<compile_context>
chip_gen: v7x
topology: tpu7x:2x2x1
jax: 0.10.0
libtpu: 0.0.40
codegen_flags: <defaults>
</compile_context>

<pallas_src>
import functools

import jax
import jax.numpy as jnp
from jax import lax
from jax.experimental import pallas as pl
from jax.experimental.pallas import tpu as pltpu

HALO = 3  # receptive-field halo of the deepest branch (3 stacked 3x3 convs)


def _shift_w(x, d):
    """Shift x (R, W, C) along W by d in {-1, +1} with zero fill (conv zero-pad in W)."""
    R, Wd, C = x.shape
    zcol = jnp.zeros((R, 1, C), x.dtype)
    if d == -1:   # out[:, w] = x[:, w-1]
        return jnp.concatenate([zcol, x[:, :Wd - 1, :]], axis=1)
    else:         # out[:, w] = x[:, w+1]
        return jnp.concatenate([x[:, 1:, :], zcol], axis=1)


def _conv3x3(x, w_ref, b_ref):
    """3x3 conv: zero 'same' padding along W, VALID along H (caller supplies halo rows).

    x: (R, W, Cin) f32; w_ref: (3, 3, Cin, Cout); b_ref: (1, Cout) BN-folded bias.
    Returns (R-2, W, Cout) f32.
    """
    R, Wd, Cin = x.shape
    Ro = R - 2
    taps = (_shift_w(x, -1), x, _shift_w(x, 1))   # input column w + dx - 1, dx = 0,1,2
    acc = None
    for dy in range(3):
        for dx in range(3):
            a = taps[dx][dy:dy + Ro]                          # static H slice (major dim, free)
            w = w_ref[dy, dx].astype(jnp.float32)             # (Cin, Cout)
            c = jnp.dot(a.reshape(Ro * Wd, Cin), w,
                        preferred_element_type=jnp.float32)   # (Ro*W, Cout)
            acc = c if acc is None else acc + c
    acc = acc + b_ref[...].astype(jnp.float32)
    return acc.reshape(Ro, Wd, -1)


def _ssh_kernel(x_ref, w3_ref, b3_ref, w51_ref, b51_ref, w52_ref, b52_ref,
                w72_ref, b72_ref, w73_ref, b73_ref, o_ref, *, th, H, leaky):
    # x_ref block: (1, H + 2*HALO, W, Cin)  -- H-padded image of one batch element
    # o_ref block: (1, th, W, Cout)         -- one output row tile
    t = pl.program_id(1)
    s = t * th                                   # first output row of this tile
    Wd = x_ref.shape[2]

    # Input rows needed by this tile: padded rows [s, s + th + 2*HALO).
    x = x_ref[0, pl.ds(s, th + 2 * HALO), :, :].astype(jnp.float32)   # (th+6, W, Cin)

    def lrelu(v):
        return jnp.where(v > 0, v, leaky * v)

    # ---- branch 1: conv3x3 (BN folded, no activation); needs only rows [2, th+4) ----
    br3 = _conv3x3(x[2:2 + th + 2], w3_ref, b3_ref)                   # (th, W, C_half)

    # ---- conv5x5_1: BN + LeakyReLU; zero rows outside the image so downstream convs
    #      see proper zero padding at the top/bottom borders. t1 row j <-> image row s-2+j.
    t1 = lrelu(_conv3x3(x, w51_ref, b51_ref))                         # (th+4, W, C_q)
    r1 = lax.broadcasted_iota(jnp.int32, (th + 4, Wd, 1), 0) + (s - 2)
    t1 = jnp.where((r1 >= 0) & (r1 < H), t1, 0.0)

    # ---- branch 2: conv5x5_2 on the central th+2 rows of t1 ----
    br5 = _conv3x3(t1[1:1 + th + 2], w52_ref, b52_ref)                # (th, W, C_q)

    # ---- conv7x7_2: BN + LeakyReLU; t2 row j <-> image row s-1+j ----
    t2 = lrelu(_conv3x3(t1, w72_ref, b72_ref))                        # (th+2, W, C_q)
    r2 = lax.broadcasted_iota(jnp.int32, (th + 2, Wd, 1), 0) + (s - 1)
    t2 = jnp.where((r2 >= 0) & (r2 < H), t2, 0.0)

    # ---- branch 3: conv7x7_3 ----
    br7 = _conv3x3(t2, w73_ref, b73_ref)                              # (th, W, C_q)

    out = jnp.concatenate([br3, br5, br7], axis=-1)                   # (th, W, Cout)
    out = jnp.maximum(out, 0.0)                                       # final ReLU
    o_ref[0] = out.astype(o_ref.dtype)


def ssh_forward(x_nchw, params, *, out_channels, th=None):
    """x_nchw: (B, Cin, H, W). Returns (B, Cout, H, W), matching PyTorch SSH (eval)."""
    (w3, b3, w51, b51, w52, b52, w72, b72, w73, b73) = params
    x = jnp.transpose(x_nchw, (0, 2, 3, 1))                 # NCHW -> NHWC
    B, H, W, Cin = x.shape
    assert W % 8 == 0, "pad W to a multiple of 8 so sublane tiling / reshapes stay free"
    Cout = out_channels
    leaky = 0.1 if out_channels <= 64 else 0.0

    if th is None:
        th = 8 if H % 8 == 0 else H
    assert H % th == 0
    nT = H // th

    # Zero-pad H by the halo once in the wrapper (== the convs' zero padding at the
    # top/bottom image border); kernel slices the rows it needs per tile.
    xp = jnp.pad(x, ((0, 0), (HALO, HALO), (0, 0), (0, 0)))

    kernel = functools.partial(_ssh_kernel, th=th, H=H, leaky=leaky)
    out = pl.pallas_call(
        kernel,
        out_shape=jax.ShapeDtypeStruct((B, H, W, Cout), x.dtype),
        grid_spec=pltpu.PrefetchScalarGridSpec(
            num_scalar_prefetch=0,
            grid=(B, nT),
            in_specs=[
                pl.BlockSpec((1, H + 2 * HALO, W, Cin), lambda b, t: (b, 0, 0, 0)),
                pl.BlockSpec(w3.shape,  lambda b, t: (0, 0, 0, 0)),
                pl.BlockSpec(b3.shape,  lambda b, t: (0, 0)),
                pl.BlockSpec(w51.shape, lambda b, t: (0, 0, 0, 0)),
                pl.BlockSpec(b51.shape, lambda b, t: (0, 0)),
                pl.BlockSpec(w52.shape, lambda b, t: (0, 0, 0, 0)),
                pl.BlockSpec(b52.shape, lambda b, t: (0, 0)),
                pl.BlockSpec(w72.shape, lambda b, t: (0, 0, 0, 0)),
                pl.BlockSpec(b72.shape, lambda b, t: (0, 0)),
                pl.BlockSpec(w73.shape, lambda b, t: (0, 0, 0, 0)),
                pl.BlockSpec(b73.shape, lambda b, t: (0, 0)),
            ],
            out_specs=pl.BlockSpec((1, th, W, Cout), lambda b, t: (b, t, 0, 0)),
        ),
        compiler_params=pltpu.CompilerParams(
            dimension_semantics=("parallel", "parallel")),
    )(xp, w3, b3, w51, b51, w52, b52, w72, b72, w73, b73)

    return jnp.transpose(out, (0, 3, 1, 2))                 # NHWC -> NCHW


def _fold_bn(w, gamma, beta, mean, var, eps=1e-5):
    """Fold eval-mode BatchNorm into conv weight (3,3,Cin,Cout) and bias (1,Cout)."""
    scale = gamma / jnp.sqrt(var + eps)
    return w * scale[None, None, None, :], (beta - mean * scale)[None, :]


def init_params(key, in_channels, out_channels):
    """Deterministic synthetic params (conv weights in HWIO + folded BatchNorm)."""
    assert out_channels % 4 == 0
    # NOTE: the PyTorch module declares conv7x7_2 with in_channels // 4 input channels
    # but feeds it conv5x5_1's output (out_channels // 4 channels); it only runs when
    # those match, so we require it here as well.
    assert in_channels // 4 == out_channels // 4
    c_half, c_q = out_channels // 2, out_channels // 4
    ks = jax.random.split(key, 5)

    def make_conv_bn(k, cin, cout, idx):
        w = jax.random.normal(k, (3, 3, cin, cout), jnp.float32) * (0.3 / cin)
        gamma = 1.0 + 0.1 * jnp.cos(jnp.arange(cout, dtype=jnp.float32) + idx)
        beta = 0.05 * jnp.sin(jnp.arange(cout, dtype=jnp.float32) - idx)
        mean = 0.02 * jnp.arange(cout, dtype=jnp.float32)
        var = 1.0 + 0.05 * jnp.arange(cout, dtype=jnp.float32)
        return _fold_bn(w, gamma, beta, mean, var)

    w3, b3 = make_conv_bn(ks[0], in_channels, c_half, 0)
    w51, b51 = make_conv_bn(ks[1], in_channels, c_q, 1)
    w52, b52 = make_conv_bn(ks[2], c_q, c_q, 2)
    w72, b72 = make_conv_bn(ks[3], c_q, c_q, 3)
    w73, b73 = make_conv_bn(ks[4], c_q, c_q, 4)
    return (w3, b3, w51, b51, w52, b52, w72, b72, w73, b73)


def ssh_reference(x_nchw, params, *, out_channels):
    """Pure-JAX reference (lax.conv_general_dilated) for correctness checking."""
    (w3, b3, w51, b51, w52, b52, w72, b72, w73, b73) = params
    leaky = 0.1 if out_channels <= 64 else 0.0
    x = jnp.transpose(x_nchw, (0, 2, 3, 1))

    def conv(t, w, b):
        y = lax.conv_general_dilated(
            t, w, window_strides=(1, 1), padding='SAME',
            dimension_numbers=('NHWC', 'HWIO', 'NHWC'))
        return y + b.reshape(1, 1, 1, -1)

    def lrelu(t):
        return jnp.where(t > 0, t, leaky * t)

    c3 = conv(x, w3, b3)
    t1 = lrelu(conv(x, w51, b51))
    c5 = conv(t1, w52, b52)
    t2 = lrelu(conv(t1, w72, b72))
    c7 = conv(t2, w73, b73)
    out = jnp.maximum(jnp.concatenate([c3, c5, c7], axis=-1), 0.0)
    return jnp.transpose(out, (0, 3, 1, 2))


if __name__ == "__main__":
    B, Cin, H, W = 2, 8, 16, 16
    Cout = 8   # SSH: out % 4 == 0; module as written also needs in//4 == out//4

    key = jax.random.PRNGKey(0)
    kx, kp = jax.random.split(key)
    x = jax.random.normal(kx, (B, Cin, H, W), jnp.float32)
    params = init_params(kp, Cin, Cout)

    out = ssh_forward(x, params, out_channels=Cout, th=8)
    out = jax.block_until_ready(out)

    ref = ssh_reference(x, params, out_channels=Cout)
    assert out.shape == (B, Cout, H, W)
    err = float(jnp.max(jnp.abs(out - ref)))
    assert jnp.allclose(out, ref, atol=1e-4, rtol=1e-4), f"max abs err {err}"

    print("KERNEL_OK")
</pallas_src>

<mosaic_0001>
module attributes {stable_mosaic.version = 11 : i64} {
  func.func @_ssh_kernel(%arg0: i32, %arg1: i32, %arg2: memref<1x22x16x8xf32, #tpu.memory_space<vmem>>, %arg3: memref<3x3x8x4xf32, #tpu.memory_space<vmem>>, %arg4: memref<1x4xf32, #tpu.memory_space<vmem>>, %arg5: memref<3x3x8x2xf32, #tpu.memory_space<vmem>>, %arg6: memref<1x2xf32, #tpu.memory_space<vmem>>, %arg7: memref<3x3x2x2xf32, #tpu.memory_space<vmem>>, %arg8: memref<1x2xf32, #tpu.memory_space<vmem>>, %arg9: memref<3x3x2x2xf32, #tpu.memory_space<vmem>>, %arg10: memref<1x2xf32, #tpu.memory_space<vmem>>, %arg11: memref<3x3x2x2xf32, #tpu.memory_space<vmem>>, %arg12: memref<1x2xf32, #tpu.memory_space<vmem>>, %arg13: memref<1x8x16x8xf32, #tpu.memory_space<vmem>>) attributes {dimension_semantics = [#tpu.dimension_semantics<parallel>, #tpu.dimension_semantics<parallel>], iteration_bounds = array<i64: 2, 2>, scalar_prefetch = 0 : i64, scratch_operands = 0 : i64, tpu.core_type = #tpu.core_type<tc>, window_params = [{transform_indices = @transform_0, window_bounds = array<i64: 1, 22, 16, 8>}, {pipeline_mode = #tpu.pipeline_mode<synchronous>, transform_indices = @transform_1, window_bounds = array<i64: 3, 3, 8, 4>}, {pipeline_mode = #tpu.pipeline_mode<synchronous>, transform_indices = @transform_2, window_bounds = array<i64: 1, 4>}, {pipeline_mode = #tpu.pipeline_mode<synchronous>, transform_indices = @transform_3, window_bounds = array<i64: 3, 3, 8, 2>}, {pipeline_mode = #tpu.pipeline_mode<synchronous>, transform_indices = @transform_4, window_bounds = array<i64: 1, 2>}, {pipeline_mode = #tpu.pipeline_mode<synchronous>, transform_indices = @transform_5, window_bounds = array<i64: 3, 3, 2, 2>}, {pipeline_mode = #tpu.pipeline_mode<synchronous>, transform_indices = @transform_6, window_bounds = array<i64: 1, 2>}, {pipeline_mode = #tpu.pipeline_mode<synchronous>, transform_indices = @transform_7, window_bounds = array<i64: 3, 3, 2, 2>}, {pipeline_mode = #tpu.pipeline_mode<synchronous>, transform_indices = @transform_8, window_bounds = array<i64: 1, 2>}, {pipeline_mode = #tpu.pipeline_mode<synchronous>, transform_indices = @transform_9, window_bounds = array<i64: 3, 3, 2, 2>}, {pipeline_mode = #tpu.pipeline_mode<synchronous>, transform_indices = @transform_10, window_bounds = array<i64: 1, 2>}, {transform_indices = @transform_11, window_bounds = array<i64: 1, 8, 16, 8>}]} {
    %c8_i32 = arith.constant 8 : i32
    %0 = arith.muli %arg1, %c8_i32 : i32
    %c0 = arith.constant 0 : index
    %1 = arith.index_cast %0 : i32 to index
    %c0_0 = arith.constant 0 : index
    %c0_1 = arith.constant 0 : index
    %2 = vector.load %arg2[%c0, %1, %c0_0, %c0_1] : memref<1x22x16x8xf32, #tpu.memory_space<vmem>>, vector<1x14x16x8xf32>
    %3 = vector.shape_cast %2 : vector<1x14x16x8xf32> to vector<14x16x8xf32>
    %4 = vector.extract_strided_slice %3 {offsets = [2, 0, 0], sizes = [10, 16, 8], strides = [1, 1, 1]} : vector<14x16x8xf32> to vector<10x16x8xf32>
    %cst = arith.constant 0.000000e+00 : f32
    %5 = vector.broadcast %cst : f32 to vector<10x1x8xf32>
    %6 = vector.extract_strided_slice %4 {offsets = [0, 0, 0], sizes = [10, 15, 8], strides = [1, 1, 1]} : vector<10x16x8xf32> to vector<10x15x8xf32>
    %7 = tpu.concatenate %5, %6 in 1 : vector<10x1x8xf32>, vector<10x15x8xf32> -> vector<10x16x8xf32>
    %cst_2 = arith.constant 0.000000e+00 : f32
    %8 = vector.broadcast %cst_2 : f32 to vector<10x1x8xf32>
    %9 = vector.extract_strided_slice %4 {offsets = [0, 1, 0], sizes = [10, 15, 8], strides = [1, 1, 1]} : vector<10x16x8xf32> to vector<10x15x8xf32>
    %10 = tpu.concatenate %9, %8 in 1 : vector<10x15x8xf32>, vector<10x1x8xf32> -> vector<10x16x8xf32>
    %11 = vector.extract_strided_slice %7 {offsets = [0, 0, 0], sizes = [8, 16, 8], strides = [1, 1, 1]} : vector<10x16x8xf32> to vector<8x16x8xf32>
    %c0_3 = arith.constant 0 : index
    %c0_4 = arith.constant 0 : index
    %c0_5 = arith.constant 0 : index
    %c0_6 = arith.constant 0 : index
    %12 = vector.load %arg3[%c0_3, %c0_4, %c0_5, %c0_6] : memref<3x3x8x4xf32, #tpu.memory_space<vmem>>, vector<1x1x8x4xf32>
    %13 = vector.shape_cast %12 : vector<1x1x8x4xf32> to vector<8x4xf32>
    %14 = vector.shape_cast %11 : vector<8x16x8xf32> to vector<128x8xf32>
    %cst_7 = arith.constant dense<0.000000e+00> : vector<128x4xf32>
    %15 = tpu.matmul %14, %13, %cst_7 {dimension_numbers = #tpu.dot_dimension_numbers<[1], [0], [0], [1], [0, 0, 1, 1], [], []>} : vector<128x8xf32>, vector<8x4xf32>, vector<128x4xf32> -> vector<128x4xf32>
    %16 = vector.extract_strided_slice %4 {offsets = [0, 0, 0], sizes = [8, 16, 8], strides = [1, 1, 1]} : vector<10x16x8xf32> to vector<8x16x8xf32>
    %c0_8 = arith.constant 0 : index
    %c1 = arith.constant 1 : index
    %c0_9 = arith.constant 0 : index
    %c0_10 = arith.constant 0 : index
    %17 = vector.load %arg3[%c0_8, %c1, %c0_9, %c0_10] : memref<3x3x8x4xf32, #tpu.memory_space<vmem>>, vector<1x1x8x4xf32>
    %18 = vector.shape_cast %17 : vector<1x1x8x4xf32> to vector<8x4xf32>
    %19 = vector.shape_cast %16 : vector<8x16x8xf32> to vector<128x8xf32>
    %cst_11 = arith.constant dense<0.000000e+00> : vector<128x4xf32>
    %20 = tpu.matmul %19, %18, %cst_11 {dimension_numbers = #tpu.dot_dimension_numbers<[1], [0], [0], [1], [0, 0, 1, 1], [], []>} : vector<128x8xf32>, vector<8x4xf32>, vector<128x4xf32> -> vector<128x4xf32>
    %21 = arith.addf %15, %20 : vector<128x4xf32>
    %22 = vector.extract_strided_slice %10 {offsets = [0, 0, 0], sizes = [8, 16, 8], strides = [1, 1, 1]} : vector<10x16x8xf32> to vector<8x16x8xf32>
    %c0_12 = arith.constant 0 : index
    %c2 = arith.constant 2 : index
    %c0_13 = arith.constant 0 : index
    %c0_14 = arith.constant 0 : index
    %23 = vector.load %arg3[%c0_12, %c2, %c0_13, %c0_14] : memref<3x3x8x4xf32, #tpu.memory_space<vmem>>, vector<1x1x8x4xf32>
    %24 = vector.shape_cast %23 : vector<1x1x8x4xf32> to vector<8x4xf32>
    %25 = vector.shape_cast %22 : vector<8x16x8xf32> to vector<128x8xf32>
    %cst_15 = arith.constant dense<0.000000e+00> : vector<128x4xf32>
    %26 = tpu.matmul %25, %24, %cst_15 {dimension_numbers = #tpu.dot_dimension_numbers<[1], [0], [0], [1], [0, 0, 1, 1], [], []>} : vector<128x8xf32>, vector<8x4xf32>, vector<128x4xf32> -> vector<128x4xf32>
    %27 = arith.addf %21, %26 : vector<128x4xf32>
    %28 = vector.extract_strided_slice %7 {offsets = [1, 0, 0], sizes = [8, 16, 8], strides = [1, 1, 1]} : vector<10x16x8xf32> to vector<8x16x8xf32>
    %c1_16 = arith.constant 1 : index
    %c0_17 = arith.constant 0 : index
    %c0_18 = arith.constant 0 : index
    %c0_19 = arith.constant 0 : index
    %29 = vector.load %arg3[%c1_16, %c0_17, %c0_18, %c0_19] : memref<3x3x8x4xf32, #tpu.memory_space<vmem>>, vector<1x1x8x4xf32>
    %30 = vector.shape_cast %29 : vector<1x1x8x4xf32> to vector<8x4xf32>
    %31 = vector.shape_cast %28 : vector<8x16x8xf32> to vector<128x8xf32>
    %cst_20 = arith.constant dense<0.000000e+00> : vector<128x4xf32>
    %32 = tpu.matmul %31, %30, %cst_20 {dimension_numbers = #tpu.dot_dimension_numbers<[1], [0], [0], [1], [0, 0, 1, 1], [], []>} : vector<128x8xf32>, vector<8x4xf32>, vector<128x4xf32> -> vector<128x4xf32>
    %33 = arith.addf %27, %32 : vector<128x4xf32>
    %34 = vector.extract_strided_slice %4 {offsets = [1, 0, 0], sizes = [8, 16, 8], strides = [1, 1, 1]} : vector<10x16x8xf32> to vector<8x16x8xf32>
    %c1_21 = arith.constant 1 : index
    %c1_22 = arith.constant 1 : index
    %c0_23 = arith.constant 0 : index
    %c0_24 = arith.constant 0 : index
    %35 = vector.load %arg3[%c1_21, %c1_22, %c0_23, %c0_24] : memref<3x3x8x4xf32, #tpu.memory_space<vmem>>, vector<1x1x8x4xf32>
    %36 = vector.shape_cast %35 : vector<1x1x8x4xf32> to vector<8x4xf32>
    %37 = vector.shape_cast %34 : vector<8x16x8xf32> to vector<128x8xf32>
    %cst_25 = arith.constant dense<0.000000e+00> : vector<128x4xf32>
    %38 = tpu.matmul %37, %36, %cst_25 {dimension_numbers = #tpu.dot_dimension_numbers<[1], [0], [0], [1], [0, 0, 1, 1], [], []>} : vector<128x8xf32>, vector<8x4xf32>, vector<128x4xf32> -> vector<128x4xf32>
    %39 = arith.addf %33, %38 : vector<128x4xf32>
    %40 = vector.extract_strided_slice %10 {offsets = [1, 0, 0], sizes = [8, 16, 8], strides = [1, 1, 1]} : vector<10x16x8xf32> to vector<8x16x8xf32>
    %c1_26 = arith.constant 1 : index
    %c2_27 = arith.constant 2 : index
    %c0_28 = arith.constant 0 : index
    %c0_29 = arith.constant 0 : index
    %41 = vector.load %arg3[%c1_26, %c2_27, %c0_28, %c0_29] : memref<3x3x8x4xf32, #tpu.memory_space<vmem>>, vector<1x1x8x4xf32>
    %42 = vector.shape_cast %41 : vector<1x1x8x4xf32> to vector<8x4xf32>
    %43 = vector.shape_cast %40 : vector<8x16x8xf32> to vector<128x8xf32>
    %cst_30 = arith.constant dense<0.000000e+00> : vector<128x4xf32>
    %44 = tpu.matmul %43, %42, %cst_30 {dimension_numbers = #tpu.dot_dimension_numbers<[1], [0], [0], [1], [0, 0, 1, 1], [], []>} : vector<128x8xf32>, vector<8x4xf32>, vector<128x4xf32> -> vector<128x4xf32>
    %45 = arith.addf %39, %44 : vector<128x4xf32>
    %46 = vector.extract_strided_slice %7 {offsets = [2, 0, 0], sizes = [8, 16, 8], strides = [1, 1, 1]} : vector<10x16x8xf32> to vector<8x16x8xf32>
    %c2_31 = arith.constant 2 : index
    %c0_32 = arith.constant 0 : index
    %c0_33 = arith.constant 0 : index
    %c0_34 = arith.constant 0 : index
    %47 = vector.load %arg3[%c2_31, %c0_32, %c0_33, %c0_34] : memref<3x3x8x4xf32, #tpu.memory_space<vmem>>, vector<1x1x8x4xf32>
    %48 = vector.shape_cast %47 : vector<1x1x8x4xf32> to vector<8x4xf32>
    %49 = vector.shape_cast %46 : vector<8x16x8xf32> to vector<128x8xf32>
    %cst_35 = arith.constant dense<0.000000e+00> : vector<128x4xf32>
    %50 = tpu.matmul %49, %48, %cst_35 {dimension_numbers = #tpu.dot_dimension_numbers<[1], [0], [0], [1], [0, 0, 1, 1], [], []>} : vector<128x8xf32>, vector<8x4xf32>, vector<128x4xf32> -> vector<128x4xf32>
    %51 = arith.addf %45, %50 : vector<128x4xf32>
    %52 = vector.extract_strided_slice %4 {offsets = [2, 0, 0], sizes = [8, 16, 8], strides = [1, 1, 1]} : vector<10x16x8xf32> to vector<8x16x8xf32>
    %c2_36 = arith.constant 2 : index
    %c1_37 = arith.constant 1 : index
    %c0_38 = arith.constant 0 : index
    %c0_39 = arith.constant 0 : index
    %53 = vector.load %arg3[%c2_36, %c1_37, %c0_38, %c0_39] : memref<3x3x8x4xf32, #tpu.memory_space<vmem>>, vector<1x1x8x4xf32>
    %54 = vector.shape_cast %53 : vector<1x1x8x4xf32> to vector<8x4xf32>
    %55 = vector.shape_cast %52 : vector<8x16x8xf32> to vector<128x8xf32>
    %cst_40 = arith.constant dense<0.000000e+00> : vector<128x4xf32>
    %56 = tpu.matmul %55, %54, %cst_40 {dimension_numbers = #tpu.dot_dimension_numbers<[1], [0], [0], [1], [0, 0, 1, 1], [], []>} : vector<128x8xf32>, vector<8x4xf32>, vector<128x4xf32> -> vector<128x4xf32>
    %57 = arith.addf %51, %56 : vector<128x4xf32>
    %58 = vector.extract_strided_slice %10 {offsets = [2, 0, 0], sizes = [8, 16, 8], strides = [1, 1, 1]} : vector<10x16x8xf32> to vector<8x16x8xf32>
    %c2_41 = arith.constant 2 : index
    %c2_42 = arith.constant 2 : index
    %c0_43 = arith.constant 0 : index
    %c0_44 = arith.constant 0 : index
    %59 = vector.load %arg3[%c2_41, %c2_42, %c0_43, %c0_44] : memref<3x3x8x4xf32, #tpu.memory_space<vmem>>, vector<1x1x8x4xf32>
    %60 = vector.shape_cast %59 : vector<1x1x8x4xf32> to vector<8x4xf32>
    %61 = vector.shape_cast %58 : vector<8x16x8xf32> to vector<128x8xf32>
    %cst_45 = arith.constant dense<0.000000e+00> : vector<128x4xf32>
    %62 = tpu.matmul %61, %60, %cst_45 {dimension_numbers = #tpu.dot_dimension_numbers<[1], [0], [0], [1], [0, 0, 1, 1], [], []>} : vector<128x8xf32>, vector<8x4xf32>, vector<128x4xf32> -> vector<128x4xf32>
    %63 = arith.addf %57, %62 : vector<128x4xf32>
    %c0_46 = arith.constant 0 : index
    %c0_47 = arith.constant 0 : index
    %64 = vector.load %arg4[%c0_46, %c0_47] : memref<1x4xf32, #tpu.memory_space<vmem>>, vector<1x4xf32>
    %65 = vector.broadcast %64 : vector<1x4xf32> to vector<128x4xf32>
    %66 = arith.addf %63, %65 : vector<128x4xf32>
    %67 = vector.shape_cast %66 : vector<128x4xf32> to vector<8x16x4xf32>
    %cst_48 = arith.constant 0.000000e+00 : f32
    %68 = vector.broadcast %cst_48 : f32 to vector<14x1x8xf32>
    %69 = vector.extract_strided_slice %3 {offsets = [0, 0, 0], sizes = [14, 15, 8], strides = [1, 1, 1]} : vector<14x16x8xf32> to vector<14x15x8xf32>
    %70 = tpu.concatenate %68, %69 in 1 : vector<14x1x8xf32>, vector<14x15x8xf32> -> vector<14x16x8xf32>
    %cst_49 = arith.constant 0.000000e+00 : f32
    %71 = vector.broadcast %cst_49 : f32 to vector<14x1x8xf32>
    %72 = vector.extract_strided_slice %3 {offsets = [0, 1, 0], sizes = [14, 15, 8], strides = [1, 1, 1]} : vector<14x16x8xf32> to vector<14x15x8xf32>
    %73 = tpu.concatenate %72, %71 in 1 : vector<14x15x8xf32>, vector<14x1x8xf32> -> vector<14x16x8xf32>
    %74 = vector.extract_strided_slice %70 {offsets = [0, 0, 0], sizes = [12, 16, 8], strides = [1, 1, 1]} : vector<14x16x8xf32> to vector<12x16x8xf32>
    %c0_50 = arith.constant 0 : index
    %c0_51 = arith.constant 0 : index
    %c0_52 = arith.constant 0 : index
    %c0_53 = arith.constant 0 : index
    %75 = vector.load %arg5[%c0_50, %c0_51, %c0_52, %c0_53] : memref<3x3x8x2xf32, #tpu.memory_space<vmem>>, vector<1x1x8x2xf32>
    %76 = vector.shape_cast %75 : vector<1x1x8x2xf32> to vector<8x2xf32>
    %77 = vector.shape_cast %74 : vector<12x16x8xf32> to vector<192x8xf32>
    %cst_54 = arith.constant dense<0.000000e+00> : vector<192x2xf32>
    %78 = tpu.matmul %77, %76, %cst_54 {dimension_numbers = #tpu.dot_dimension_numbers<[1], [0], [0], [1], [0, 0, 1, 1], [], []>} : vector<192x8xf32>, vector<8x2xf32>, vector<192x2xf32> -> vector<192x2xf32>
    %79 = vector.extract_strided_slice %3 {offsets = [0, 0, 0], sizes = [12, 16, 8], strides = [1, 1, 1]} : vector<14x16x8xf32> to vector<12x16x8xf32>
    %c0_55 = arith.constant 0 : index
    %c1_56 = arith.constant 1 : index
    %c0_57 = arith.constant 0 : index
    %c0_58 = arith.constant 0 : index
    %80 = vector.load %arg5[%c0_55, %c1_56, %c0_57, %c0_58] : memref<3x3x8x2xf32, #tpu.memory_space<vmem>>, vector<1x1x8x2xf32>
    %81 = vector.shape_cast %80 : vector<1x1x8x2xf32> to vector<8x2xf32>
    %82 = vector.shape_cast %79 : vector<12x16x8xf32> to vector<192x8xf32>
    %cst_59 = arith.constant dense<0.000000e+00> : vector<192x2xf32>
    %83 = tpu.matmul %82, %81, %cst_59 {dimension_numbers = #tpu.dot_dimension_numbers<[1], [0], [0], [1], [0, 0, 1, 1], [], []>} : vector<192x8xf32>, vector<8x2xf32>, vector<192x2xf32> -> vector<192x2xf32>
    %84 = arith.addf %78, %83 : vector<192x2xf32>
    %85 = vector.extract_strided_slice %73 {offsets = [0, 0, 0], sizes = [12, 16, 8], strides = [1, 1, 1]} : vector<14x16x8xf32> to vector<12x16x8xf32>
    %c0_60 = arith.constant 0 : index
    %c2_61 = arith.constant 2 : index
    %c0_62 = arith.constant 0 : index
    %c0_63 = arith.constant 0 : index
    %86 = vector.load %arg5[%c0_60, %c2_61, %c0_62, %c0_63] : memref<3x3x8x2xf32, #tpu.memory_space<vmem>>, vector<1x1x8x2xf32>
    %87 = vector.shape_cast %86 : vector<1x1x8x2xf32> to vector<8x2xf32>
    %88 = vector.shape_cast %85 : vector<12x16x8xf32> to vector<192x8xf32>
    %cst_64 = arith.constant dense<0.000000e+00> : vector<192x2xf32>
    %89 = tpu.matmul %88, %87, %cst_64 {dimension_numbers = #tpu.dot_dimension_numbers<[1], [0], [0], [1], [0, 0, 1, 1], [], []>} : vector<192x8xf32>, vector<8x2xf32>, vector<192x2xf32> -> vector<192x2xf32>
    %90 = arith.addf %84, %89 : vector<192x2xf32>
    %91 = vector.extract_strided_slice %70 {offsets = [1, 0, 0], sizes = [12, 16, 8], strides = [1, 1, 1]} : vector<14x16x8xf32> to vector<12x16x8xf32>
    %c1_65 = arith.constant 1 : index
    %c0_66 = arith.constant 0 : index
    %c0_67 = arith.constant 0 : index
    %c0_68 = arith.constant 0 : index
    %92 = vector.load %arg5[%c1_65, %c0_66, %c0_67, %c0_68] : memref<3x3x8x2xf32, #tpu.memory_space<vmem>>, vector<1x1x8x2xf32>
    %93 = vector.shape_cast %92 : vector<1x1x8x2xf32> to vector<8x2xf32>
    %94 = vector.shape_cast %91 : vector<12x16x8xf32> to vector<192x8xf32>
    %cst_69 = arith.constant dense<0.000000e+00> : vector<192x2xf32>
    %95 = tpu.matmul %94, %93, %cst_69 {dimension_numbers = #tpu.dot_dimension_numbers<[1], [0], [0], [1], [0, 0, 1, 1], [], []>} : vector<192x8xf32>, vector<8x2xf32>, vector<192x2xf32> -> vector<192x2xf32>
    %96 = arith.addf %90, %95 : vector<192x2xf32>
    %97 = vector.extract_strided_slice %3 {offsets = [1, 0, 0], sizes = [12, 16, 8], strides = [1, 1, 1]} : vector<14x16x8xf32> to vector<12x16x8xf32>
    %c1_70 = arith.constant 1 : index
    %c1_71 = arith.constant 1 : index
    %c0_72 = arith.constant 0 : index
    %c0_73 = arith.constant 0 : index
    %98 = vector.load %arg5[%c1_70, %c1_71, %c0_72, %c0_73] : memref<3x3x8x2xf32, #tpu.memory_space<vmem>>, vector<1x1x8x2xf32>
    %99 = vector.shape_cast %98 : vector<1x1x8x2xf32> to vector<8x2xf32>
    %100 = vector.shape_cast %97 : vector<12x16x8xf32> to vector<192x8xf32>
    %cst_74 = arith.constant dense<0.000000e+00> : vector<192x2xf32>
    %101 = tpu.matmul %100, %99, %cst_74 {dimension_numbers = #tpu.dot_dimension_numbers<[1], [0], [0], [1], [0, 0, 1, 1], [], []>} : vector<192x8xf32>, vector<8x2xf32>, vector<192x2xf32> -> vector<192x2xf32>
    %102 = arith.addf %96, %101 : vector<192x2xf32>
    %103 = vector.extract_strided_slice %73 {offsets = [1, 0, 0], sizes = [12, 16, 8], strides = [1, 1, 1]} : vector<14x16x8xf32> to vector<12x16x8xf32>
    %c1_75 = arith.constant 1 : index
    %c2_76 = arith.constant 2 : index
    %c0_77 = arith.constant 0 : index
    %c0_78 = arith.constant 0 : index
    %104 = vector.load %arg5[%c1_75, %c2_76, %c0_77, %c0_78] : memref<3x3x8x2xf32, #tpu.memory_space<vmem>>, vector<1x1x8x2xf32>
    %105 = vector.shape_cast %104 : vector<1x1x8x2xf32> to vector<8x2xf32>
    %106 = vector.shape_cast %103 : vector<12x16x8xf32> to vector<192x8xf32>
    %cst_79 = arith.constant dense<0.000000e+00> : vector<192x2xf32>
    %107 = tpu.matmul %106, %105, %cst_79 {dimension_numbers = #tpu.dot_dimension_numbers<[1], [0], [0], [1], [0, 0, 1, 1], [], []>} : vector<192x8xf32>, vector<8x2xf32>, vector<192x2xf32> -> vector<192x2xf32>
    %108 = arith.addf %102, %107 : vector<192x2xf32>
    %109 = vector.extract_strided_slice %70 {offsets = [2, 0, 0], sizes = [12, 16, 8], strides = [1, 1, 1]} : vector<14x16x8xf32> to vector<12x16x8xf32>
    %c2_80 = arith.constant 2 : index
    %c0_81 = arith.constant 0 : index
    %c0_82 = arith.constant 0 : index
    %c0_83 = arith.constant 0 : index
    %110 = vector.load %arg5[%c2_80, %c0_81, %c0_82, %c0_83] : memref<3x3x8x2xf32, #tpu.memory_space<vmem>>, vector<1x1x8x2xf32>
    %111 = vector.shape_cast %110 : vector<1x1x8x2xf32> to vector<8x2xf32>
    %112 = vector.shape_cast %109 : vector<12x16x8xf32> to vector<192x8xf32>
    %cst_84 = arith.constant dense<0.000000e+00> : vector<192x2xf32>
    %113 = tpu.matmul %112, %111, %cst_84 {dimension_numbers = #tpu.dot_dimension_numbers<[1], [0], [0], [1], [0, 0, 1, 1], [], []>} : vector<192x8xf32>, vector<8x2xf32>, vector<192x2xf32> -> vector<192x2xf32>
    %114 = arith.addf %108, %113 : vector<192x2xf32>
    %115 = vector.extract_strided_slice %3 {offsets = [2, 0, 0], sizes = [12, 16, 8], strides = [1, 1, 1]} : vector<14x16x8xf32> to vector<12x16x8xf32>
    %c2_85 = arith.constant 2 : index
    %c1_86 = arith.constant 1 : index
    %c0_87 = arith.constant 0 : index
    %c0_88 = arith.constant 0 : index
    %116 = vector.load %arg5[%c2_85, %c1_86, %c0_87, %c0_88] : memref<3x3x8x2xf32, #tpu.memory_space<vmem>>, vector<1x1x8x2xf32>
    %117 = vector.shape_cast %116 : vector<1x1x8x2xf32> to vector<8x2xf32>
    %118 = vector.shape_cast %115 : vector<12x16x8xf32> to vector<192x8xf32>
    %cst_89 = arith.constant dense<0.000000e+00> : vector<192x2xf32>
    %119 = tpu.matmul %118, %117, %cst_89 {dimension_numbers = #tpu.dot_dimension_numbers<[1], [0], [0], [1], [0, 0, 1, 1], [], []>} : vector<192x8xf32>, vector<8x2xf32>, vector<192x2xf32> -> vector<192x2xf32>
    %120 = arith.addf %114, %119 : vector<192x2xf32>
    %121 = vector.extract_strided_slice %73 {offsets = [2, 0, 0], sizes = [12, 16, 8], strides = [1, 1, 1]} : vector<14x16x8xf32> to vector<12x16x8xf32>
    %c2_90 = arith.constant 2 : index
    %c2_91 = arith.constant 2 : index
    %c0_92 = arith.constant 0 : index
    %c0_93 = arith.constant 0 : index
    %122 = vector.load %arg5[%c2_90, %c2_91, %c0_92, %c0_93] : memref<3x3x8x2xf32, #tpu.memory_space<vmem>>, vector<1x1x8x2xf32>
    %123 = vector.shape_cast %122 : vector<1x1x8x2xf32> to vector<8x2xf32>
    %124 = vector.shape_cast %121 : vector<12x16x8xf32> to vector<192x8xf32>
    %cst_94 = arith.constant dense<0.000000e+00> : vector<192x2xf32>
    %125 = tpu.matmul %124, %123, %cst_94 {dimension_numbers = #tpu.dot_dimension_numbers<[1], [0], [0], [1], [0, 0, 1, 1], [], []>} : vector<192x8xf32>, vector<8x2xf32>, vector<192x2xf32> -> vector<192x2xf32>
    %126 = arith.addf %120, %125 : vector<192x2xf32>
    %c0_95 = arith.constant 0 : index
    %c0_96 = arith.constant 0 : index
    %127 = vector.load %arg6[%c0_95, %c0_96] : memref<1x2xf32, #tpu.memory_space<vmem>>, vector<1x2xf32>
    %128 = vector.broadcast %127 : vector<1x2xf32> to vector<192x2xf32>
    %129 = arith.addf %126, %128 : vector<192x2xf32>
    %130 = vector.shape_cast %129 : vector<192x2xf32> to vector<12x16x2xf32>
    %cst_97 = arith.constant 0.000000e+00 : f32
    %131 = vector.broadcast %cst_97 : f32 to vector<12x16x2xf32>
    %132 = arith.cmpf ogt, %130, %131 : vector<12x16x2xf32>
    %cst_98 = arith.constant 1.000000e-01 : f32
    %133 = vector.broadcast %cst_98 : f32 to vector<12x16x2xf32>
    %134 = arith.mulf %133, %130 : vector<12x16x2xf32>
    %135 = arith.select %132, %130, %134 : vector<12x16x2xi1>, vector<12x16x2xf32>
    %136 = tpu.iota {dimensions = array<i32: 0>} : vector<12x16x1xi32>
    %c2_i32 = arith.constant 2 : i32
    %137 = arith.subi %0, %c2_i32 : i32
    %138 = vector.broadcast %137 : i32 to vector<12x16x1xi32>
    %139 = arith.addi %136, %138 : vector<12x16x1xi32>
    %c0_i32 = arith.constant 0 : i32
    %140 = vector.broadcast %c0_i32 : i32 to vector<12x16x1xi32>
    %141 = arith.cmpi sge, %139, %140 : vector<12x16x1xi32>
    %c16_i32 = arith.constant 16 : i32
    %142 = vector.broadcast %c16_i32 : i32 to vector<12x16x1xi32>
    %143 = arith.cmpi slt, %139, %142 : vector<12x16x1xi32>
    %144 = arith.andi %141, %143 : vector<12x16x1xi1>
    %cst_99 = arith.constant 0.000000e+00 : f32
    %145 = vector.shape_cast %144 : vector<12x16x1xi1> to vector<12x16x1xi1>
    %146 = vector.broadcast %145 : vector<12x16x1xi1> to vector<12x16x2xi1>
    %147 = vector.broadcast %cst_99 : f32 to vector<12x16x2xf32>
    %148 = arith.select %146, %135, %147 : vector<12x16x2xi1>, vector<12x16x2xf32>
    %149 = vector.extract_strided_slice %148 {offsets = [1, 0, 0], sizes = [10, 16, 2], strides = [1, 1, 1]} : vector<12x16x2xf32> to vector<10x16x2xf32>
    %cst_100 = arith.constant 0.000000e+00 : f32
    %150 = vector.broadcast %cst_100 : f32 to vector<10x1x2xf32>
    %151 = vector.extract_strided_slice %149 {offsets = [0, 0, 0], sizes = [10, 15, 2], strides = [1, 1, 1]} : vector<10x16x2xf32> to vector<10x15x2xf32>
    %152 = tpu.concatenate %150, %151 in 1 : vector<10x1x2xf32>, vector<10x15x2xf32> -> vector<10x16x2xf32>
    %cst_101 = arith.constant 0.000000e+00 : f32
    %153 = vector.broadcast %cst_101 : f32 to vector<10x1x2xf32>
    %154 = vector.extract_strided_slice %149 {offsets = [0, 1, 0], sizes = [10, 15, 2], strides = [1, 1, 1]} : vector<10x16x2xf32> to vector<10x15x2xf32>
    %155 = tpu.concatenate %154, %153 in 1 : vector<10x15x2xf32>, vector<10x1x2xf32> -> vector<10x16x2xf32>
    %156 = vector.extract_strided_slice %152 {offsets = [0, 0, 0], sizes = [8, 16, 2], strides = [1, 1, 1]} : vector<10x16x2xf32> to vector<8x16x2xf32>
    %c0_102 = arith.constant 0 : index
    %c0_103 = arith.constant 0 : index
    %c0_104 = arith.constant 0 : index
    %c0_105 = arith.constant 0 : index
    %157 = vector.load %arg7[%c0_102, %c0_103, %c0_104, %c0_105] : memref<3x3x2x2xf32, #tpu.memory_space<vmem>>, vector<1x1x2x2xf32>
    %158 = vector.shape_cast %157 : vector<1x1x2x2xf32> to vector<2x2xf32>
    %159 = vector.shape_cast %156 : vector<8x16x2xf32> to vector<128x2xf32>
    %cst_106 = arith.constant dense<0.000000e+00> : vector<128x2xf32>
    %160 = tpu.matmul %159, %158, %cst_106 {dimension_numbers = #tpu.dot_dimension_numbers<[1], [0], [0], [1], [0, 0, 1, 1], [], []>} : vector<128x2xf32>, vector<2x2xf32>, vector<128x2xf32> -> vector<128x2xf32>
    %161 = vector.extract_strided_slice %149 {offsets = [0, 0, 0], sizes = [8, 16, 2], strides = [1, 1, 1]} : vector<10x16x2xf32> to vector<8x16x2xf32>
    %c0_107 = arith.constant 0 : index
    %c1_108 = arith.constant 1 : index
    %c0_109 = arith.constant 0 : index
    %c0_110 = arith.constant 0 : index
    %162 = vector.load %arg7[%c0_107, %c1_108, %c0_109, %c0_110] : memref<3x3x2x2xf32, #tpu.memory_space<vmem>>, vector<1x1x2x2xf32>
    %163 = vector.shape_cast %162 : vector<1x1x2x2xf32> to vector<2x2xf32>
    %164 = vector.shape_cast %161 : vector<8x16x2xf32> to vector<128x2xf32>
    %cst_111 = arith.constant dense<0.000000e+00> : vector<128x2xf32>
    %165 = tpu.matmul %164, %163, %cst_111 {dimension_numbers = #tpu.dot_dimension_numbers<[1], [0], [0], [1], [0, 0, 1, 1], [], []>} : vector<128x2xf32>, vector<2x2xf32>, vector<128x2xf32> -> vector<128x2xf32>
    %166 = arith.addf %160, %165 : vector<128x2xf32>
    %167 = vector.extract_strided_slice %155 {offsets = [0, 0, 0], sizes = [8, 16, 2], strides = [1, 1, 1]} : vector<10x16x2xf32> to vector<8x16x2xf32>
    %c0_112 = arith.constant 0 : index
    %c2_113 = arith.constant 2 : index
    %c0_114 = arith.constant 0 : index
    %c0_115 = arith.constant 0 : index
    %168 = vector.load %arg7[%c0_112, %c2_113, %c0_114, %c0_115] : memref<3x3x2x2xf32, #tpu.memory_space<vmem>>, vector<1x1x2x2xf32>
    %169 = vector.shape_cast %168 : vector<1x1x2x2xf32> to vector<2x2xf32>
    %170 = vector.shape_cast %167 : vector<8x16x2xf32> to vector<128x2xf32>
    %cst_116 = arith.constant dense<0.000000e+00> : vector<128x2xf32>
    %171 = tpu.matmul %170, %169, %cst_116 {dimension_numbers = #tpu.dot_dimension_numbers<[1], [0], [0], [1], [0, 0, 1, 1], [], []>} : vector<128x2xf32>, vector<2x2xf32>, vector<128x2xf32> -> vector<128x2xf32>
    %172 = arith.addf %166, %171 : vector<128x2xf32>
    %173 = vector.extract_strided_slice %152 {offsets = [1, 0, 0], sizes = [8, 16, 2], strides = [1, 1, 1]} : vector<10x16x2xf32> to vector<8x16x2xf32>
    %c1_117 = arith.constant 1 : index
    %c0_118 = arith.constant 0 : index
    %c0_119 = arith.constant 0 : index
    %c0_120 = arith.constant 0 : index
    %174 = vector.load %arg7[%c1_117, %c0_118, %c0_119, %c0_120] : memref<3x3x2x2xf32, #tpu.memory_space<vmem>>, vector<1x1x2x2xf32>
    %175 = vector.shape_cast %174 : vector<1x1x2x2xf32> to vector<2x2xf32>
    %176 = vector.shape_cast %173 : vector<8x16x2xf32> to vector<128x2xf32>
    %cst_121 = arith.constant dense<0.000000e+00> : vector<128x2xf32>
    %177 = tpu.matmul %176, %175, %cst_121 {dimension_numbers = #tpu.dot_dimension_numbers<[1], [0], [0], [1], [0, 0, 1, 1], [], []>} : vector<128x2xf32>, vector<2x2xf32>, vector<128x2xf32> -> vector<128x2xf32>
    %178 = arith.addf %172, %177 : vector<128x2xf32>
    %179 = vector.extract_strided_slice %149 {offsets = [1, 0, 0], sizes = [8, 16, 2], strides = [1, 1, 1]} : vector<10x16x2xf32> to vector<8x16x2xf32>
    %c1_122 = arith.constant 1 : index
    %c1_123 = arith.constant 1 : index
    %c0_124 = arith.constant 0 : index
    %c0_125 = arith.constant 0 : index
    %180 = vector.load %arg7[%c1_122, %c1_123, %c0_124, %c0_125] : memref<3x3x2x2xf32, #tpu.memory_space<vmem>>, vector<1x1x2x2xf32>
    %181 = vector.shape_cast %180 : vector<1x1x2x2xf32> to vector<2x2xf32>
    %182 = vector.shape_cast %179 : vector<8x16x2xf32> to vector<128x2xf32>
    %cst_126 = arith.constant dense<0.000000e+00> : vector<128x2xf32>
    %183 = tpu.matmul %182, %181, %cst_126 {dimension_numbers = #tpu.dot_dimension_numbers<[1], [0], [0], [1], [0, 0, 1, 1], [], []>} : vector<128x2xf32>, vector<2x2xf32>, vector<128x2xf32> -> vector<128x2xf32>
    %184 = arith.addf %178, %183 : vector<128x2xf32>
    %185 = vector.extract_strided_slice %155 {offsets = [1, 0, 0], sizes = [8, 16, 2], strides = [1, 1, 1]} : vector<10x16x2xf32> to vector<8x16x2xf32>
    %c1_127 = arith.constant 1 : index
    %c2_128 = arith.constant 2 : index
    %c0_129 = arith.constant 0 : index
    %c0_130 = arith.constant 0 : index
    %186 = vector.load %arg7[%c1_127, %c2_128, %c0_129, %c0_130] : memref<3x3x2x2xf32, #tpu.memory_space<vmem>>, vector<1x1x2x2xf32>
    %187 = vector.shape_cast %186 : vector<1x1x2x2xf32> to vector<2x2xf32>
    %188 = vector.shape_cast %185 : vector<8x16x2xf32> to vector<128x2xf32>
    %cst_131 = arith.constant dense<0.000000e+00> : vector<128x2xf32>
    %189 = tpu.matmul %188, %187, %cst_131 {dimension_numbers = #tpu.dot_dimension_numbers<[1], [0], [0], [1], [0, 0, 1, 1], [], []>} : vector<128x2xf32>, vector<2x2xf32>, vector<128x2xf32> -> vector<128x2xf32>
    %190 = arith.addf %184, %189 : vector<128x2xf32>
    %191 = vector.extract_strided_slice %152 {offsets = [2, 0, 0], sizes = [8, 16, 2], strides = [1, 1, 1]} : vector<10x16x2xf32> to vector<8x16x2xf32>
    %c2_132 = arith.constant 2 : index
    %c0_133 = arith.constant 0 : index
    %c0_134 = arith.constant 0 : index
    %c0_135 = arith.constant 0 : index
    %192 = vector.load %arg7[%c2_132, %c0_133, %c0_134, %c0_135] : memref<3x3x2x2xf32, #tpu.memory_space<vmem>>, vector<1x1x2x2xf32>
    %193 = vector.shape_cast %192 : vector<1x1x2x2xf32> to vector<2x2xf32>
    %194 = vector.shape_cast %191 : vector<8x16x2xf32> to vector<128x2xf32>
    %cst_136 = arith.constant dense<0.000000e+00> : vector<128x2xf32>
    %195 = tpu.matmul %194, %193, %cst_136 {dimension_numbers = #tpu.dot_dimension_numbers<[1], [0], [0], [1], [0, 0, 1, 1], [], []>} : vector<128x2xf32>, vector<2x2xf32>, vector<128x2xf32> -> vector<128x2xf32>
    %196 = arith.addf %190, %195 : vector<128x2xf32>
    %197 = vector.extract_strided_slice %149 {offsets = [2, 0, 0], sizes = [8, 16, 2], strides = [1, 1, 1]} : vector<10x16x2xf32> to vector<8x16x2xf32>
    %c2_137 = arith.constant 2 : index
    %c1_138 = arith.constant 1 : index
    %c0_139 = arith.constant 0 : index
    %c0_140 = arith.constant 0 : index
    %198 = vector.load %arg7[%c2_137, %c1_138, %c0_139, %c0_140] : memref<3x3x2x2xf32, #tpu.memory_space<vmem>>, vector<1x1x2x2xf32>
    %199 = vector.shape_cast %198 : vector<1x1x2x2xf32> to vector<2x2xf32>
    %200 = vector.shape_cast %197 : vector<8x16x2xf32> to vector<128x2xf32>
    %cst_141 = arith.constant dense<0.000000e+00> : vector<128x2xf32>
    %201 = tpu.matmul %200, %199, %cst_141 {dimension_numbers = #tpu.dot_dimension_numbers<[1], [0], [0], [1], [0, 0, 1, 1], [], []>} : vector<128x2xf32>, vector<2x2xf32>, vector<128x2xf32> -> vector<128x2xf32>
    %202 = arith.addf %196, %201 : vector<128x2xf32>
    %203 = vector.extract_strided_slice %155 {offsets = [2, 0, 0], sizes = [8, 16, 2], strides = [1, 1, 1]} : vector<10x16x2xf32> to vector<8x16x2xf32>
    %c2_142 = arith.constant 2 : index
    %c2_143 = arith.constant 2 : index
    %c0_144 = arith.constant 0 : index
    %c0_145 = arith.constant 0 : index
    %204 = vector.load %arg7[%c2_142, %c2_143, %c0_144, %c0_145] : memref<3x3x2x2xf32, #tpu.memory_space<vmem>>, vector<1x1x2x2xf32>
    %205 = vector.shape_cast %204 : vector<1x1x2x2xf32> to vector<2x2xf32>
    %206 = vector.shape_cast %203 : vector<8x16x2xf32> to vector<128x2xf32>
    %cst_146 = arith.constant dense<0.000000e+00> : vector<128x2xf32>
    %207 = tpu.matmul %206, %205, %cst_146 {dimension_numbers = #tpu.dot_dimension_numbers<[1], [0], [0], [1], [0, 0, 1, 1], [], []>} : vector<128x2xf32>, vector<2x2xf32>, vector<128x2xf32> -> vector<128x2xf32>
    %208 = arith.addf %202, %207 : vector<128x2xf32>
    %c0_147 = arith.constant 0 : index
    %c0_148 = arith.constant 0 : index
    %209 = vector.load %arg8[%c0_147, %c0_148] : memref<1x2xf32, #tpu.memory_space<vmem>>, vector<1x2xf32>
    %210 = vector.broadcast %209 : vector<1x2xf32> to vector<128x2xf32>
    %211 = arith.addf %208, %210 : vector<128x2xf32>
    %212 = vector.shape_cast %211 : vector<128x2xf32> to vector<8x16x2xf32>
    %cst_149 = arith.constant 0.000000e+00 : f32
    %213 = vector.broadcast %cst_149 : f32 to vector<12x1x2xf32>
    %214 = vector.extract_strided_slice %148 {offsets = [0, 0, 0], sizes = [12, 15, 2], strides = [1, 1, 1]} : vector<12x16x2xf32> to vector<12x15x2xf32>
    %215 = tpu.concatenate %213, %214 in 1 : vector<12x1x2xf32>, vector<12x15x2xf32> -> vector<12x16x2xf32>
    %cst_150 = arith.constant 0.000000e+00 : f32
    %216 = vector.broadcast %cst_150 : f32 to vector<12x1x2xf32>
    %217 = vector.extract_strided_slice %148 {offsets = [0, 1, 0], sizes = [12, 15, 2], strides = [1, 1, 1]} : vector<12x16x2xf32> to vector<12x15x2xf32>
    %218 = tpu.concatenate %217, %216 in 1 : vector<12x15x2xf32>, vector<12x1x2xf32> -> vector<12x16x2xf32>
    %219 = vector.extract_strided_slice %215 {offsets = [0, 0, 0], sizes = [10, 16, 2], strides = [1, 1, 1]} : vector<12x16x2xf32> to vector<10x16x2xf32>
    %c0_151 = arith.constant 0 : index
    %c0_152 = arith.constant 0 : index
    %c0_153 = arith.constant 0 : index
    %c0_154 = arith.constant 0 : index
    %220 = vector.load %arg9[%c0_151, %c0_152, %c0_153, %c0_154] : memref<3x3x2x2xf32, #tpu.memory_space<vmem>>, vector<1x1x2x2xf32>
    %221 = vector.shape_cast %220 : vector<1x1x2x2xf32> to vector<2x2xf32>
    %222 = vector.shape_cast %219 : vector<10x16x2xf32> to vector<160x2xf32>
    %cst_155 = arith.constant dense<0.000000e+00> : vector<160x2xf32>
    %223 = tpu.matmul %222, %221, %cst_155 {dimension_numbers = #tpu.dot_dimension_numbers<[1], [0], [0], [1], [0, 0, 1, 1], [], []>} : vector<160x2xf32>, vector<2x2xf32>, vector<160x2xf32> -> vector<160x2xf32>
    %224 = vector.extract_strided_slice %148 {offsets = [0, 0, 0], sizes = [10, 16, 2], strides = [1, 1, 1]} : vector<12x16x2xf32> to vector<10x16x2xf32>
    %c0_156 = arith.constant 0 : index
    %c1_157 = arith.constant 1 : index
    %c0_158 = arith.constant 0 : index
    %c0_159 = arith.constant 0 : index
    %225 = vector.load %arg9[%c0_156, %c1_157, %c0_158, %c0_159] : memref<3x3x2x2xf32, #tpu.memory_space<vmem>>, vector<1x1x2x2xf32>
    %226 = vector.shape_cast %225 : vector<1x1x2x2xf32> to vector<2x2xf32>
    %227 = vector.shape_cast %224 : vector<10x16x2xf32> to vector<160x2xf32>
    %cst_160 = arith.constant dense<0.000000e+00> : vector<160x2xf32>
    %228 = tpu.matmul %227, %226, %cst_160 {dimension_numbers = #tpu.dot_dimension_numbers<[1], [0], [0], [1], [0, 0, 1, 1], [], []>} : vector<160x2xf32>, vector<2x2xf32>, vector<160x2xf32> -> vector<160x2xf32>
    %229 = arith.addf %223, %228 : vector<160x2xf32>
    %230 = vector.extract_strided_slice %218 {offsets = [0, 0, 0], sizes = [10, 16, 2], strides = [1, 1, 1]} : vector<12x16x2xf32> to vector<10x16x2xf32>
    %c0_161 = arith.constant 0 : index
    %c2_162 = arith.constant 2 : index
    %c0_163 = arith.constant 0 : index
    %c0_164 = arith.constant 0 : index
    %231 = vector.load %arg9[%c0_161, %c2_162, %c0_163, %c0_164] : memref<3x3x2x2xf32, #tpu.memory_space<vmem>>, vector<1x1x2x2xf32>
    %232 = vector.shape_cast %231 : vector<1x1x2x2xf32> to vector<2x2xf32>
    %233 = vector.shape_cast %230 : vector<10x16x2xf32> to vector<160x2xf32>
    %cst_165 = arith.constant dense<0.000000e+00> : vector<160x2xf32>
    %234 = tpu.matmul %233, %232, %cst_165 {dimension_numbers = #tpu.dot_dimension_numbers<[1], [0], [0], [1], [0, 0, 1, 1], [], []>} : vector<160x2xf32>, vector<2x2xf32>, vector<160x2xf32> -> vector<160x2xf32>
    %235 = arith.addf %229, %234 : vector<160x2xf32>
    %236 = vector.extract_strided_slice %215 {offsets = [1, 0, 0], sizes = [10, 16, 2], strides = [1, 1, 1]} : vector<12x16x2xf32> to vector<10x16x2xf32>
    %c1_166 = arith.constant 1 : index
    %c0_167 = arith.constant 0 : index
    %c0_168 = arith.constant 0 : index
    %c0_169 = arith.constant 0 : index
    %237 = vector.load %arg9[%c1_166, %c0_167, %c0_168, %c0_169] : memref<3x3x2x2xf32, #tpu.memory_space<vmem>>, vector<1x1x2x2xf32>
    %238 = vector.shape_cast %237 : vector<1x1x2x2xf32> to vector<2x2xf32>
    %239 = vector.shape_cast %236 : vector<10x16x2xf32> to vector<160x2xf32>
    %cst_170 = arith.constant dense<0.000000e+00> : vector<160x2xf32>
    %240 = tpu.matmul %239, %238, %cst_170 {dimension_numbers = #tpu.dot_dimension_numbers<[1], [0], [0], [1], [0, 0, 1, 1], [], []>} : vector<160x2xf32>, vector<2x2xf32>, vector<160x2xf32> -> vector<160x2xf32>
    %241 = arith.addf %235, %240 : vector<160x2xf32>
    %242 = vector.extract_strided_slice %148 {offsets = [1, 0, 0], sizes = [10, 16, 2], strides = [1, 1, 1]} : vector<12x16x2xf32> to vector<10x16x2xf32>
    %c1_171 = arith.constant 1 : index
    %c1_172 = arith.constant 1 : index
    %c0_173 = arith.constant 0 : index
    %c0_174 = arith.constant 0 : index
    %243 = vector.load %arg9[%c1_171, %c1_172, %c0_173, %c0_174] : memref<3x3x2x2xf32, #tpu.memory_space<vmem>>, vector<1x1x2x2xf32>
    %244 = vector.shape_cast %243 : vector<1x1x2x2xf32> to vector<2x2xf32>
    %245 = vector.shape_cast %242 : vector<10x16x2xf32> to vector<160x2xf32>
    %cst_175 = arith.constant dense<0.000000e+00> : vector<160x2xf32>
    %246 = tpu.matmul %245, %244, %cst_175 {dimension_numbers = #tpu.dot_dimension_numbers<[1], [0], [0], [1], [0, 0, 1, 1], [], []>} : vector<160x2xf32>, vector<2x2xf32>, vector<160x2xf32> -> vector<160x2xf32>
    %247 = arith.addf %241, %246 : vector<160x2xf32>
    %248 = vector.extract_strided_slice %218 {offsets = [1, 0, 0], sizes = [10, 16, 2], strides = [1, 1, 1]} : vector<12x16x2xf32> to vector<10x16x2xf32>
    %c1_176 = arith.constant 1 : index
    %c2_177 = arith.constant 2 : index
    %c0_178 = arith.constant 0 : index
    %c0_179 = arith.constant 0 : index
    %249 = vector.load %arg9[%c1_176, %c2_177, %c0_178, %c0_179] : memref<3x3x2x2xf32, #tpu.memory_space<vmem>>, vector<1x1x2x2xf32>
    %250 = vector.shape_cast %249 : vector<1x1x2x2xf32> to vector<2x2xf32>
    %251 = vector.shape_cast %248 : vector<10x16x2xf32> to vector<160x2xf32>
    %cst_180 = arith.constant dense<0.000000e+00> : vector<160x2xf32>
    %252 = tpu.matmul %251, %250, %cst_180 {dimension_numbers = #tpu.dot_dimension_numbers<[1], [0], [0], [1], [0, 0, 1, 1], [], []>} : vector<160x2xf32>, vector<2x2xf32>, vector<160x2xf32> -> vector<160x2xf32>
    %253 = arith.addf %247, %252 : vector<160x2xf32>
    %254 = vector.extract_strided_slice %215 {offsets = [2, 0, 0], sizes = [10, 16, 2], strides = [1, 1, 1]} : vector<12x16x2xf32> to vector<10x16x2xf32>
    %c2_181 = arith.constant 2 : index
    %c0_182 = arith.constant 0 : index
    %c0_183 = arith.constant 0 : index
    %c0_184 = arith.constant 0 : index
    %255 = vector.load %arg9[%c2_181, %c0_182, %c0_183, %c0_184] : memref<3x3x2x2xf32, #tpu.memory_space<vmem>>, vector<1x1x2x2xf32>
    %256 = vector.shape_cast %255 : vector<1x1x2x2xf32> to vector<2x2xf32>
    %257 = vector.shape_cast %254 : vector<10x16x2xf32> to vector<160x2xf32>
    %cst_185 = arith.constant dense<0.000000e+00> : vector<160x2xf32>
    %258 = tpu.matmul %257, %256, %cst_185 {dimension_numbers = #tpu.dot_dimension_numbers<[1], [0], [0], [1], [0, 0, 1, 1], [], []>} : vector<160x2xf32>, vector<2x2xf32>, vector<160x2xf32> -> vector<160x2xf32>
    %259 = arith.addf %253, %258 : vector<160x2xf32>
    %260 = vector.extract_strided_slice %148 {offsets = [2, 0, 0], sizes = [10, 16, 2], strides = [1, 1, 1]} : vector<12x16x2xf32> to vector<10x16x2xf32>
    %c2_186 = arith.constant 2 : index
    %c1_187 = arith.constant 1 : index
    %c0_188 = arith.constant 0 : index
    %c0_189 = arith.constant 0 : index
    %261 = vector.load %arg9[%c2_186, %c1_187, %c0_188, %c0_189] : memref<3x3x2x2xf32, #tpu.memory_space<vmem>>, vector<1x1x2x2xf32>
    %262 = vector.shape_cast %261 : vector<1x1x2x2xf32> to vector<2x2xf32>
    %263 = vector.shape_cast %260 : vector<10x16x2xf32> to vector<160x2xf32>
    %cst_190 = arith.constant dense<0.000000e+00> : vector<160x2xf32>
    %264 = tpu.matmul %263, %262, %cst_190 {dimension_numbers = #tpu.dot_dimension_numbers<[1], [0], [0], [1], [0, 0, 1, 1], [], []>} : vector<160x2xf32>, vector<2x2xf32>, vector<160x2xf32> -> vector<160x2xf32>
    %265 = arith.addf %259, %264 : vector<160x2xf32>
    %266 = vector.extract_strided_slice %218 {offsets = [2, 0, 0], sizes = [10, 16, 2], strides = [1, 1, 1]} : vector<12x16x2xf32> to vector<10x16x2xf32>
    %c2_191 = arith.constant 2 : index
    %c2_192 = arith.constant 2 : index
    %c0_193 = arith.constant 0 : index
    %c0_194 = arith.constant 0 : index
    %267 = vector.load %arg9[%c2_191, %c2_192, %c0_193, %c0_194] : memref<3x3x2x2xf32, #tpu.memory_space<vmem>>, vector<1x1x2x2xf32>
    %268 = vector.shape_cast %267 : vector<1x1x2x2xf32> to vector<2x2xf32>
    %269 = vector.shape_cast %266 : vector<10x16x2xf32> to vector<160x2xf32>
    %cst_195 = arith.constant dense<0.000000e+00> : vector<160x2xf32>
    %270 = tpu.matmul %269, %268, %cst_195 {dimension_numbers = #tpu.dot_dimension_numbers<[1], [0], [0], [1], [0, 0, 1, 1], [], []>} : vector<160x2xf32>, vector<2x2xf32>, vector<160x2xf32> -> vector<160x2xf32>
    %271 = arith.addf %265, %270 : vector<160x2xf32>
    %c0_196 = arith.constant 0 : index
    %c0_197 = arith.constant 0 : index
    %272 = vector.load %arg10[%c0_196, %c0_197] : memref<1x2xf32, #tpu.memory_space<vmem>>, vector<1x2xf32>
    %273 = vector.broadcast %272 : vector<1x2xf32> to vector<160x2xf32>
    %274 = arith.addf %271, %273 : vector<160x2xf32>
    %275 = vector.shape_cast %274 : vector<160x2xf32> to vector<10x16x2xf32>
    %cst_198 = arith.constant 0.000000e+00 : f32
    %276 = vector.broadcast %cst_198 : f32 to vector<10x16x2xf32>
    %277 = arith.cmpf ogt, %275, %276 : vector<10x16x2xf32>
    %cst_199 = arith.constant 1.000000e-01 : f32
    %278 = vector.broadcast %cst_199 : f32 to vector<10x16x2xf32>
    %279 = arith.mulf %278, %275 : vector<10x16x2xf32>
    %280 = arith.select %277, %275, %279 : vector<10x16x2xi1>, vector<10x16x2xf32>
    %281 = tpu.iota {dimensions = array<i32: 0>} : vector<10x16x1xi32>
    %c1_i32 = arith.constant 1 : i32
    %282 = arith.subi %0, %c1_i32 : i32
    %283 = vector.broadcast %282 : i32 to vector<10x16x1xi32>
    %284 = arith.addi %281, %283 : vector<10x16x1xi32>
    %c0_i32_200 = arith.constant 0 : i32
    %285 = vector.broadcast %c0_i32_200 : i32 to vector<10x16x1xi32>
    %286 = arith.cmpi sge, %284, %285 : vector<10x16x1xi32>
    %c16_i32_201 = arith.constant 16 : i32
    %287 = vector.broadcast %c16_i32_201 : i32 to vector<10x16x1xi32>
    %288 = arith.cmpi slt, %284, %287 : vector<10x16x1xi32>
    %289 = arith.andi %286, %288 : vector<10x16x1xi1>
    %cst_202 = arith.constant 0.000000e+00 : f32
    %290 = vector.shape_cast %289 : vector<10x16x1xi1> to vector<10x16x1xi1>
    %291 = vector.broadcast %290 : vector<10x16x1xi1> to vector<10x16x2xi1>
    %292 = vector.broadcast %cst_202 : f32 to vector<10x16x2xf32>
    %293 = arith.select %291, %280, %292 : vector<10x16x2xi1>, vector<10x16x2xf32>
    %cst_203 = arith.constant 0.000000e+00 : f32
    %294 = vector.broadcast %cst_203 : f32 to vector<10x1x2xf32>
    %295 = vector.extract_strided_slice %293 {offsets = [0, 0, 0], sizes = [10, 15, 2], strides = [1, 1, 1]} : vector<10x16x2xf32> to vector<10x15x2xf32>
    %296 = tpu.concatenate %294, %295 in 1 : vector<10x1x2xf32>, vector<10x15x2xf32> -> vector<10x16x2xf32>
    %cst_204 = arith.constant 0.000000e+00 : f32
    %297 = vector.broadcast %cst_204 : f32 to vector<10x1x2xf32>
    %298 = vector.extract_strided_slice %293 {offsets = [0, 1, 0], sizes = [10, 15, 2], strides = [1, 1, 1]} : vector<10x16x2xf32> to vector<10x15x2xf32>
    %299 = tpu.concatenate %298, %297 in 1 : vector<10x15x2xf32>, vector<10x1x2xf32> -> vector<10x16x2xf32>
    %300 = vector.extract_strided_slice %296 {offsets = [0, 0, 0], sizes = [8, 16, 2], strides = [1, 1, 1]} : vector<10x16x2xf32> to vector<8x16x2xf32>
    %c0_205 = arith.constant 0 : index
    %c0_206 = arith.constant 0 : index
    %c0_207 = arith.constant 0 : index
    %c0_208 = arith.constant 0 : index
    %301 = vector.load %arg11[%c0_205, %c0_206, %c0_207, %c0_208] : memref<3x3x2x2xf32, #tpu.memory_space<vmem>>, vector<1x1x2x2xf32>
    %302 = vector.shape_cast %301 : vector<1x1x2x2xf32> to vector<2x2xf32>
    %303 = vector.shape_cast %300 : vector<8x16x2xf32> to vector<128x2xf32>
    %cst_209 = arith.constant dense<0.000000e+00> : vector<128x2xf32>
    %304 = tpu.matmul %303, %302, %cst_209 {dimension_numbers = #tpu.dot_dimension_numbers<[1], [0], [0], [1], [0, 0, 1, 1], [], []>} : vector<128x2xf32>, vector<2x2xf32>, vector<128x2xf32> -> vector<128x2xf32>
    %305 = vector.extract_strided_slice %293 {offsets = [0, 0, 0], sizes = [8, 16, 2], strides = [1, 1, 1]} : vector<10x16x2xf32> to vector<8x16x2xf32>
    %c0_210 = arith.constant 0 : index
    %c1_211 = arith.constant 1 : index
    %c0_212 = arith.constant 0 : index
    %c0_213 = arith.constant 0 : index
    %306 = vector.load %arg11[%c0_210, %c1_211, %c0_212, %c0_213] : memref<3x3x2x2xf32, #tpu.memory_space<vmem>>, vector<1x1x2x2xf32>
    %307 = vector.shape_cast %306 : vector<1x1x2x2xf32> to vector<2x2xf32>
    %308 = vector.shape_cast %305 : vector<8x16x2xf32> to vector<128x2xf32>
    %cst_214 = arith.constant dense<0.000000e+00> : vector<128x2xf32>
    %309 = tpu.matmul %308, %307, %cst_214 {dimension_numbers = #tpu.dot_dimension_numbers<[1], [0], [0], [1], [0, 0, 1, 1], [], []>} : vector<128x2xf32>, vector<2x2xf32>, vector<128x2xf32> -> vector<128x2xf32>
    %310 = arith.addf %304, %309 : vector<128x2xf32>
    %311 = vector.extract_strided_slice %299 {offsets = [0, 0, 0], sizes = [8, 16, 2], strides = [1, 1, 1]} : vector<10x16x2xf32> to vector<8x16x2xf32>
    %c0_215 = arith.constant 0 : index
    %c2_216 = arith.constant 2 : index
    %c0_217 = arith.constant 0 : index
    %c0_218 = arith.constant 0 : index
    %312 = vector.load %arg11[%c0_215, %c2_216, %c0_217, %c0_218] : memref<3x3x2x2xf32, #tpu.memory_space<vmem>>, vector<1x1x2x2xf32>
    %313 = vector.shape_cast %312 : vector<1x1x2x2xf32> to vector<2x2xf32>
    %314 = vector.shape_cast %311 : vector<8x16x2xf32> to vector<128x2xf32>
    %cst_219 = arith.constant dense<0.000000e+00> : vector<128x2xf32>
    %315 = tpu.matmul %314, %313, %cst_219 {dimension_numbers = #tpu.dot_dimension_numbers<[1], [0], [0], [1], [0, 0, 1, 1], [], []>} : vector<128x2xf32>, vector<2x2xf32>, vector<128x2xf32> -> vector<128x2xf32>
    %316 = arith.addf %310, %315 : vector<128x2xf32>
    %317 = vector.extract_strided_slice %296 {offsets = [1, 0, 0], sizes = [8, 16, 2], strides = [1, 1, 1]} : vector<10x16x2xf32> to vector<8x16x2xf32>
    %c1_220 = arith.constant 1 : index
    %c0_221 = arith.constant 0 : index
    %c0_222 = arith.constant 0 : index
    %c0_223 = arith.constant 0 : index
    %318 = vector.load %arg11[%c1_220, %c0_221, %c0_222, %c0_223] : memref<3x3x2x2xf32, #tpu.memory_space<vmem>>, vector<1x1x2x2xf32>
    %319 = vector.shape_cast %318 : vector<1x1x2x2xf32> to vector<2x2xf32>
    %320 = vector.shape_cast %317 : vector<8x16x2xf32> to vector<128x2xf32>
    %cst_224 = arith.constant dense<0.000000e+00> : vector<128x2xf32>
    %321 = tpu.matmul %320, %319, %cst_224 {dimension_numbers = #tpu.dot_dimension_numbers<[1], [0], [0], [1], [0, 0, 1, 1], [], []>} : vector<128x2xf32>, vector<2x2xf32>, vector<128x2xf32> -> vector<128x2xf32>
    %322 = arith.addf %316, %321 : vector<128x2xf32>
    %323 = vector.extract_strided_slice %293 {offsets = [1, 0, 0], sizes = [8, 16, 2], strides = [1, 1, 1]} : vector<10x16x2xf32> to vector<8x16x2xf32>
    %c1_225 = arith.constant 1 : index
    %c1_226 = arith.constant 1 : index
    %c0_227 = arith.constant 0 : index
    %c0_228 = arith.constant 0 : index
    %324 = vector.load %arg11[%c1_225, %c1_226, %c0_227, %c0_228] : memref<3x3x2x2xf32, #tpu.memory_space<vmem>>, vector<1x1x2x2xf32>
    %325 = vector.shape_cast %324 : vector<1x1x2x2xf32> to vector<2x2xf32>
    %326 = vector.shape_cast %323 : vector<8x16x2xf32> to vector<128x2xf32>
    %cst_229 = arith.constant dense<0.000000e+00> : vector<128x2xf32>
    %327 = tpu.matmul %326, %325, %cst_229 {dimension_numbers = #tpu.dot_dimension_numbers<[1], [0], [0], [1], [0, 0, 1, 1], [], []>} : vector<128x2xf32>, vector<2x2xf32>, vector<128x2xf32> -> vector<128x2xf32>
    %328 = arith.addf %322, %327 : vector<128x2xf32>
    %329 = vector.extract_strided_slice %299 {offsets = [1, 0, 0], sizes = [8, 16, 2], strides = [1, 1, 1]} : vector<10x16x2xf32> to vector<8x16x2xf32>
    %c1_230 = arith.constant 1 : index
    %c2_231 = arith.constant 2 : index
    %c0_232 = arith.constant 0 : index
    %c0_233 = arith.constant 0 : index
    %330 = vector.load %arg11[%c1_230, %c2_231, %c0_232, %c0_233] : memref<3x3x2x2xf32, #tpu.memory_space<vmem>>, vector<1x1x2x2xf32>
    %331 = vector.shape_cast %330 : vector<1x1x2x2xf32> to vector<2x2xf32>
    %332 = vector.shape_cast %329 : vector<8x16x2xf32> to vector<128x2xf32>
    %cst_234 = arith.constant dense<0.000000e+00> : vector<128x2xf32>
    %333 = tpu.matmul %332, %331, %cst_234 {dimension_numbers = #tpu.dot_dimension_numbers<[1], [0], [0], [1], [0, 0, 1, 1], [], []>} : vector<128x2xf32>, vector<2x2xf32>, vector<128x2xf32> -> vector<128x2xf32>
    %334 = arith.addf %328, %333 : vector<128x2xf32>
    %335 = vector.extract_strided_slice %296 {offsets = [2, 0, 0], sizes = [8, 16, 2], strides = [1, 1, 1]} : vector<10x16x2xf32> to vector<8x16x2xf32>
    %c2_235 = arith.constant 2 : index
    %c0_236 = arith.constant 0 : index
    %c0_237 = arith.constant 0 : index
    %c0_238 = arith.constant 0 : index
    %336 = vector.load %arg11[%c2_235, %c0_236, %c0_237, %c0_238] : memref<3x3x2x2xf32, #tpu.memory_space<vmem>>, vector<1x1x2x2xf32>
    %337 = vector.shape_cast %336 : vector<1x1x2x2xf32> to vector<2x2xf32>
    %338 = vector.shape_cast %335 : vector<8x16x2xf32> to vector<128x2xf32>
    %cst_239 = arith.constant dense<0.000000e+00> : vector<128x2xf32>
    %339 = tpu.matmul %338, %337, %cst_239 {dimension_numbers = #tpu.dot_dimension_numbers<[1], [0], [0], [1], [0, 0, 1, 1], [], []>} : vector<128x2xf32>, vector<2x2xf32>, vector<128x2xf32> -> vector<128x2xf32>
    %340 = arith.addf %334, %339 : vector<128x2xf32>
    %341 = vector.extract_strided_slice %293 {offsets = [2, 0, 0], sizes = [8, 16, 2], strides = [1, 1, 1]} : vector<10x16x2xf32> to vector<8x16x2xf32>
    %c2_240 = arith.constant 2 : index
    %c1_241 = arith.constant 1 : index
    %c0_242 = arith.constant 0 : index
    %c0_243 = arith.constant 0 : index
    %342 = vector.load %arg11[%c2_240, %c1_241, %c0_242, %c0_243] : memref<3x3x2x2xf32, #tpu.memory_space<vmem>>, vector<1x1x2x2xf32>
    %343 = vector.shape_cast %342 : vector<1x1x2x2xf32> to vector<2x2xf32>
    %344 = vector.shape_cast %341 : vector<8x16x2xf32> to vector<128x2xf32>
    %cst_244 = arith.constant dense<0.000000e+00> : vector<128x2xf32>
    %345 = tpu.matmul %344, %343, %cst_244 {dimension_numbers = #tpu.dot_dimension_numbers<[1], [0], [0], [1], [0, 0, 1, 1], [], []>} : vector<128x2xf32>, vector<2x2xf32>, vector<128x2xf32> -> vector<128x2xf32>
    %346 = arith.addf %340, %345 : vector<128x2xf32>
    %347 = vector.extract_strided_slice %299 {offsets = [2, 0, 0], sizes = [8, 16, 2], strides = [1, 1, 1]} : vector<10x16x2xf32> to vector<8x16x2xf32>
    %c2_245 = arith.constant 2 : index
    %c2_246 = arith.constant 2 : index
    %c0_247 = arith.constant 0 : index
    %c0_248 = arith.constant 0 : index
    %348 = vector.load %arg11[%c2_245, %c2_246, %c0_247, %c0_248] : memref<3x3x2x2xf32, #tpu.memory_space<vmem>>, vector<1x1x2x2xf32>
    %349 = vector.shape_cast %348 : vector<1x1x2x2xf32> to vector<2x2xf32>
    %350 = vector.shape_cast %347 : vector<8x16x2xf32> to vector<128x2xf32>
    %cst_249 = arith.constant dense<0.000000e+00> : vector<128x2xf32>
    %351 = tpu.matmul %350, %349, %cst_249 {dimension_numbers = #tpu.dot_dimension_numbers<[1], [0], [0], [1], [0, 0, 1, 1], [], []>} : vector<128x2xf32>, vector<2x2xf32>, vector<128x2xf32> -> vector<128x2xf32>
    %352 = arith.addf %346, %351 : vector<128x2xf32>
    %c0_250 = arith.constant 0 : index
    %c0_251 = arith.constant 0 : index
    %353 = vector.load %arg12[%c0_250, %c0_251] : memref<1x2xf32, #tpu.memory_space<vmem>>, vector<1x2xf32>
    %354 = vector.broadcast %353 : vector<1x2xf32> to vector<128x2xf32>
    %355 = arith.addf %352, %354 : vector<128x2xf32>
    %356 = vector.shape_cast %355 : vector<128x2xf32> to vector<8x16x2xf32>
    %357 = tpu.concatenate %67, %212, %356 in 2 : vector<8x16x4xf32>, vector<8x16x2xf32>, vector<8x16x2xf32> -> vector<8x16x8xf32>
    %cst_252 = arith.constant 0.000000e+00 : f32
    %358 = vector.broadcast %cst_252 : f32 to vector<8x16x8xf32>
    %359 = arith.maximumf %357, %358 : vector<8x16x8xf32>
    %c0_253 = arith.constant 0 : index
    %c0_254 = arith.constant 0 : index
    %c0_255 = arith.constant 0 : index
    %c0_256 = arith.constant 0 : index
    %360 = vector.load %arg13[%c0_253, %c0_254, %c0_255, %c0_256] : memref<1x8x16x8xf32, #tpu.memory_space<vmem>>, vector<1x8x16x8xf32>
    %361 = vector.shape_cast %360 : vector<1x8x16x8xf32> to vector<8x16x8xf32>
    %362 = vector.shape_cast %359 : vector<8x16x8xf32> to vector<1x8x16x8xf32>
    tpu.vector_store %arg13[%c0_253, %c0_254, %c0_255, %c0_256], %362 {strides = array<i32>} : memref<1x8x16x8xf32, #tpu.memory_space<vmem>>, vector<1x8x16x8xf32>,
    return
  }
  func.func @transform_0(%arg0: i32, %arg1: i32) -> (i32, i32, i32, i32) {
    %c0_i32 = arith.constant 0 : i32
    %c0_i32_0 = arith.constant 0 : i32
    %c0_i32_1 = arith.constant 0 : i32
    %c0_i32_2 = arith.constant 0 : i32
    return %arg0, %c0_i32, %c0_i32_0, %c0_i32_1 : i32, i32, i32, i32
  }
  func.func @transform_1(%arg0: i32, %arg1: i32) -> (i32, i32, i32, i32) {
    %c0_i32 = arith.constant 0 : i32
    %c0_i32_0 = arith.constant 0 : i32
    %c0_i32_1 = arith.constant 0 : i32
    %c0_i32_2 = arith.constant 0 : i32
    %c0_i32_3 = arith.constant 0 : i32
    return %c0_i32, %c0_i32_0, %c0_i32_1, %c0_i32_2 : i32, i32, i32, i32
  }
  func.func @transform_2(%arg0: i32, %arg1: i32) -> (i32, i32) {
    %c0_i32 = arith.constant 0 : i32
    %c0_i32_0 = arith.constant 0 : i32
    %c0_i32_1 = arith.constant 0 : i32
    return %c0_i32, %c0_i32_0 : i32, i32
  }
  func.func @transform_3(%arg0: i32, %arg1: i32) -> (i32, i32, i32, i32) {
    %c0_i32 = arith.constant 0 : i32
    %c0_i32_0 = arith.constant 0 : i32
    %c0_i32_1 = arith.constant 0 : i32
    %c0_i32_2 = arith.constant 0 : i32
    %c0_i32_3 = arith.constant 0 : i32
    return %c0_i32, %c0_i32_0, %c0_i32_1, %c0_i32_2 : i32, i32, i32, i32
  }
  func.func @transform_4(%arg0: i32, %arg1: i32) -> (i32, i32) {
    %c0_i32 = arith.constant 0 : i32
    %c0_i32_0 = arith.constant 0 : i32
    %c0_i32_1 = arith.constant 0 : i32
    return %c0_i32, %c0_i32_0 : i32, i32
  }
  func.func @transform_5(%arg0: i32, %arg1: i32) -> (i32, i32, i32, i32) {
    %c0_i32 = arith.constant 0 : i32
    %c0_i32_0 = arith.constant 0 : i32
    %c0_i32_1 = arith.constant 0 : i32
    %c0_i32_2 = arith.constant 0 : i32
    %c0_i32_3 = arith.constant 0 : i32
    return %c0_i32, %c0_i32_0, %c0_i32_1, %c0_i32_2 : i32, i32, i32, i32
  }
  func.func @transform_6(%arg0: i32, %arg1: i32) -> (i32, i32) {
    %c0_i32 = arith.constant 0 : i32
    %c0_i32_0 = arith.constant 0 : i32
    %c0_i32_1 = arith.constant 0 : i32
    return %c0_i32, %c0_i32_0 : i32, i32
  }
  func.func @transform_7(%arg0: i32, %arg1: i32) -> (i32, i32, i32, i32) {
    %c0_i32 = arith.constant 0 : i32
    %c0_i32_0 = arith.constant 0 : i32
    %c0_i32_1 = arith.constant 0 : i32
    %c0_i32_2 = arith.constant 0 : i32
    %c0_i32_3 = arith.constant 0 : i32
    return %c0_i32, %c0_i32_0, %c0_i32_1, %c0_i32_2 : i32, i32, i32, i32
  }
  func.func @transform_8(%arg0: i32, %arg1: i32) -> (i32, i32) {
    %c0_i32 = arith.constant 0 : i32
    %c0_i32_0 = arith.constant 0 : i32
    %c0_i32_1 = arith.constant 0 : i32
    return %c0_i32, %c0_i32_0 : i32, i32
  }
  func.func @transform_9(%arg0: i32, %arg1: i32) -> (i32, i32, i32, i32) {
    %c0_i32 = arith.constant 0 : i32
    %c0_i32_0 = arith.constant 0 : i32
    %c0_i32_1 = arith.constant 0 : i32
    %c0_i32_2 = arith.constant 0 : i32
    %c0_i32_3 = arith.constant 0 : i32
    return %c0_i32, %c0_i32_0, %c0_i32_1, %c0_i32_2 : i32, i32, i32, i32
  }
  func.func @transform_10(%arg0: i32, %arg1: i32) -> (i32, i32) {
    %c0_i32 = arith.constant 0 : i32
    %c0_i32_0 = arith.constant 0 : i32
    %c0_i32_1 = arith.constant 0 : i32
    return %c0_i32, %c0_i32_0 : i32, i32
  }
  func.func @transform_11(%arg0: i32, %arg1: i32) -> (i32, i32, i32, i32) {
    %c0_i32 = arith.constant 0 : i32
    %c0_i32_0 = arith.constant 0 : i32
    %c0_i32_1 = arith.constant 0 : i32
    return %arg0, %arg1, %c0_i32, %c0_i32_0 : i32, i32, i32, i32
  }
}

</mosaic_0001>

<bundles_post_ra>
// kernel: tpu_custom_call.1
= control target key start
LH: loop header
LB: loop body
LE: loop exit
PB: predicated region body
PF: predicated region fallthrough
CT: control target
= control target key end

     0   :  { %s13991_s17 = smov 0   ;;  %s13993_s18 = smov 0   ;;  %s17204_s0 = inlined_call_operand.vmem [shape: f32[2,22,16,8], index: 0, kind: input, shape index: {}]   ;;  %s17205_s1 = inlined_call_operand.vmem [shape: f32[3,3,8,4], index: 1, kind: input, shape index: {}]   ;;  %s17206_s2 = inlined_call_operand.vmem [shape: f32[1,4], index: 2, kind: input, shape index: {}]   ;;  %s17207_s3 = inlined_call_operand.vmem [shape: f32[3,3,8,2], index: 3, kind: input, shape index: {}]   ;;  %s17208_s4 = inlined_call_operand.vmem [shape: f32[1,2], index: 4, kind: input, shape index: {}]   ;;  %s17209_s5 = inlined_call_operand.vmem [shape: f32[3,3,2,2], index: 5, kind: input, shape index: {}]   ;;  %s17210_s6 = inlined_call_operand.vmem [shape: f32[1,2], index: 6, kind: input, shape index: {}]   ;;  %s17211_s7 = inlined_call_operand.vmem [shape: f32[3,3,2,2], index: 7, kind: input, shape index: {}]   ;;  %s17212_s8 = inlined_call_operand.vmem [shape: f32[1,2], index: 8, kind: input, shape index: {}]   ;;  %s17213_s9 = inlined_call_operand.vmem [shape: f32[3,3,2,2], index: 9, kind: input, shape index: {}]   ;;  %s17214_s10 = inlined_call_operand.vmem [shape: f32[1,2], index: 10, kind: input, shape index: {}]   ;;  %s17215_s11 = inlined_call_operand.vmem [shape: f32[2,16,16,8], index: 11, kind: output, shape index: {}]  }
   0x1   :  { %s13995_s19 = smov 0   ;;  %s13997_s20 = smov 0  }
   0x2   :  { %s13999_s21 = smov 0  }
   0x3 LB: > { %s30_s22 = sadd.s32 1, %s13919_s19  ;;  %s33_s23 = sadd.s32 1, %s13923_s20  ;;  %s13927_s21 = sphi %s13999_s21, %s21_s21   ;;  %s13923_s20 = sphi %s13997_s20, %s17366_s20   ;;  %s13919_s19 = sphi %s13995_s19, %s17365_s19   ;;  %s13915_s18 = sphi %s13993_s18, %s17364_s18   ;;  %s13911_s17 = sphi %s13991_s17, %s17363_s17  }
   0x4   : > { %p31_p0 = scmp.ge.s32.totalorder %s30_s22, 2  ;;  %p9986_p1 = scmp.ge.s32.totalorder %s13927_s21, 1 }
   0x5   : > { %p351_p2 = scmp.lt.s32.totalorder %s13927_s21, 5 }
   0x6   : > { %s17368_s22 = smov (%p31_p0, %s30_s22), 0  ;;  %s17370_s23 = smov (!%p31_p0, %s33_s23), %s13923_s20 }
   0x7   : > { %p352_p3 = pnand %p9986_p1, %p351_p2  ;;  %p35_p4 = scmp.ge.s32.totalorder %s17370_s23, 2 }
   0x9   : > { %s17372_s23 = smov (%p35_p4, %s17370_s23), 0  ;;  %355 = sbr.rel (%p352_p3) target bundleno = 1827 (0x723), region = 64 }
  0x10   : > { %v9994_v0 = vld [vmem:[%s17205_s1 + $0x8] sm:$0xff]  ;;  %p396_p5 = scmp.lt.s32.totalorder %s13915_s18, 1  ;;  %v565_v1 = vld [vmem:[%s17205_s1] sm:$0xff]  ;;  %v10027_v2 = vld [vmem:[%s17205_s1 + $0x10] sm:$0xff]  ;;  %s10898_s12 = sshll.u32 %s13911_s17, 7  ;;  %vm568_vm0 = vcmask 64512  }
  0x11   : > { %11772 = vmatprep.subr.mxu1 %v9994_v0  ;;  %11798 = vmatprep.subr.mxu0 %v565_v1  ;;  %vm463_vm1 = vcmask 1040384   ;;  %v14064_v11 = vld [vmem:[%s17207_s3 + $0x8] sm:$0xff]  ;;  %v14095_v19 = vld [vmem:[%s17205_s1 + $0x18] sm:$0xff]  ;;  %vm514_vm2 = vcmask 1046528   ;;  %vm4473_vm3 = vcmask 1041408   ;;  %s15227_s28 = sshll.u32 %s13911_s17, 3 }
  0x12   : > { %11773 = vmatpush3.msra.mxu1 %v9994_v0  ;;  %s17374_s18 = smov (!%p396_p5, %s13915_s18), 1  ;;  %11799 = vmatpush3.msra.mxu0 %v565_v1  ;;  %s10372_s29 = sadd.s32 4294967294, %s15227_s28  ;;  %vm4440_vm8 = vcmask 15360  }
  0x13   : > { %13104 = vmatprep.subr.mxu1 %v565_v1  ;;  %11824 = vmatprep.subr.mxu0 %v10027_v2  ;;  %s13842_s30 = smul.u32 352, %s17374_s18  ;;  %s13930_s25 = smov 6  }
  0x14   : > { %p404_p6 = scmp.lt.s32.totalorder %s15227_s28, 15  ;;  %s9990_s27 = sshll.u32 %s17374_s18, 5 }
  0x15   : > { %s400_s15 = scalar_lea.vmem %s17204_s0, %s13842_s30  ;;  %s13929_s30 = smov 4  }
  0x16   : > { %s14039_s16 = scalar_lea.vmem %s400_s15, %s10898_s12  ;;  %s10733_s12 = sadd.s32 4294967295, %s15227_s28 }
  0x17   : > { %v14042_v3 = vld [vmem:[%s14039_s16 + $0x20] sm:$0xff]  ;;  %v14045_v4 = vld [vmem:[%s14039_s16 + $0x28] sm:$0xff]  ;;  %v14048_v5 = vld [vmem:[%s14039_s16 + $0x30] sm:$0xff]  ;;  %s17376_s28 = smov (!%p404_p6, %s15227_s28), 15 }
  0x18   : > { %17237 = vst [vmem:[#allocation2_spill] sm:$0xff] %v14042_v3  ;;  %17238 = vst [vmem:[#allocation3_spill] sm:$0xff] %v14045_v4  ;;  %11774 = vmatprep.mubr.msk.f32.mxu1 %vm568_vm0, %v14042_v3  ;;  %v464_v6 = vrot.slane %v14042_v3, 7  ;;  %v465_v7 = vrot.slane %v14045_v4, 7  ;;  %v14055_v8 = vld [vmem:[%s14039_s16 + $0x38] sm:$0xff]  ;;  %v467_v9 = vrot.slane %v14048_v5, 7 }
  0x19   : > { %17239 = vst [vmem:[#allocation4_spill] sm:$0xff] %v14055_v8  ;;  %v14059_v10 = vld [vmem:[%s14039_s16 + $0x40] sm:$0xff]  ;;  %11775 = vmatmul.mubr.msk.f32.vlgmr.msra.gmra.mrb[0].mxu1 %vm568_vm0, %v14045_v4  ;;  %v468_v12 = vrot.slane %v14055_v8, 7  ;;  %v14081_v16 = vld [vmem:[%s14039_s16 + $0x48] sm:$0xff]  ;;  %v14087_v18 = vld [vmem:[%s14039_s16 + $0x50] sm:$0xff]  ;;  %v515_v51 = vrot.slane %v14042_v3, 1 }
  0x1a   : > { %13105 = vmatpush3.msra.mxu1 %v565_v1  ;;  %v14070_v13 = vsel %vm463_vm1, 0.0, %v464_v6  ;;  %11777 = vmatprep.mubr.msk.f32.mxu1 %vm568_vm0, %v14048_v5  ;;  %v14075_v14 = vsel %vm463_vm1, %v464_v6, %v465_v7  ;;  %v14078_v15 = vsel %vm463_vm1, 0.0, %v467_v9  ;;  %v470_v17 = vrot.slane %v14059_v10, 7  ;;  %v14111_v23 = vld [vmem:[%s14039_s16 + $0x58] sm:$0xff]  ;;  %v14115_v25 = vld [vmem:[%s14039_s16 + $0x60] sm:$0xff]  ;;  %v14134_v29 = vld [vmem:[%s14039_s16 + $0x68] sm:$0xff] }
  0x1b   : > { %11800 = vmatprep.mubr.msk.f32.mxu0 %vm568_vm0, %v14070_v13  ;;  %12006 = vmatprep.subr.mxu1 %v14064_v11  ;;  %v14102_v20 = vsel %vm463_vm1, %v467_v9, %v468_v12  ;;  %v471_v21 = vrot.slane %v14081_v16, 7  ;;  %v473_v24 = vrot.slane %v14087_v18, 7  ;;  %v474_v27 = vrot.slane %v14111_v23, 7  ;;  %v14138_v31 = vld [vmem:[%s14039_s16 + $0x70] sm:$0xff]  ;;  %v14156_v35 = vld [vmem:[%s14039_s16 + $0x78] sm:$0xff]  ;;  %v14160_v37 = vld [vmem:[%s14039_s16 + $0x80] sm:$0xff] }
  0x1c   : > { %11801 = vmatmul.mubr.msk.f32.vlgmr.msra.gmra.mrb[0].mxu0 %vm568_vm0, %v14075_v14  ;;  %v14108_v22 = vsel %vm463_vm1, 0.0, %v470_v17  ;;  %v476_v30 = vrot.slane %v14115_v25, 7  ;;  %v477_v33 = vrot.slane %v14134_v29, 7  ;;  %v479_v36 = vrot.slane %v14138_v31, 7  ;;  %v14173_v40 = vld [vmem:[%s14039_s16] sm:$0xff]  ;;  %v14181_v42 = vld [vmem:[%s14039_s16 + $0x88] sm:$0xff] }
  0x1d   : > { %11778 = vmatmul.mubr.msk.f32.gmra.mrb[2].mxu1 %vm568_vm0, %v14055_v8  ;;  %11803 = vmatprep.mubr.msk.f32.mxu0 %vm568_vm0, %v14078_v15  ;;  %v14125_v26 = vsel %vm463_vm1, %v470_v17, %v471_v21  ;;  %v14131_v28 = vsel %vm463_vm1, 0.0, %v473_v24  ;;  %v14147_v32 = vsel %vm463_vm1, %v473_v24, %v474_v27  ;;  %v480_v39 = vrot.slane %v14156_v35, 7  ;;  %v14186_v45 = vld [vmem:[%s14039_s16 + $0x8] sm:$0xff]  ;;  %v14205_v50 = vld [vmem:[%s14039_s16 + $0x90] sm:$0xff]  ;;  %v14227_v56 = vld [vmem:[%s14039_s16 + $0x98] sm:$0xff]  ;;  %s9989_s26 = sshll.u32 %s17376_s28, 1 }
  0x1e   : > { %11780 = vmatprep.mubr.msk.f32.mxu1 %vm568_vm0, %v14059_v10  ;;  %11825 = vmatpush3.msra.mxu0 %v10027_v2  ;;  %v14153_v34 = vsel %vm463_vm1, 0.0, %v476_v30  ;;  %v14169_v38 = vsel %vm463_vm1, %v476_v30, %v477_v33  ;;  %v14178_v41 = vsel %vm463_vm1, 0.0, %v479_v36  ;;  %v482_v43 = vrot.slane %v14160_v37, 7  ;;  %v14257_v2 = vld [vmem:[%s17205_s1 + $0x20] sm:$0xff]  ;;  %v14297_v33 = vld [vmem:[%s14039_s16 + $0x10] sm:$0xff] }
  0x1f   : > { %11850 = vmatprep.subr.mxu0 %v14095_v19  ;;  %v2191_v44 = vrot.slane %v14173_v40, 1  ;;  %v17216_v46 = vrot.slane %v14186_v45, 1  ;;  %v14196_v47 = vsel %vm463_vm1, %v479_v36, %v480_v39  ;;  %v483_v48 = vrot.slane %v14181_v42, 7  ;;  %v14316_v39 = vld [vmem:[%s14039_s16 + $0x18] sm:$0xff] }
  0x20   : > { %11804 = vmatmul.mubr.msk.f32.gmra.mrb[2].mxu0 %vm568_vm0, %v14102_v20  ;;  %v14202_v49 = vsel %vm463_vm1, 0.0, %v482_v43  ;;  %v516_v52 = vrot.slane %v14045_v4, 1  ;;  %v485_v54 = vrot.slane %v14205_v50, 7  ;;  %v518_v58 = vrot.slane %v14048_v5, 1 }
  0x21   : > { %11781 = vmatmul.mubr.msk.f32.gmra.mrb[4].mxu1 %vm568_vm0, %v14081_v16  ;;  %11806 = vmatprep.mubr.msk.f32.mxu0 %vm568_vm0, %v14108_v22  ;;  %v14212_v53 = vsel %vm514_vm2, %v2191_v44, %v17216_v46  ;;  %v14222_v55 = vsel %vm463_vm1, %v482_v43, %v483_v48  ;;  %v519_v59 = vrot.slane %v14055_v8, 1  ;;  %v486_v63 = vrot.slane %v14227_v56, 7 }
  0x22   : > { %11783 = vmatprep.mubr.msk.f32.mxu1 %vm568_vm0, %v14087_v18  ;;  %v14230_v57 = vsel %vm514_vm2, %v515_v51, %v516_v52  ;;  %v14235_v60 = vsel %vm463_vm1, 0.0, %v485_v54  ;;  %v14244_v61 = vsel %vm514_vm2, %v516_v52, 0.0  ;;  %v521_v0 = vrot.slane %v14059_v10, 1 }
  0x23   : > { %17240 = vst [vmem:[#allocation5_spill] sm:$0xff] %v14235_v60  ;;  %17241 = vst [vmem:[#allocation6_spill] sm:$0xff] %v14244_v61  ;;  %v14247_v62 = vsel %vm514_vm2, %v518_v58, %v519_v59  ;;  %v522_v1 = vrot.slane %v14081_v16, 1  ;;  %v14264_v6 = vsel %vm514_vm2, %v519_v59, 0.0  ;;  %v14268_v7 = vsel %vm463_vm1, %v485_v54, %v486_v63 }
  0x24   : > { %11807 = vmatmul.mubr.msk.f32.gmra.mrb[4].mxu0 %vm568_vm0, %v14125_v26  ;;  %17242 = vst [vmem:[#allocation7_spill] sm:$0xff] %v14247_v62  ;;  %17243 = vst [vmem:[#allocation8_spill] sm:$0xff] %v14264_v6  ;;  %v524_v12 = vrot.slane %v14087_v18, 1  ;;  %v525_v17 = vrot.slane %v14111_v23, 1  ;;  %v527_v27 = vrot.slane %v14115_v25, 1  ;;  %v528_v30 = vrot.slane %v14134_v29, 1 }
  0x25   : > { %11784 = vmatmul.mubr.msk.f32.gmra.mrb[6].mxu1 %vm568_vm0, %v14111_v23  ;;  %11809 = vmatprep.mubr.msk.f32.mxu0 %vm568_vm0, %v14131_v28  ;;  %v14271_v9 = vsel %vm514_vm2, %v521_v0, %v522_v1  ;;  %v14286_v21 = vsel %vm514_vm2, %v522_v1, 0.0  ;;  %v530_v44 = vrot.slane %v14138_v31, 1  ;;  %v531_v48 = vrot.slane %v14156_v35, 1 }
  0x26   : > { %11786 = vmatprep.mubr.msk.f32.mxu1 %vm568_vm0, %v14115_v25  ;;  %v14292_v24 = vsel %vm514_vm2, %v524_v12, %v525_v17  ;;  %v14311_v36 = vsel %vm514_vm2, %v525_v17, 0.0  ;;  %v14319_v43 = vsel %vm514_vm2, %v527_v27, %v528_v30  ;;  %v14331_v51 = vsel %vm514_vm2, %v528_v30, 0.0  ;;  %v10078_v27 = vld [vmem:[%s17205_s1 + $0x28] sm:$0xff] }
  0x27   : > { %v14336_v52 = vsel %vm514_vm2, %v530_v44, %v531_v48  ;;  %v533_v54 = vrot.slane %v14160_v37, 1  ;;  %v534_v58 = vrot.slane %v14181_v42, 1  ;;  %v14347_v59 = vsel %vm514_vm2, %v531_v48, 0.0  ;;  %v14429_v30 = vld [vmem:[%s14039_s16 + $0xa8] sm:$0xff]  ;;  %v14432_v44 = vld [vmem:[%s14039_s16 + $0xb0] sm:$0xff] }
  0x28   : > { %11810 = vmatmul.mubr.msk.f32.gmra.mrb[6].mxu0 %vm568_vm0, %v14147_v32  ;;  %v536_v0 = vrot.slane %v14205_v50, 1  ;;  %v537_v1 = vrot.slane %v14227_v56, 1  ;;  %v2171_v48 = vrot.slane %v14173_v40, 7  ;;  %v489_v46 = vrot.slane %v14429_v30, 7 }
  0x29   : > { %11787 = vmatmul.mubr.msk.f32.gmra.mrb[8].mxu1 %vm568_vm0, %v14134_v29  ;;  %11812 = vmatprep.mubr.msk.f32.mxu0 %vm568_vm0, %v14153_v34  ;;  %v14352_v63 = vsel %vm514_vm2, %v533_v54, %v534_v58  ;;  %v14363_v12 = vsel %vm514_vm2, %v534_v58, 0.0  ;;  %v2172_v54 = vrot.slane %v14186_v45, 7  ;;  %v14445_v58 = vld [vmem:[%s14039_s16 + $0xb8] sm:$0xff] }
  0x2a   : > { %11789 = vmatprep.mubr.msk.f32.mxu1 %vm568_vm0, %v14138_v31  ;;  %17244 = vst [vmem:[#allocation9_spill] sm:$0xff] %v14363_v12  ;;  %v14368_v17 = vsel %vm514_vm2, %v536_v0, %v537_v1 }
  0x2b   : > { %17245 = vst [vmem:[#allocation10_spill] sm:$0xff] %v14368_v17 }
  0x2c   : > { %11813 = vmatmul.mubr.msk.f32.gmra.mrb[8].mxu0 %vm568_vm0, %v14169_v38 }
  0x2d   : > { %11790 = vmatmul.mubr.msk.f32.gmra.mrb[10].mxu1 %vm568_vm0, %v14156_v35  ;;  %11815 = vmatprep.mubr.msk.f32.mxu0 %vm568_vm0, %v14178_v41 }
  0x2e   : > { %11792 = vmatprep.mubr.msk.f32.mxu1 %vm568_vm0, %v14160_v37 }
  0x30   : > { %11816 = vmatmul.mubr.msk.f32.gmra.mrb[10].mxu0 %vm568_vm0, %v14196_v47 }
  0x31   : > { %11793 = vmatmul.mubr.msk.f32.gmra.mrb[12].mxu1 %vm568_vm0, %v14181_v42  ;;  %11818 = vmatprep.mubr.msk.f32.mxu0 %vm568_vm0, %v14202_v49 }
  0x32   : > { %11795 = vmatprep.mubr.msk.f32.mxu1 %vm568_vm0, %v14205_v50 }
  0x34   : > { %11819 = vmatmul.mubr.msk.f32.gmra.mrb[12].mxu0 %vm568_vm0, %v14222_v55 }
  0x35   : > { %11796 = vmatmul.mubr.msk.f32.gmra.mrb[14].mxu1 %vm568_vm0, %v14227_v56  ;;  %11826 = vmatprep.mubr.msk.f32.mxu0 %vm568_vm0, %v14230_v57 }
  0x36   : > { %11821 = vmatprep.mubr.msk.f32.mxu1 %vm568_vm0, %v14235_v60 }
  0x38   : > { %11827 = vmatmul.mubr.msk.f32.vlgmr.msra.gmra.mrb[0].mxu0 %vm568_vm0, %v14244_v61 }
  0x39   : > { %11829 = vmatprep.mubr.msk.f32.mxu0 %vm568_vm0, %v14247_v62  ;;  %11851 = vmatpush3.msra.mxu0 %v14095_v19  ;;  %v2211_v19 = vld [vmem:[%s17207_s3] sm:$0xff] }
  0x3a   : > { %11876 = vmatprep.subr.mxu0 %v14257_v2 }
  0x3c   : > { %11830 = vmatmul.mubr.msk.f32.gmra.mrb[2].mxu0 %vm568_vm0, %v14264_v6 }
  0x3d   : > { %11822 = vmatmul.mubr.msk.f32.vlgmr.msra.gmra.mrb[14].mxu1 %vm568_vm0, %v14268_v7  ;;  %11832 = vmatprep.mubr.msk.f32.mxu0 %vm568_vm0, %v14271_v9 }
  0x3e   : > { %12007 = vmatpush3.msra.mxu1 %v14064_v11  ;;  %12008 = vmatprep.mubr.msk.f32.mxu1 %vm568_vm0, %v14173_v40  ;;  %v14304_v11 = vld [vmem:[%s17207_s3 + $0x10] sm:$0xff]  ;;  %v2187_v40 = vsel %vm463_vm1, 0.0, %v2171_v48 }
  0x3f   : > { %12044 = vmatprep.subr.mxu1 %v2211_v19 }
  0x40   : > { %11833 = vmatmul.mubr.msk.f32.gmra.mrb[4].mxu0 %vm568_vm0, %v14286_v21 }
  0x41   : > { %12009 = vmatmul.mubr.msk.f32.vlgmr.msra.gmra.mrb[16].mxu1 %vm568_vm0, %v14186_v45  ;;  %11835 = vmatprep.mubr.msk.f32.mxu0 %vm568_vm0, %v14292_v24 }
  0x42   : > { %12045 = vmatpush3.msra.mxu1 %v2211_v19  ;;  %12011 = vmatprep.mubr.msk.f32.mxu1 %vm568_vm0, %v14297_v33  ;;  %v14377_v19 = vsel %vm514_vm2, %v537_v1, 0.0  ;;  %v2174_v1 = vrot.slane %v14297_v33, 7 }
  0x43   : > { %12082 = vmatprep.subr.mxu1 %v14304_v11  ;;  %17246 = vst [vmem:[#allocation11_spill] sm:$0xff] %v14377_v19 }
  0x44   : > { %11836 = vmatmul.mubr.msk.f32.gmra.mrb[6].mxu0 %vm568_vm0, %v14311_v36 }
  0x45   : > { %12012 = vmatmul.mubr.msk.f32.gmra.mrb[18].mxu1 %vm568_vm0, %v14316_v39  ;;  %11838 = vmatprep.mubr.msk.f32.mxu0 %vm568_vm0, %v14319_v43 }
  0x46   : > { %12014 = vmatprep.mubr.msk.f32.mxu1 %vm568_vm0, %v14042_v3  ;;  %v2173_v3 = vsel %vm463_vm1, %v2171_v48, %v2172_v54 }
  0x48   : > { %11839 = vmatmul.mubr.msk.f32.gmra.mrb[8].mxu0 %vm568_vm0, %v14331_v51 }
  0x49   : > { %12015 = vmatmul.mubr.msk.f32.gmra.mrb[20].mxu1 %vm568_vm0, %v14045_v4  ;;  %11841 = vmatprep.mubr.msk.f32.mxu0 %vm568_vm0, %v14336_v52  ;;  %v2175_v4 = vrot.slane %v14316_v39, 7 }
  0x4a   : > { %12017 = vmatprep.mubr.msk.f32.mxu1 %vm568_vm0, %v14048_v5 }
  0x4b   : > { %v14483_v54 = vsel %vm463_vm1, %v2174_v1, %v2175_v4  ;;  %v491_v4 = vrot.slane %v14432_v44, 7 }
  0x4c   : > { %11842 = vmatmul.mubr.msk.f32.gmra.mrb[10].mxu0 %vm568_vm0, %v14347_v59 }
  0x4d   : > { %12018 = vmatmul.mubr.msk.f32.gmra.mrb[22].mxu1 %vm568_vm0, %v14055_v8  ;;  %11844 = vmatprep.mubr.msk.f32.mxu0 %vm568_vm0, %v14352_v63 }
  0x4e   : > { %12020 = vmatprep.mubr.msk.f32.mxu1 %vm568_vm0, %v14059_v10 }
  0x50   : > { %11845 = vmatmul.mubr.msk.f32.gmra.mrb[12].mxu0 %vm568_vm0, %v14363_v12  ;;  %v14471_v12 = vld [vmem:[%s17207_s3 + $0x18] sm:$0xff] }
  0x51   : > { %12021 = vmatmul.mubr.msk.f32.gmra.mrb[24].mxu1 %vm568_vm0, %v14081_v16  ;;  %11847 = vmatprep.mubr.msk.f32.mxu0 %vm568_vm0, %v14368_v17  ;;  %v14464_v17 = vsel %vm463_vm1, 0.0, %v2174_v1  ;;  %v2195_v1 = vrot.slane %v14316_v39, 1 }
  0x52   : > { %12023 = vmatprep.mubr.msk.f32.mxu1 %vm568_vm0, %v14087_v18 }
  0x54   : > { %11848 = vmatmul.mubr.msk.f32.gmra.mrb[14].mxu0 %vm568_vm0, %v14377_v19 }
  0x55   : > { %12024 = vmatmul.mubr.msk.f32.gmra.mrb[26].mxu1 %vm568_vm0, %v14111_v23  ;;  %11852 = vmatprep.mubr.msk.f32.mxu0 %vm568_vm0, %v14078_v15 }
  0x56   : > { %12026 = vmatprep.mubr.msk.f32.mxu1 %vm568_vm0, %v14115_v25 }
  0x58   : > { %11853 = vmatmul.mubr.msk.f32.vlgmr.msra.gmra.mrb[0].mxu0 %vm568_vm0, %v14102_v20 }
  0x59   : > { %12027 = vmatmul.mubr.msk.f32.gmra.mrb[28].mxu1 %vm568_vm0, %v14134_v29  ;;  %11855 = vmatprep.mubr.msk.f32.mxu0 %vm568_vm0, %v14108_v22 }
  0x5a   : > { %12029 = vmatprep.mubr.msk.f32.mxu1 %vm568_vm0, %v14138_v31  ;;  %11877 = vmatpush3.msra.mxu0 %v14257_v2  ;;  %v14418_v2 = vld [vmem:[%s14039_s16 + $0xa0] sm:$0xff] }
  0x5b   : > { %11902 = vmatprep.subr.mxu0 %v10078_v27  ;;  %v488_v0 = vrot.slane %v14418_v2, 7 }
  0x5c   : > { %11856 = vmatmul.mubr.msk.f32.gmra.mrb[2].mxu0 %vm568_vm0, %v14125_v26 }
  0x5d   : > { %12030 = vmatmul.mubr.msk.f32.gmra.mrb[30].mxu1 %vm568_vm0, %v14156_v35  ;;  %11858 = vmatprep.mubr.msk.f32.mxu0 %vm568_vm0, %v14131_v28  ;;  %v14461_v19 = vsel %vm463_vm1, 0.0, %v488_v0  ;;  %v14477_v48 = vsel %vm463_vm1, %v488_v0, %v489_v46  ;;  %v492_v46 = vrot.slane %v14445_v58, 7 }
  0x5e   : > { %12032 = vmatprep.mubr.msk.f32.mxu1 %vm568_vm0, %v14160_v37  ;;  %17247 = vst [vmem:[#allocation12_spill] sm:$0xff] %v14461_v19  ;;  %17248 = vst [vmem:[#allocation13_spill] sm:$0xff] %v14477_v48 }
  0x5f   : > { %v14578_v0 = vsel %vm463_vm1, %v491_v4, %v492_v46 }
  0x60   : > { %11859 = vmatmul.mubr.msk.f32.gmra.mrb[4].mxu0 %vm568_vm0, %v14147_v32 }
  0x61   : > { %12033 = vmatmul.mubr.msk.f32.gmra.mrb[32].mxu1 %vm568_vm0, %v14181_v42  ;;  %11861 = vmatprep.mubr.msk.f32.mxu0 %vm568_vm0, %v14153_v34 }
  0x62   : > { %12035 = vmatprep.mubr.msk.f32.mxu1 %vm568_vm0, %v14205_v50 }
  0x64   : > { %11862 = vmatmul.mubr.msk.f32.gmra.mrb[6].mxu0 %vm568_vm0, %v14169_v38 }
  0x65   : > { %12036 = vmatmul.mubr.msk.f32.gmra.mrb[34].mxu1 %vm568_vm0, %v14227_v56  ;;  %11864 = vmatprep.mubr.msk.f32.mxu0 %vm568_vm0, %v14178_v41 }
  0x66   : > { %12038 = vmatprep.mubr.msk.f32.mxu1 %vm568_vm0, %v14418_v2 }
  0x68   : > { %11865 = vmatmul.mubr.msk.f32.gmra.mrb[8].mxu0 %vm568_vm0, %v14196_v47 }
  0x69   : > { %12039 = vmatmul.mubr.msk.f32.gmra.mrb[36].mxu1 %vm568_vm0, %v14429_v30  ;;  %11867 = vmatprep.mubr.msk.f32.mxu0 %vm568_vm0, %v14202_v49 }
  0x6a   : > { %12041 = vmatprep.mubr.msk.f32.mxu1 %vm568_vm0, %v14432_v44 }
  0x6c   : > { %11868 = vmatmul.mubr.msk.f32.gmra.mrb[10].mxu0 %vm568_vm0, %v14222_v55 }
  0x6d   : > { %12042 = vmatmul.mubr.msk.f32.gmra.mrb[38].mxu1 %vm568_vm0, %v14445_v58  ;;  %11870 = vmatprep.mubr.msk.f32.mxu0 %vm568_vm0, %v14235_v60 }
  0x6e   : > { %12046 = vmatprep.mubr.msk.f32.mxu1 %vm568_vm0, %v2187_v40  ;;  %v2194_v40 = vrot.slane %v14297_v33, 1 }
  0x70   : > { %11871 = vmatmul.mubr.msk.f32.gmra.mrb[12].mxu0 %vm568_vm0, %v14268_v7  ;;  %v14594_v46 = vsel %vm514_vm2, %v2194_v40, %v2195_v1  ;;  %v17251_v40 = vld [vmem:[#allocation9_spill] sm:$0xff] }
  0x71   : > { %12047 = vmatmul.mubr.msk.f32.vlgmr.msra.gmra.mrb[16].mxu1 %vm568_vm0, %v2173_v3  ;;  %11873 = vmatprep.mubr.msk.f32.mxu0 %vm568_vm0, %v14461_v19  ;;  %v10095_v3 = vld [vmem:[%s17205_s1 + $0x30] sm:$0xff] }
  0x72   : > { %12083 = vmatpush3.msra.mxu1 %v14304_v11  ;;  %12049 = vmatprep.mubr.msk.f32.mxu1 %vm568_vm0, %v14464_v17  ;;  %v14564_v11 = vsel %vm463_vm1, 0.0, %v491_v4  ;;  %v17250_v4 = vrot.slane %v14186_v45, 1  ;;  %v14610_v45 = vsel %vm514_vm2, %v2195_v1, 0.0  ;;  %v17252_v1 = vld [vmem:[#allocation10_spill] sm:$0xff] }
  0x73   : > { %12120 = vmatprep.subr.mxu1 %v14471_v12  ;;  %17249 = vst [vmem:[#allocation14_spill] sm:$0xff] %v14564_v11 }
  0x74   : > { %11874 = vmatmul.mubr.msk.f32.gmra.mrb[14].mxu0 %vm568_vm0, %v14477_v48 }
  0x75   : > { %12050 = vmatmul.mubr.msk.f32.gmra.mrb[18].mxu1 %vm568_vm0, %v14483_v54  ;;  %11878 = vmatprep.mubr.msk.f32.mxu0 %vm568_vm0, %v14048_v5 }
  0x76   : > { %12052 = vmatprep.mubr.msk.f32.mxu1 %vm568_vm0, %v14070_v13 }
  0x78   : > { %11879 = vmatmul.mubr.msk.f32.vlgmr.msra.gmra.mrb[0].mxu0 %vm568_vm0, %v14055_v8  ;;  %v14601_v8 = vld [vmem:[%s17207_s3 + $0x20] sm:$0xff] }
  0x79   : > { %12053 = vmatmul.mubr.msk.f32.gmra.mrb[20].mxu1 %vm568_vm0, %v14075_v14  ;;  %11881 = vmatprep.mubr.msk.f32.mxu0 %vm568_vm0, %v14059_v10 }
  0x7a   : > { %12055 = vmatprep.mubr.msk.f32.mxu1 %vm568_vm0, %v14078_v15  ;;  %11903 = vmatpush3.msra.mxu0 %v10078_v27  ;;  %v10112_v27 = vld [vmem:[%s17205_s1 + $0x38] sm:$0xff] }
  0x7b   : > { %11928 = vmatprep.subr.mxu0 %v10095_v3 }
  0x7c   : > { %11882 = vmatmul.mubr.msk.f32.gmra.mrb[2].mxu0 %vm568_vm0, %v14081_v16 }
  0x7d   : > { %12056 = vmatmul.mubr.msk.f32.gmra.mrb[22].mxu1 %vm568_vm0, %v14102_v20  ;;  %11884 = vmatprep.mubr.msk.f32.mxu0 %vm568_vm0, %v14087_v18 }
  0x7e   : > { %12058 = vmatprep.mubr.msk.f32.mxu1 %vm568_vm0, %v14108_v22 }
  0x80   : > { %11885 = vmatmul.mubr.msk.f32.gmra.mrb[4].mxu0 %vm568_vm0, %v14111_v23 }
  0x81   : > { %12059 = vmatmul.mubr.msk.f32.gmra.mrb[24].mxu1 %vm568_vm0, %v14125_v26  ;;  %11887 = vmatprep.mubr.msk.f32.mxu0 %vm568_vm0, %v14115_v25 }
  0x82   : > { %12061 = vmatprep.mubr.msk.f32.mxu1 %vm568_vm0, %v14131_v28 }
  0x84   : > { %11888 = vmatmul.mubr.msk.f32.gmra.mrb[6].mxu0 %vm568_vm0, %v14134_v29 }
  0x85   : > { %12062 = vmatmul.mubr.msk.f32.gmra.mrb[26].mxu1 %vm568_vm0, %v14147_v32  ;;  %11890 = vmatprep.mubr.msk.f32.mxu0 %vm568_vm0, %v14138_v31 }
  0x86   : > { %12064 = vmatprep.mubr.msk.f32.mxu1 %vm568_vm0, %v14153_v34 }
  0x88   : > { %11891 = vmatmul.mubr.msk.f32.gmra.mrb[8].mxu0 %vm568_vm0, %v14156_v35 }
  0x89   : > { %12065 = vmatmul.mubr.msk.f32.gmra.mrb[28].mxu1 %vm568_vm0, %v14169_v38  ;;  %11893 = vmatprep.mubr.msk.f32.mxu0 %vm568_vm0, %v14160_v37 }
  0x8a   : > { %12067 = vmatprep.mubr.msk.f32.mxu1 %vm568_vm0, %v14178_v41 }
  0x8c   : > { %11894 = vmatmul.mubr.msk.f32.gmra.mrb[10].mxu0 %vm568_vm0, %v14181_v42 }
  0x8d   : > { %12068 = vmatmul.mubr.msk.f32.gmra.mrb[30].mxu1 %vm568_vm0, %v14196_v47  ;;  %11896 = vmatprep.mubr.msk.f32.mxu0 %vm568_vm0, %v14205_v50 }
  0x8e   : > { %12070 = vmatprep.mubr.msk.f32.mxu1 %vm568_vm0, %v14202_v49 }
  0x90   : > { %11897 = vmatmul.mubr.msk.f32.gmra.mrb[12].mxu0 %vm568_vm0, %v14227_v56 }
  0x91   : > { %12071 = vmatmul.mubr.msk.f32.gmra.mrb[32].mxu1 %vm568_vm0, %v14222_v55  ;;  %11899 = vmatprep.mubr.msk.f32.mxu0 %vm568_vm0, %v14418_v2 }
  0x92   : > { %12073 = vmatprep.mubr.msk.f32.mxu1 %vm568_vm0, %v14235_v60 }
  0x94   : > { %11900 = vmatmul.mubr.msk.f32.gmra.mrb[14].mxu0 %vm568_vm0, %v14429_v30 }
  0x95   : > { %12074 = vmatmul.mubr.msk.f32.gmra.mrb[34].mxu1 %vm568_vm0, %v14268_v7  ;;  %11904 = vmatprep.mubr.msk.f32.mxu0 %vm568_vm0, %v14247_v62 }
  0x96   : > { %12076 = vmatprep.mubr.msk.f32.mxu1 %vm568_vm0, %v14461_v19 }
  0x98   : > { %11905 = vmatmul.mubr.msk.f32.vlgmr.msra.gmra.mrb[0].mxu0 %vm568_vm0, %v14264_v6 }
  0x99   : > { %12077 = vmatmul.mubr.msk.f32.gmra.mrb[36].mxu1 %vm568_vm0, %v14477_v48  ;;  %11907 = vmatprep.mubr.msk.f32.mxu0 %vm568_vm0, %v14271_v9 }
  0x9a   : > { %12079 = vmatprep.mubr.msk.f32.mxu1 %vm568_vm0, %v14564_v11  ;;  %11929 = vmatpush3.msra.mxu0 %v10095_v3  ;;  %v2207_v3 = vsel %vm514_vm2, %v17250_v4, 0.0 }
  0x9b   : > { %11954 = vmatprep.subr.mxu0 %v10112_v27 }
  0x9c   : > { %11908 = vmatmul.mubr.msk.f32.gmra.mrb[2].mxu0 %vm568_vm0, %v14286_v21 }
  0x9d   : > { %12080 = vmatmul.mubr.msk.f32.gmra.mrb[38].mxu1 %vm568_vm0, %v14578_v0  ;;  %11910 = vmatprep.mubr.msk.f32.mxu0 %vm568_vm0, %v14292_v24 }
  0x9e   : > { %12084 = vmatprep.mubr.msk.f32.mxu1 %vm568_vm0, %v14212_v53  ;;  %v539_v53 = vrot.slane %v14418_v2, 1 }
  0xa0   : > { %11911 = vmatmul.mubr.msk.f32.gmra.mrb[4].mxu0 %vm568_vm0, %v14311_v36 }
  0xa1   : > { %12085 = vmatmul.mubr.msk.f32.vlgmr.msra.gmra.mrb[16].mxu1 %vm568_vm0, %v2207_v3  ;;  %11913 = vmatprep.mubr.msk.f32.mxu0 %vm568_vm0, %v14319_v43  ;;  %v17253_v3 = vld [vmem:[#allocation11_spill] sm:$0xff] }
  0xa2   : > { %12121 = vmatpush3.msra.mxu1 %v14471_v12  ;;  %12087 = vmatprep.mubr.msk.f32.mxu1 %vm568_vm0, %v14594_v46  ;;  %v540_v12 = vrot.slane %v14429_v30, 1 }
  0xa3   : > { %12158 = vmatprep.subr.mxu1 %v14601_v8 }
  0xa4   : > { %11914 = vmatmul.mubr.msk.f32.gmra.mrb[6].mxu0 %vm568_vm0, %v14331_v51  ;;  %v14640_v4 = vsel %vm514_vm2, %v539_v53, %v540_v12  ;;  %v10129_v53 = vld [vmem:[%s17205_s1 + $0x40] sm:$0xff] }
  0xa5   : > { %12088 = vmatmul.mubr.msk.f32.gmra.mrb[18].mxu1 %vm568_vm0, %v14610_v45  ;;  %11916 = vmatprep.mubr.msk.f32.mxu0 %vm568_vm0, %v14336_v52 }
  0xa6   : > { %12090 = vmatprep.mubr.msk.f32.mxu1 %vm568_vm0, %v14230_v57 }
  0xa8   : > { %11917 = vmatmul.mubr.msk.f32.gmra.mrb[8].mxu0 %vm568_vm0, %v14347_v59 }
  0xa9   : > { %12091 = vmatmul.mubr.msk.f32.gmra.mrb[20].mxu1 %vm568_vm0, %v14244_v61  ;;  %11919 = vmatprep.mubr.msk.f32.mxu0 %vm568_vm0, %v14352_v63 }
  0xaa   : > { %12093 = vmatprep.mubr.msk.f32.mxu1 %vm568_vm0, %v14247_v62 }
  0xac   : > { %11920 = vmatmul.mubr.msk.f32.gmra.mrb[10].mxu0 %vm568_vm0, %v17251_v40 }
  0xad   : > { %12094 = vmatmul.mubr.msk.f32.gmra.mrb[22].mxu1 %vm568_vm0, %v14264_v6  ;;  %11922 = vmatprep.mubr.msk.f32.mxu0 %vm568_vm0, %v17252_v1  ;;  %v14649_v6 = vsel %vm514_vm2, %v540_v12, 0.0  ;;  %v543_v12 = vrot.slane %v14445_v58, 1 }
  0xae   : > { %12096 = vmatprep.mubr.msk.f32.mxu1 %vm568_vm0, %v14271_v9 }
  0xaf   : > { %v14710_v61 = vsel %vm514_vm2, %v543_v12, 0.0 }
  0xb0   : > { %11923 = vmatmul.mubr.msk.f32.gmra.mrb[12].mxu0 %vm568_vm0, %v17253_v3 }
  0xb1   : > { %12097 = vmatmul.mubr.msk.f32.gmra.mrb[24].mxu1 %vm568_vm0, %v14286_v21  ;;  %11925 = vmatprep.mubr.msk.f32.mxu0 %vm568_vm0, %v14640_v4 }
  0xb2   : > { %12099 = vmatprep.mubr.msk.f32.mxu1 %vm568_vm0, %v14292_v24 }
  0xb4   : > { %11926 = vmatmul.mubr.msk.f32.gmra.mrb[14].mxu0 %vm568_vm0, %v14649_v6 }
  0xb5   : > { %12100 = vmatmul.mubr.msk.f32.gmra.mrb[26].mxu1 %vm568_vm0, %v14311_v36  ;;  %11930 = vmatprep.mubr.msk.f32.mxu0 %vm568_vm0, %v14108_v22 }
  0xb6   : > { %12102 = vmatprep.mubr.msk.f32.mxu1 %vm568_vm0, %v14319_v43 }
  0xb8   : > { %11931 = vmatmul.mubr.msk.f32.vlgmr.msra.gmra.mrb[0].mxu0 %vm568_vm0, %v14125_v26 }
  0xb9   : > { %12103 = vmatmul.mubr.msk.f32.gmra.mrb[28].mxu1 %vm568_vm0, %v14331_v51  ;;  %11933 = vmatprep.mubr.msk.f32.mxu0 %vm568_vm0, %v14131_v28 }
  0xba   : > { %12105 = vmatprep.mubr.msk.f32.mxu1 %vm568_vm0, %v14336_v52  ;;  %11955 = vmatpush3.msra.mxu0 %v10112_v27  ;;  %v542_v27 = vrot.slane %v14432_v44, 1 }
  0xbb   : > { %11980 = vmatprep.subr.mxu0 %v10129_v53 }
  0xbc   : > { %11934 = vmatmul.mubr.msk.f32.gmra.mrb[2].mxu0 %vm568_vm0, %v14147_v32  ;;  %v14699_v62 = vsel %vm514_vm2, %v542_v27, %v543_v12  ;;  %v14725_v27 = vld [vmem:[%s17207_s3 + $0x28] sm:$0xff] }
  0xbd   : > { %12106 = vmatmul.mubr.msk.f32.gmra.mrb[30].mxu1 %vm568_vm0, %v14347_v59  ;;  %11936 = vmatprep.mubr.msk.f32.mxu0 %vm568_vm0, %v14153_v34 }
  0xbe   : > { %12108 = vmatprep.mubr.msk.f32.mxu1 %vm568_vm0, %v14352_v63 }
  0xc0   : > { %11937 = vmatmul.mubr.msk.f32.gmra.mrb[4].mxu0 %vm568_vm0, %v14169_v38 }
  0xc1   : > { %12109 = vmatmul.mubr.msk.f32.gmra.mrb[32].mxu1 %vm568_vm0, %v17251_v40  ;;  %11939 = vmatprep.mubr.msk.f32.mxu0 %vm568_vm0, %v14178_v41 }
  0xc2   : > { %12111 = vmatprep.mubr.msk.f32.mxu1 %vm568_vm0, %v17252_v1 }
  0xc4   : > { %11940 = vmatmul.mubr.msk.f32.gmra.mrb[6].mxu0 %vm568_vm0, %v14196_v47 }
  0xc5   : > { %12112 = vmatmul.mubr.msk.f32.gmra.mrb[34].mxu1 %vm568_vm0, %v17253_v3  ;;  %11942 = vmatprep.mubr.msk.f32.mxu0 %vm568_vm0, %v14202_v49 }
  0xc6   : > { %12114 = vmatprep.mubr.msk.f32.mxu1 %vm568_vm0, %v14640_v4 }
  0xc8   : > { %11943 = vmatmul.mubr.msk.f32.gmra.mrb[8].mxu0 %vm568_vm0, %v14222_v55 }
  0xc9   : > { %12115 = vmatmul.mubr.msk.f32.gmra.mrb[36].mxu1 %vm568_vm0, %v14649_v6  ;;  %11945 = vmatprep.mubr.msk.f32.mxu0 %vm568_vm0, %v14235_v60 }
  0xca   : > { %12117 = vmatprep.mubr.msk.f32.mxu1 %vm568_vm0, %v14699_v62 }
  0xcc   : > { %11946 = vmatmul.mubr.msk.f32.gmra.mrb[10].mxu0 %vm568_vm0, %v14268_v7 }
  0xcd   : > { %12118 = vmatmul.mubr.msk.f32.gmra.mrb[38].mxu1 %vm568_vm0, %v14710_v61  ;;  %11948 = vmatprep.mubr.msk.f32.mxu0 %vm568_vm0, %v14461_v19 }
  0xce   : > { %12122 = vmatprep.mubr.msk.f32.mxu1 %vm568_vm0, %v14464_v17 }
  0xd0   : > { %11949 = vmatmul.mubr.msk.f32.gmra.mrb[12].mxu0 %vm568_vm0, %v14477_v48 }
  0xd1   : > { %12123 = vmatmul.mubr.msk.f32.vlgmr.msra.gmra.mrb[16].mxu1 %vm568_vm0, %v14483_v54  ;;  %11951 = vmatprep.mubr.msk.f32.mxu0 %vm568_vm0, %v14564_v11 }
  0xd2   : > { %12159 = vmatpush3.msra.mxu1 %v14601_v8  ;;  %12125 = vmatprep.mubr.msk.f32.mxu1 %vm568_vm0, %v14070_v13 }
  0xd3   : > { %12196 = vmatprep.subr.mxu1 %v14725_v27 }
  0xd4   : > { %11952 = vmatmul.mubr.msk.f32.gmra.mrb[14].mxu0 %vm568_vm0, %v14578_v0 }
  0xd5   : > { %12126 = vmatmul.mubr.msk.f32.gmra.mrb[18].mxu1 %vm568_vm0, %v14075_v14  ;;  %11956 = vmatprep.mubr.msk.f32.mxu0 %vm568_vm0, %v14059_v10 }
  0xd6   : > { %12128 = vmatprep.mubr.msk.f32.mxu1 %vm568_vm0, %v14078_v15 }
  0xd8   : > { %11957 = vmatmul.mubr.msk.f32.vlgmr.msra.gmra.mrb[0].mxu0 %vm568_vm0, %v14081_v16 }
  0xd9   : > { %12129 = vmatmul.mubr.msk.f32.gmra.mrb[20].mxu1 %vm568_vm0, %v14102_v20  ;;  %11959 = vmatprep.mubr.msk.f32.mxu0 %vm568_vm0, %v14087_v18 }
  0xda   : > { %12131 = vmatprep.mubr.msk.f32.mxu1 %vm568_vm0, %v14108_v22  ;;  %11981 = vmatpush3.msra.mxu0 %v10129_v53  ;;  %v14800_v53 = vld [vmem:[%s14039_s16 + $0xc0] sm:$0xff] }
  0xdc   : > { %11960 = vmatmul.mubr.msk.f32.gmra.mrb[2].mxu0 %vm568_vm0, %v14111_v23 }
  0xdd   : > { %12132 = vmatmul.mubr.msk.f32.gmra.mrb[22].mxu1 %vm568_vm0, %v14125_v26  ;;  %11962 = vmatprep.mubr.msk.f32.mxu0 %vm568_vm0, %v14115_v25 }
  0xde   : > { %12134 = vmatprep.mubr.msk.f32.mxu1 %vm568_vm0, %v14131_v28 }
  0xe0   : > { %11963 = vmatmul.mubr.msk.f32.gmra.mrb[4].mxu0 %vm568_vm0, %v14134_v29 }
  0xe1   : > { %12135 = vmatmul.mubr.msk.f32.gmra.mrb[24].mxu1 %vm568_vm0, %v14147_v32  ;;  %11965 = vmatprep.mubr.msk.f32.mxu0 %vm568_vm0, %v14138_v31 }
  0xe2   : > { %12137 = vmatprep.mubr.msk.f32.mxu1 %vm568_vm0, %v14153_v34 }
  0xe4   : > { %11966 = vmatmul.mubr.msk.f32.gmra.mrb[6].mxu0 %vm568_vm0, %v14156_v35 }
  0xe5   : > { %12138 = vmatmul.mubr.msk.f32.gmra.mrb[26].mxu1 %vm568_vm0, %v14169_v38  ;;  %11968 = vmatprep.mubr.msk.f32.mxu0 %vm568_vm0, %v14160_v37 }
  0xe6   : > { %12140 = vmatprep.mubr.msk.f32.mxu1 %vm568_vm0, %v14178_v41 }
  0xe8   : > { %11969 = vmatmul.mubr.msk.f32.gmra.mrb[8].mxu0 %vm568_vm0, %v14181_v42 }
  0xe9   : > { %12141 = vmatmul.mubr.msk.f32.gmra.mrb[28].mxu1 %vm568_vm0, %v14196_v47  ;;  %11971 = vmatprep.mubr.msk.f32.mxu0 %vm568_vm0, %v14205_v50 }
  0xea   : > { %12143 = vmatprep.mubr.msk.f32.mxu1 %vm568_vm0, %v14202_v49 }
  0xec   : > { %v14783_v8 = vpop.f32.mrb[0].mxu1  ;;  %11972 = vmatmul.mubr.msk.f32.gmra.mrb[10].mxu0 %vm568_vm0, %v14227_v56 }
  0xed   : > { %17254 = vst [vmem:[#allocation9_spill] sm:$0xff] %v14783_v8  ;;  %v14787_v17 = vpop.f32.mrb[1].mxu1  ;;  %12144 = vmatmul.mubr.msk.f32.gmra.mrb[30].mxu1 %vm568_vm0, %v14222_v55  ;;  %11974 = vmatprep.mubr.msk.f32.mxu0 %vm568_vm0, %v14418_v2  ;;  %v14812_v8 = vld [vmem:[%s14039_s16 + $0xc8] sm:$0xff] }
  0xee   : > { %17255 = vst [vmem:[#allocation10_spill] sm:$0xff] %v14787_v17  ;;  %12146 = vmatprep.mubr.msk.f32.mxu1 %vm568_vm0, %v14235_v60  ;;  %v2177_v17 = vrot.slane %v14800_v53, 7 }
  0xf0   : > { %v14795_v54 = vpop.f32.mrb[2].mxu1  ;;  %11975 = vmatmul.mubr.msk.f32.gmra.mrb[12].mxu0 %vm568_vm0, %v14429_v30 }
  0xf1   : > { %17256 = vst [vmem:[#allocation11_spill] sm:$0xff] %v14795_v54  ;;  %v14802_v12 = vpop.f32.mrb[3].mxu1  ;;  %12147 = vmatmul.mubr.msk.f32.gmra.mrb[32].mxu1 %vm568_vm0, %v14268_v7  ;;  %11977 = vmatprep.mubr.msk.f32.mxu0 %vm568_vm0, %v14432_v44 }
  0xf2   : > { %17257 = vst [vmem:[#allocation15_spill] sm:$0xff] %v14802_v12  ;;  %12149 = vmatprep.mubr.msk.f32.mxu1 %vm568_vm0, %v14461_v19  ;;  %v2178_v12 = vrot.slane %v14812_v8, 7  ;;  %v14828_v19 = vsel %vm463_vm1, 0.0, %v2177_v17 }
  0xf4   : > { %v14814_v54 = vpop.f32.mrb[4].mxu1  ;;  %11978 = vmatmul.mubr.msk.f32.gmra.mrb[14].mxu0 %vm568_vm0, %v14445_v58 }
  0xf5   : > { %17258 = vst [vmem:[#allocation16_spill] sm:$0xff] %v14814_v54  ;;  %v14818_v60 = vpop.f32.mrb[5].mxu1  ;;  %12150 = vmatmul.mubr.msk.f32.gmra.mrb[34].mxu1 %vm568_vm0, %v14477_v48  ;;  %11982 = vmatprep.mubr.msk.f32.mxu0 %vm568_vm0, %v14271_v9 }
  0xf6   : > { %17259 = vst [vmem:[#allocation17_spill] sm:$0xff] %v14818_v60  ;;  %12152 = vmatprep.mubr.msk.f32.mxu1 %vm568_vm0, %v14564_v11  ;;  %v14843_v11 = vsel %vm463_vm1, %v2177_v17, %v2178_v12  ;;  %v10296_v17 = vld [vmem:[%s17207_s3 + $0x30] sm:$0xff] }
  0xf8   : > { %v14830_v54 = vpop.f32.mrb[6].mxu1  ;;  %11983 = vmatmul.mubr.msk.f32.vlgmr.msra.gmra.mrb[0].mxu0 %vm568_vm0, %v14286_v21 }
  0xf9   : > { %17260 = vst [vmem:[#allocation18_spill] sm:$0xff] %v14830_v54  ;;  %v14834_v60 = vpop.f32.mrb[7].mxu1  ;;  %12153 = vmatmul.mubr.msk.f32.gmra.mrb[36].mxu1 %vm568_vm0, %v14578_v0  ;;  %11985 = vmatprep.mubr.msk.f32.mxu0 %vm568_vm0, %v14292_v24 }
  0xfa   : > { %17261 = vst [vmem:[#allocation19_spill] sm:$0xff] %v14834_v60  ;;  %12155 = vmatprep.mubr.msk.f32.mxu1 %vm568_vm0, %v14828_v19 }
  0xfc   : > { %v14845_v48 = vpop.f32.mrb[8].mxu1  ;;  %11986 = vmatmul.mubr.msk.f32.gmra.mrb[2].mxu0 %vm568_vm0, %v14311_v36 }
  0xfd   : > { %v14849_v54 = vpop.f32.mrb[9].mxu1  ;;  %12156 = vmatmul.mubr.msk.f32.gmra.mrb[38].mxu1 %vm568_vm0, %v14843_v11  ;;  %11988 = vmatprep.mubr.msk.f32.mxu0 %vm568_vm0, %v14319_v43 }
  0xfe   : > { %17262 = vst [vmem:[#allocation20_spill] sm:$0xff] %v14849_v54  ;;  %12160 = vmatprep.mubr.msk.f32.mxu1 %vm568_vm0, %v14297_v33  ;;  %v17265_v33 = vld [vmem:[#allocation2_spill] sm:$0xff] }
 0x100   : > { %v14857_v60 = vpop.f32.mrb[10].mxu1  ;;  %11989 = vmatmul.mubr.msk.f32.gmra.mrb[4].mxu0 %vm568_vm0, %v14331_v51 }
 0x101   : > { %17263 = vst [vmem:[#allocation21_spill] sm:$0xff] %v14857_v60  ;;  %v14864_v12 = vpop.f32.mrb[11].mxu1  ;;  %12161 = vmatmul.mubr.msk.f32.vlgmr.msra.gmra.mrb[16].mxu1 %vm568_vm0, %v14316_v39  ;;  %11991 = vmatprep.mubr.msk.f32.mxu0 %vm568_vm0, %v14336_v52  ;;  %v17267_v39 = vld [vmem:[#allocation4_spill] sm:$0xff] }
 0x102   : > { %17264 = vst [vmem:[#allocation22_spill] sm:$0xff] %v14864_v12  ;;  %12197 = vmatpush3.msra.mxu1 %v14725_v27  ;;  %12163 = vmatprep.mubr.msk.f32.mxu1 %vm568_vm0, %v17265_v33  ;;  %v17266_v12 = vld [vmem:[#allocation3_spill] sm:$0xff]  ;;  %v17270_v33 = vld [vmem:[#allocation6_spill] sm:$0xff] }
 0x103   : > { %12234 = vmatprep.subr.mxu1 %v10296_v17 }
 0x104   : > { %v14873_v60 = vpop.f32.mrb[12].mxu1  ;;  %11992 = vmatmul.mubr.msk.f32.gmra.mrb[6].mxu0 %vm568_vm0, %v14347_v59 }
 0x105   : > { %v14877_v54 = vpop.f32.mrb[13].mxu1  ;;  %12164 = vmatmul.mubr.msk.f32.gmra.mrb[18].mxu1 %vm568_vm0, %v17266_v12  ;;  %11994 = vmatprep.mubr.msk.f32.mxu0 %vm568_vm0, %v14352_v63  ;;  %v10321_v12 = vld [vmem:[%s17207_s3 + $0x38] sm:$0xff] }
 0x106   : > { %12166 = vmatprep.mubr.msk.f32.mxu1 %vm568_vm0, %v14048_v5 }
 0x108   : > { %11995 = vmatmul.mubr.msk.f32.gmra.mrb[8].mxu0 %vm568_vm0, %v17251_v40 }
 0x109   : > { %12167 = vmatmul.mubr.msk.f32.gmra.mrb[20].mxu1 %vm568_vm0, %v17267_v39  ;;  %11997 = vmatprep.mubr.msk.f32.mxu0 %vm568_vm0, %v17252_v1  ;;  %v17271_v39 = vld [vmem:[#allocation7_spill] sm:$0xff] }
 0x10a   : > { %12169 = vmatprep.mubr.msk.f32.mxu1 %vm568_vm0, %v14059_v10 }
 0x10c   : > { %11998 = vmatmul.mubr.msk.f32.gmra.mrb[10].mxu0 %vm568_vm0, %v17253_v3 }
 0x10d   : > { %12170 = vmatmul.mubr.msk.f32.gmra.mrb[22].mxu1 %vm568_vm0, %v14081_v16  ;;  %12000 = vmatprep.mubr.msk.f32.mxu0 %vm568_vm0, %v14640_v4 }
 0x10e   : > { %12172 = vmatprep.mubr.msk.f32.mxu1 %vm568_vm0, %v14087_v18 }
 0x110   : > { %v14901_v5 = vpop.f32.mrb[14].mxu1  ;;  %12001 = vmatmul.mubr.msk.f32.gmra.mrb[12].mxu0 %vm568_vm0, %v14649_v6 }
 0x111   : > { %17268 = vst [vmem:[#allocation2_spill] sm:$0xff] %v14901_v5  ;;  %v14905_v27 = vpop.f32.mrb[15].mxu1  ;;  %12173 = vmatmul.mubr.msk.f32.gmra.mrb[24].mxu1 %vm568_vm0, %v14111_v23  ;;  %12003 = vmatprep.mubr.msk.f32.mxu0 %vm568_vm0, %v14699_v62 }
 0x112   : > { %17269 = vst [vmem:[#allocation3_spill] sm:$0xff] %v14905_v27  ;;  %12175 = vmatprep.mubr.msk.f32.mxu1 %vm568_vm0, %v14115_v25  ;;  %v17272_v27 = vld [vmem:[#allocation8_spill] sm:$0xff] }
 0x114   : > { %12004 = vmatmul.mubr.msk.f32.gmra.mrb[14].mxu0 %vm568_vm0, %v14710_v61 }
 0x115   : > { %12176 = vmatmul.mubr.msk.f32.gmra.mrb[26].mxu1 %vm568_vm0, %v14134_v29 }
 0x116   : > { %12178 = vmatprep.mubr.msk.f32.mxu1 %vm568_vm0, %v14138_v31 }
 0x119   : > { %12179 = vmatmul.mubr.msk.f32.gmra.mrb[28].mxu1 %vm568_vm0, %v14156_v35 }
 0x11a   : > { %12181 = vmatprep.mubr.msk.f32.mxu1 %vm568_vm0, %v14160_v37 }
 0x11d   : > { %12182 = vmatmul.mubr.msk.f32.gmra.mrb[30].mxu1 %vm568_vm0, %v14181_v42 }
 0x11e   : > { %12184 = vmatprep.mubr.msk.f32.mxu1 %vm568_vm0, %v14205_v50 }
 0x121   : > { %12185 = vmatmul.mubr.msk.f32.gmra.mrb[32].mxu1 %vm568_vm0, %v14227_v56 }
 0x122   : > { %12187 = vmatprep.mubr.msk.f32.mxu1 %vm568_vm0, %v14418_v2 }
 0x125   : > { %12188 = vmatmul.mubr.msk.f32.gmra.mrb[34].mxu1 %vm568_vm0, %v14429_v30 }
 0x126   : > { %12190 = vmatprep.mubr.msk.f32.mxu1 %vm568_vm0, %v14432_v44 }
 0x129   : > { %12191 = vmatmul.mubr.msk.f32.gmra.mrb[36].mxu1 %vm568_vm0, %v14445_v58 }
 0x12a   : > { %12193 = vmatprep.mubr.msk.f32.mxu1 %vm568_vm0, %v14800_v53 }
 0x12d   : > { %12194 = vmatmul.mubr.msk.f32.gmra.mrb[38].mxu1 %vm568_vm0, %v14812_v8 }
 0x12e   : > { %12198 = vmatprep.mubr.msk.f32.mxu1 %vm568_vm0, %v14594_v46  ;;  %v2197_v46 = vrot.slane %v14800_v53, 1 }
 0x131   : > { %12199 = vmatmul.mubr.msk.f32.vlgmr.msra.gmra.mrb[16].mxu1 %vm568_vm0, %v14610_v45  ;;  %v2198_v45 = vrot.slane %v14812_v8, 1 }
 0x132   : > { %12235 = vmatpush3.msra.mxu1 %v10296_v17  ;;  %12201 = vmatprep.mubr.msk.f32.mxu1 %vm568_vm0, %v14230_v57 }
 0x133   : > { %12272 = vmatprep.subr.mxu1 %v10321_v12  ;;  %v14989_v17 = vsel %vm514_vm2, %v2197_v46, %v2198_v45  ;;  %v14996_v5 = vsel %vm514_vm2, %v2198_v45, 0.0  ;;  %v10346_v46 = vld [vmem:[%s17207_s3 + $0x40] sm:$0xff] }
 0x135   : > { %12202 = vmatmul.mubr.msk.f32.gmra.mrb[18].mxu1 %vm568_vm0, %v17270_v33 }
 0x136   : > { %12204 = vmatprep.mubr.msk.f32.mxu1 %vm568_vm0, %v17271_v39 }
 0x139   : > { %12205 = vmatmul.mubr.msk.f32.gmra.mrb[20].mxu1 %vm568_vm0, %v17272_v27 }
 0x13a   : > { %12207 = vmatprep.mubr.msk.f32.mxu1 %vm568_vm0, %v14271_v9 }
 0x13d   : > { %12208 = vmatmul.mubr.msk.f32.gmra.mrb[22].mxu1 %vm568_vm0, %v14286_v21 }
 0x13e   : > { %12210 = vmatprep.mubr.msk.f32.mxu1 %vm568_vm0, %v14292_v24 }
 0x141   : > { %12211 = vmatmul.mubr.msk.f32.gmra.mrb[24].mxu1 %vm568_vm0, %v14311_v36 }
 0x142   : > { %12213 = vmatprep.mubr.msk.f32.mxu1 %vm568_vm0, %v14319_v43 }
 0x145   : > { %12214 = vmatmul.mubr.msk.f32.gmra.mrb[26].mxu1 %vm568_vm0, %v14331_v51 }
 0x146   : > { %12216 = vmatprep.mubr.msk.f32.mxu1 %vm568_vm0, %v14336_v52 }
 0x149   : > { %12217 = vmatmul.mubr.msk.f32.gmra.mrb[28].mxu1 %vm568_vm0, %v14347_v59 }
 0x14a   : > { %12219 = vmatprep.mubr.msk.f32.mxu1 %vm568_vm0, %v14352_v63 }
 0x14d   : > { %12220 = vmatmul.mubr.msk.f32.gmra.mrb[30].mxu1 %vm568_vm0, %v17251_v40 }
 0x14e   : > { %12222 = vmatprep.mubr.msk.f32.mxu1 %vm568_vm0, %v17252_v1 }
 0x151   : > { %12223 = vmatmul.mubr.msk.f32.gmra.mrb[32].mxu1 %vm568_vm0, %v17253_v3 }
 0x152   : > { %12225 = vmatprep.mubr.msk.f32.mxu1 %vm568_vm0, %v14640_v4 }
 0x155   : > { %12226 = vmatmul.mubr.msk.f32.gmra.mrb[34].mxu1 %vm568_vm0, %v14649_v6 }
 0x156   : > { %12228 = vmatprep.mubr.msk.f32.mxu1 %vm568_vm0, %v14699_v62 }
 0x159   : > { %12229 = vmatmul.mubr.msk.f32.gmra.mrb[36].mxu1 %vm568_vm0, %v14710_v61 }
 0x15a   : > { %12231 = vmatprep.mubr.msk.f32.mxu1 %vm568_vm0, %v14989_v17 }
 0x15d   : > { %12232 = vmatmul.mubr.msk.f32.gmra.mrb[38].mxu1 %vm568_vm0, %v14996_v5 }
 0x15e   : > { %12236 = vmatprep.mubr.msk.f32.mxu1 %vm568_vm0, %v14070_v13  ;;  %v17273_v13 = vld [vmem:[#allocation5_spill] sm:$0xff] }
 0x161   : > { %12237 = vmatmul.mubr.msk.f32.vlgmr.msra.gmra.mrb[16].mxu1 %vm568_vm0, %v14075_v14  ;;  %v17274_v14 = vld [vmem:[#allocation12_spill] sm:$0xff] }
 0x162   : > { %12273 = vmatpush3.msra.mxu1 %v10321_v12  ;;  %12239 = vmatprep.mubr.msk.f32.mxu1 %vm568_vm0, %v14078_v15  ;;  %v15038_v15 = vld [vmem:[%s14039_s16 + $0xd0] sm:$0xff] }
 0x163   : > { %12310 = vmatprep.subr.mxu1 %v10346_v46 }
 0x165   : > { %12240 = vmatmul.mubr.msk.f32.gmra.mrb[18].mxu1 %vm568_vm0, %v14102_v20  ;;  %v17275_v20 = vld [vmem:[#allocation13_spill] sm:$0xff] }
 0x166   : > { %12242 = vmatprep.mubr.msk.f32.mxu1 %vm568_vm0, %v14108_v22  ;;  %v17276_v22 = vld [vmem:[#allocation14_spill] sm:$0xff] }
 0x169   : > { %12243 = vmatmul.mubr.msk.f32.gmra.mrb[20].mxu1 %vm568_vm0, %v14125_v26  ;;  %v2180_v26 = vrot.slane %v15038_v15, 7 }
 0x16a   : > { %12245 = vmatprep.mubr.msk.f32.mxu1 %vm568_vm0, %v14131_v28  ;;  %v15046_v28 = vld [vmem:[%s14039_s16 + $0xd8] sm:$0xff] }
 0x16d   : > { %12246 = vmatmul.mubr.msk.f32.gmra.mrb[22].mxu1 %vm568_vm0, %v14147_v32  ;;  %v2181_v32 = vrot.slane %v15046_v28, 7 }
 0x16e   : > { %12248 = vmatprep.mubr.msk.f32.mxu1 %vm568_vm0, %v14153_v34  ;;  %v2190_v34 = vsel %vm463_vm1, 0.0, %v2180_v26 }
 0x171   : > { %12249 = vmatmul.mubr.msk.f32.gmra.mrb[24].mxu1 %vm568_vm0, %v14169_v38  ;;  %v2182_v38 = vsel %vm463_vm1, %v2180_v26, %v2181_v32 }
 0x172   : > { %12251 = vmatprep.mubr.msk.f32.mxu1 %vm568_vm0, %v14178_v41  ;;  %v13885_v41 = vld [vmem:[%s14039_s16 + $0x20] sm:$0xff] }
 0x175   : > { %12252 = vmatmul.mubr.msk.f32.gmra.mrb[26].mxu1 %vm568_vm0, %v14196_v47  ;;  %v10535_v47 = vld [vmem:[%s17211_s7 + $0x2] sm:$0x3] }
 0x176   : > { %12254 = vmatprep.mubr.msk.f32.mxu1 %vm568_vm0, %v14202_v49  ;;  %v13886_v49 = vld [vmem:[%s14039_s16 + $0x28] sm:$0xff] }
 0x179   : > { %12255 = vmatmul.mubr.msk.f32.gmra.mrb[28].mxu1 %vm568_vm0, %v14222_v55  ;;  %v13887_v55 = vld [vmem:[%s14039_s16 + $0x30] sm:$0xff] }
 0x17a   : > { %12257 = vmatprep.mubr.msk.f32.mxu1 %vm568_vm0, %v17273_v13 }
 0x17d   : > { %12258 = vmatmul.mubr.msk.f32.gmra.mrb[30].mxu1 %vm568_vm0, %v14268_v7  ;;  %v13888_v7 = vld [vmem:[%s14039_s16 + $0x38] sm:$0xff] }
 0x17e   : > { %12260 = vmatprep.mubr.msk.f32.mxu1 %vm568_vm0, %v17274_v14 }
 0x181   : > { %12261 = vmatmul.mubr.msk.f32.gmra.mrb[32].mxu1 %vm568_vm0, %v17275_v20  ;;  %v15230_v20 = vstv %s10372_s29 }
 0x182   : > { %12263 = vmatprep.mubr.msk.f32.mxu1 %vm568_vm0, %v17276_v22  ;;  %v15235_v22 = vld [vmem:[%s17208_s4] ss:$0 sm:$0xff]  ;;  %vm4233_vm4 = vcmp.ge.s32.totalorder %v15230_v20, 0  ;;  %vm4245_vm5 = vcmp.lt.s32.totalorder %v15230_v20, 16 }
 0x183   : > { %vm15243_vm7 = vmand %vm4233_vm4, %vm4245_vm5 }
 0x185   : > { %12264 = vmatmul.mubr.msk.f32.gmra.mrb[34].mxu1 %vm568_vm0, %v14578_v0 }
 0x186   : > { %12266 = vmatprep.mubr.msk.f32.mxu1 %vm568_vm0, %v14828_v19 }
 0x189   : > { %12267 = vmatmul.mubr.msk.f32.gmra.mrb[36].mxu1 %vm568_vm0, %v14843_v11 }
 0x18a   : > { %12269 = vmatprep.mubr.msk.f32.mxu1 %vm568_vm0, %v2190_v34 }
 0x18d   : > { %12270 = vmatmul.mubr.msk.f32.gmra.mrb[38].mxu1 %vm568_vm0, %v2182_v38  ;;  %v4223_v38 = vadd.s32 2, %v15230_v20 }
 0x18e   : > { %12274 = vmatprep.mubr.msk.f32.mxu1 %vm568_vm0, %v13885_v41 }
 0x18f   : > { %vm4235_vm12 = vcmp.ge.s32.totalorder %v4223_v38, 0  ;;  %vm4247_vm13 = vcmp.lt.s32.totalorder %v4223_v38, 16 }
 0x191   : > { %12275 = vmatmul.mubr.msk.f32.vlgmr.msra.gmra.mrb[16].mxu1 %vm568_vm0, %v13886_v49  ;;  %v4226_v49 = vadd.s32 5, %v15230_v20 }
 0x192   : > { %12311 = vmatpush3.msra.mxu1 %v10346_v46  ;;  %12277 = vmatprep.mubr.msk.f32.mxu1 %vm568_vm0, %v13887_v55  ;;  %v17301_v46 = vld [vmem:[#allocation2_spill] sm:$0xff] }
 0x193   : > { %12582 = vmatprep.subr.msk.mxu1 %vm4473_vm3, %v10535_v47 }
 0x195   : > { %12278 = vmatmul.mubr.msk.f32.gmra.mrb[18].mxu1 %vm568_vm0, %v13888_v7 }
 0x196   : > { %12280 = vmatprep.mubr.msk.f32.mxu1 %vm568_vm0, %v14059_v10 }
 0x199   : > { %12281 = vmatmul.mubr.msk.f32.gmra.mrb[20].mxu1 %vm568_vm0, %v14081_v16  ;;  %v17277_v16 = vld [vmem:[#allocation9_spill] sm:$0xff] }
 0x19a   : > { %12283 = vmatprep.mubr.msk.f32.mxu1 %vm568_vm0, %v14087_v18 }
 0x19d   : > { %12284 = vmatmul.mubr.msk.f32.gmra.mrb[22].mxu1 %vm568_vm0, %v14111_v23 }
 0x19e   : > { %12286 = vmatprep.mubr.msk.f32.mxu1 %vm568_vm0, %v14115_v25  ;;  %v17278_v25 = vld [vmem:[#allocation10_spill] sm:$0xff] }
 0x1a1   : > { %12287 = vmatmul.mubr.msk.f32.gmra.mrb[24].mxu1 %vm568_vm0, %v14134_v29 }
 0x1a2   : > { %12289 = vmatprep.mubr.msk.f32.mxu1 %vm568_vm0, %v14138_v31 }
 0x1a5   : > { %12290 = vmatmul.mubr.msk.f32.gmra.mrb[26].mxu1 %vm568_vm0, %v14156_v35  ;;  %v17280_v35 = vld [vmem:[#allocation11_spill] sm:$0xff] }
 0x1a6   : > { %12292 = vmatprep.mubr.msk.f32.mxu1 %vm568_vm0, %v14160_v37 }
 0x1a9   : > { %12293 = vmatmul.mubr.msk.f32.gmra.mrb[28].mxu1 %vm568_vm0, %v14181_v42 }
 0x1aa   : > { %12295 = vmatprep.mubr.msk.f32.mxu1 %vm568_vm0, %v14205_v50  ;;  %v17282_v50 = vld [vmem:[#allocation15_spill] sm:$0xff] }
 0x1ad   : > { %12296 = vmatmul.mubr.msk.f32.gmra.mrb[30].mxu1 %vm568_vm0, %v14227_v56 }
 0x1ae   : > { %12298 = vmatprep.mubr.msk.f32.mxu1 %vm568_vm0, %v14418_v2  ;;  %v17288_v2 = vld [vmem:[#allocation18_spill] sm:$0xff] }
 0x1b1   : > { %12299 = vmatmul.mubr.msk.f32.gmra.mrb[32].mxu1 %vm568_vm0, %v14429_v30 }
 0x1b2   : > { %12301 = vmatprep.mubr.msk.f32.mxu1 %vm568_vm0, %v14432_v44 }
 0x1b5   : > { %12302 = vmatmul.mubr.msk.f32.gmra.mrb[34].mxu1 %vm568_vm0, %v14445_v58 }
 0x1b6   : > { %12304 = vmatprep.mubr.msk.f32.mxu1 %vm568_vm0, %v14800_v53  ;;  %v17295_v53 = vld [vmem:[#allocation21_spill] sm:$0xff] }
 0x1b9   : > { %12305 = vmatmul.mubr.msk.f32.gmra.mrb[36].mxu1 %vm568_vm0, %v14812_v8 }
 0x1ba   : > { %12307 = vmatprep.mubr.msk.f32.mxu1 %vm568_vm0, %v15038_v15 }
 0x1bd   : > { %12308 = vmatmul.mubr.msk.f32.gmra.mrb[38].mxu1 %vm568_vm0, %v15046_v28 }
 0x1be   : > { %12312 = vmatprep.mubr.msk.f32.mxu1 %vm568_vm0, %v14230_v57 }
 0x1c1   : > { %12313 = vmatmul.mubr.msk.f32.vlgmr.msra.gmra.mrb[16].mxu1 %vm568_vm0, %v17270_v33  ;;  %v2201_v33 = vrot.slane %v15046_v28, 1  ;;  %v4222_v28 = vadd.s32 1, %v15230_v20 }
 0x1c2   : > { %12315 = vmatprep.mubr.msk.f32.mxu1 %vm568_vm0, %v17271_v39  ;;  %12583 = vmatpush3.msk.msra.mxu1 %vm4473_vm3, %v10535_v47 }
 0x1c3   : > { %vm4234_vm10 = vcmp.ge.s32.totalorder %v4222_v28, 0  ;;  %vm4246_vm11 = vcmp.lt.s32.totalorder %v4222_v28, 16 }
 0x1c4   : > { %vm15264_vm15 = vmand %vm4234_vm10, %vm4246_vm11 }
 0x1c5   : > { %12316 = vmatmul.mubr.msk.f32.gmra.mrb[18].mxu1 %vm568_vm0, %v17272_v27 }
 0x1c6   : > { %12318 = vmatprep.mubr.msk.f32.mxu1 %vm568_vm0, %v14271_v9  ;;  %v17284_v9 = vld [vmem:[#allocation16_spill] sm:$0xff] }
 0x1c9   : > { %12319 = vmatmul.mubr.msk.f32.gmra.mrb[20].mxu1 %vm568_vm0, %v14286_v21 }
 0x1ca   : > { %12321 = vmatprep.mubr.msk.f32.mxu1 %vm568_vm0, %v14292_v24 }
 0x1cb   : > { %v11984_v10 = vpop.f32.mrb[0].mxu0 }
 0x1cc   : > { %v15127_v18 = vadd.f32 %v11984_v10, %v17277_v16  ;;  %v2045_v23 = vpop.f32.mrb[1].mxu0 }
 0x1cd   : > { %v15130_v29 = vadd.f32 %v2045_v23, %v17278_v25  ;;  %12322 = vmatmul.mubr.msk.f32.gmra.mrb[22].mxu1 %vm568_vm0, %v14311_v36  ;;  %v17286_v36 = vld [vmem:[#allocation17_spill] sm:$0xff] }
 0x1ce   : > { %12324 = vmatprep.mubr.msk.f32.mxu1 %vm568_vm0, %v14319_v43 }
 0x1cf   : > { %17279 = vst [vmem:[#allocation4_spill] sm:$0xff] %v15130_v29  ;;  %v11987_v31 = vpop.f32.mrb[2].mxu0  ;;  %v10666_v29 = vld [vmem:[%s17211_s7 + $0xc] sm:$0x3] }
 0x1d0   : > { %v15137_v37 = vadd.f32 %v11987_v31, %v17280_v35  ;;  %v2055_v42 = vpop.f32.mrb[3].mxu0 }
 0x1d1   : > { %v15140_v56 = vadd.f32 %v2055_v42, %v17282_v50  ;;  %12325 = vmatmul.mubr.msk.f32.gmra.mrb[24].mxu1 %vm568_vm0, %v14331_v51  ;;  %v4224_v42 = vadd.s32 3, %v15230_v20 }
 0x1d2   : > { %17281 = vst [vmem:[#allocation6_spill] sm:$0xff] %v15137_v37  ;;  %12327 = vmatprep.mubr.msk.f32.mxu1 %vm568_vm0, %v14336_v52  ;;  %v17290_v52 = vld [vmem:[#allocation19_spill] sm:$0xff] }
 0x1d3   : > { %17283 = vst [vmem:[#allocation7_spill] sm:$0xff] %v15140_v56  ;;  %v11990_v57 = vpop.f32.mrb[4].mxu0  ;;  %vm4236_vm5 = vcmp.ge.s32.totalorder %v4224_v42, 0  ;;  %vm4248_vm10 = vcmp.lt.s32.totalorder %v4224_v42, 16 }
 0x1d4   : > { %v15147_v21 = vadd.f32 %v11990_v57, %v17284_v9  ;;  %v2065_v24 = vpop.f32.mrb[5].mxu0  ;;  %v15261_v9 = vld [vmem:[%s17211_s7 + $0x4] sm:$0x3] }
 0x1d5   : > { %v15150_v43 = vadd.f32 %v2065_v24, %v17286_v36  ;;  %12328 = vmatmul.mubr.msk.f32.gmra.mrb[26].mxu1 %vm568_vm0, %v14347_v59 }
 0x1d6   : > { %17285 = vst [vmem:[#allocation8_spill] sm:$0xff] %v15147_v21  ;;  %12330 = vmatprep.mubr.msk.f32.mxu1 %vm568_vm0, %v14352_v63  ;;  %v17293_v63 = vld [vmem:[#allocation20_spill] sm:$0xff] }
 0x1d7   : > { %17287 = vst [vmem:[#allocation5_spill] sm:$0xff] %v15150_v43  ;;  %v11993_v19 = vpop.f32.mrb[6].mxu0 }
 0x1d8   : > { %v15157_v51 = vadd.f32 %v11993_v19, %v17288_v2  ;;  %v2075_v30 = vpop.f32.mrb[7].mxu0 }
 0x1d9   : > { %v15160_v44 = vadd.f32 %v2075_v30, %v17290_v52  ;;  %12331 = vmatmul.mubr.msk.f32.gmra.mrb[28].mxu1 %vm568_vm0, %v17251_v40 }
 0x1da   : > { %17289 = vst [vmem:[#allocation12_spill] sm:$0xff] %v15157_v51  ;;  %12333 = vmatprep.mubr.msk.f32.mxu1 %vm568_vm0, %v17252_v1  ;;  %v17297_v1 = vld [vmem:[#allocation22_spill] sm:$0xff] }
 0x1db   : > { %17291 = vst [vmem:[#allocation13_spill] sm:$0xff] %v15160_v44  ;;  %v11996_v58 = vpop.f32.mrb[8].mxu0 }
 0x1dc   : > { %v15167_v59 = vadd.f32 %v11996_v58, %v14845_v48  ;;  %v2085_v11 = vpop.f32.mrb[9].mxu0 }
 0x1dd   : > { %v15170_v0 = vadd.f32 %v2085_v11, %v17293_v63  ;;  %12334 = vmatmul.mubr.msk.f32.gmra.mrb[30].mxu1 %vm568_vm0, %v17253_v3  ;;  %v2200_v3 = vrot.slane %v15038_v15, 1 }
 0x1de   : > { %17292 = vst [vmem:[#allocation14_spill] sm:$0xff] %v15167_v59  ;;  %12336 = vmatprep.mubr.msk.f32.mxu1 %vm568_vm0, %v14640_v4 }
 0x1df   : > { %17294 = vst [vmem:[#allocation9_spill] sm:$0xff] %v15170_v0  ;;  %v11999_v8 = vpop.f32.mrb[10].mxu0 }
 0x1e0   : > { %v15177_v40 = vadd.f32 %v11999_v8, %v17295_v53  ;;  %v2095_v27 = vpop.f32.mrb[11].mxu0 }
 0x1e1   : > { %v15180_v12 = vadd.f32 %v2095_v27, %v17297_v1  ;;  %12337 = vmatmul.mubr.msk.f32.gmra.mrb[32].mxu1 %vm568_vm0, %v14649_v6 }
 0x1e2   : > { %17296 = vst [vmem:[#allocation10_spill] sm:$0xff] %v15177_v40  ;;  %12339 = vmatprep.mubr.msk.f32.mxu1 %vm568_vm0, %v14699_v62  ;;  %v2202_v62 = vsel %vm514_vm2, %v2200_v3, %v2201_v33 }
 0x1e3   : > { %17298 = vst [vmem:[#allocation11_spill] sm:$0xff] %v15180_v12  ;;  %v12002_v48 = vpop.f32.mrb[12].mxu0 }
 0x1e4   : > { %v15189_v4 = vadd.f32 %v12002_v48, %v14873_v60  ;;  %v2105_v39 = vpop.f32.mrb[13].mxu0  ;;  %v17303_v60 = vld [vmem:[#allocation3_spill] sm:$0xff] }
 0x1e5   : > { %v15192_v45 = vadd.f32 %v2105_v39, %v14877_v54  ;;  %12340 = vmatmul.mubr.msk.f32.gmra.mrb[34].mxu1 %vm568_vm0, %v14710_v61  ;;  %v2210_v61 = vsel %vm514_vm2, %v2201_v33, 0.0  ;;  %v10373_v54 = vld [vmem:[%s17209_s5 + $0x2] sm:$0x3]  ;;  %v15293_v33 = vld [vmem:[%s17209_s5 + $0x4] sm:$0x3] }
 0x1e6   : > { %17299 = vst [vmem:[#allocation15_spill] sm:$0xff] %v15189_v4  ;;  %12342 = vmatprep.mubr.msk.f32.mxu1 %vm568_vm0, %v14989_v17  ;;  %12348 = vmatprep.subr.msk.mxu0 %vm4473_vm3, %v10373_v54  ;;  %v6087_v17 = vld [vmem:[%s17211_s7] sm:$0x3] }
 0x1e7   : > { %17300 = vst [vmem:[#allocation16_spill] sm:$0xff] %v15192_v45  ;;  %v12005_v6 = vpop.f32.mrb[14].mxu0  ;;  %12349 = vmatpush3.msk.msra.mxu0 %vm4473_vm3, %v10373_v54  ;;  %12614 = vmatprep.subr.msk.mxu1 %vm4473_vm3, %v6087_v17  ;;  %v4225_v54 = vadd.s32 4, %v15230_v20 }
 0x1e8   : > { %v15200_v13 = vadd.f32 %v12005_v6, %v17301_v46  ;;  %v2115_v14 = vpop.f32.mrb[15].mxu0 }
 0x1e9   : > { %v15203_v15 = vadd.f32 %v2115_v14, %v17303_v60  ;;  %12343 = vmatmul.mubr.msk.f32.gmra.mrb[36].mxu1 %vm568_vm0, %v14996_v5  ;;  %v15222_v5 = vld [vmem:[%s17209_s5] sm:$0x3] }
 0x1ea   : > { %17302 = vst [vmem:[#allocation17_spill] sm:$0xff] %v15200_v13  ;;  %12345 = vmatprep.mubr.msk.f32.mxu1 %vm568_vm0, %v2202_v62  ;;  %12374 = vmatprep.subr.msk.mxu0 %vm4473_vm3, %v15222_v5 }
 0x1eb   : > { %17304 = vst [vmem:[#allocation18_spill] sm:$0xff] %v15203_v15 }
 0x1ed   : > { %12346 = vmatmul.mubr.msk.f32.gmra.mrb[38].mxu1 %vm568_vm0, %v2210_v61 }
 0x294   : > { %v12314_v26 = vpop.f32.mrb[16].mxu1 }
 0x295   : > { %v4125_v32 = vadd.f32 %v12314_v26, %v15235_v22  ;;  %v3974_v34 = vpop.f32.mrb[17].mxu1 }
 0x296   : > { %v4124_v41 = vadd.f32 %v15235_v22, %v3974_v34 }
 0x297   : > { %vm4149_vm6 = vcmp.gt.f32.partialorder %v4125_v32, 0.0  ;;  %v4173_v47 = vmul.f32 0.1, %v4125_v32 }
 0x298   : > { %vm4148_vm9 = vcmp.gt.f32.partialorder %v4124_v41, 0.0  ;;  %v4172_v55 = vmul.f32 0.1, %v4124_v41  ;;  %v12317_v7 = vpop.f32.mrb[18].mxu1 }
 0x299   : > { %v4197_v10 = vsel %vm4149_vm6, %v4125_v32, %v4173_v47  ;;  %v4127_v16 = vadd.f32 %v12317_v7, %v15235_v22  ;;  %v3984_v23 = vpop.f32.mrb[19].mxu1 }
 0x29a   : > { %v4126_v25 = vadd.f32 %v15235_v22, %v3984_v23  ;;  %v4196_v31 = vsel %vm4148_vm9, %v4124_v41, %v4172_v55  ;;  %v15251_v35 = vsel %vm15243_vm7, %v4197_v10, 0.0 }
 0x29b   : > { %vm4151_vm14 = vcmp.gt.f32.partialorder %v4127_v16, 0.0  ;;  %v4175_v50 = vmul.f32 0.1, %v4127_v16  ;;  %v15256_v57 = vsel %vm15243_vm7, %v4196_v31, 0.0  ;;  %v17236_v30 = vrot.slane %v15251_v35, 1  ;;  %vm15301_vm7 = vmand %vm4235_vm12, %vm4247_vm13 }
 0x29c   : > { %vm4150_vm4 = vcmp.gt.f32.partialorder %v4126_v25, 0.0  ;;  %v4174_v36 = vmul.f32 0.1, %v4126_v25  ;;  %v12320_v19 = vpop.f32.mrb[20].mxu1  ;;  %v6077_v2 = vrot.slane %v15256_v57, 1  ;;  %12584 = vmatprep.mubr.msk.f32.mxu1 %vm4440_vm8, %v15256_v57  ;;  %v6068_v11 = vrot.slane %v15251_v35, 7  ;;  %vm15335_vm12 = vmand %vm4236_vm5, %vm4248_vm10 }
 0x29d   : > { %v4199_v52 = vsel %vm4151_vm14, %v4127_v16, %v4175_v50  ;;  %v4129_v58 = vadd.f32 %v12320_v19, %v15235_v22  ;;  %v3994_v63 = vpop.f32.mrb[21].mxu1  ;;  %12585 = vmatmul.mubr.msk.f32.vlgmr.msra.gmra.mrb[40].mxu1 %vm4440_vm8, %v15251_v35  ;;  %v6067_v8 = vrot.slane %v15256_v57, 7  ;;  %vm4237_vm14 = vcmp.ge.s32.totalorder %v4225_v54, 0 }
 0x29e   : > { %v4198_v53 = vsel %vm4150_vm4, %v4126_v25, %v4174_v36  ;;  %v4128_v27 = vadd.f32 %v15235_v22, %v3994_v63  ;;  %12615 = vmatpush3.msk.msra.mxu1 %vm4473_vm3, %v6087_v17  ;;  %v15282_v1 = vsel %vm514_vm2, %v6077_v2, %v17236_v30  ;;  %v15297_v39 = vsel %vm15264_vm15, %v4199_v52, 0.0 }
 0x29f   : > { %vm4153_vm6 = vcmp.gt.f32.partialorder %v4129_v58, 0.0  ;;  %v4177_v48 = vmul.f32 0.1, %v4129_v58  ;;  %v15286_v3 = vsel %vm15264_vm15, %v4198_v53, 0.0  ;;  %12646 = vmatprep.subr.msk.mxu1 %vm4473_vm3, %v15261_v9  ;;  %v15318_v17 = vsel %vm463_vm1, %v6067_v8, %v6068_v11 }
 0x2a0   : > { %vm4152_vm9 = vcmp.gt.f32.partialorder %v4128_v27, 0.0  ;;  %v4176_v62 = vmul.f32 0.1, %v4128_v27  ;;  %v12323_v46 = vpop.f32.mrb[22].mxu1  ;;  %12350 = vmatprep.mubr.msk.f32.mxu0 %vm4440_vm8, %v15286_v3  ;;  %12587 = vmatprep.mubr.msk.f32.mxu1 %vm4440_vm8, %v15286_v3  ;;  %vm4249_vm15 = vcmp.lt.s32.totalorder %v4225_v54, 16 }
 0x2a1   : > { %v4201_v14 = vsel %vm4153_vm6, %v4129_v58, %v4177_v48  ;;  %v4131_v60 = vadd.f32 %v12323_v46, %v15235_v22  ;;  %v4004_v61 = vpop.f32.mrb[23].mxu1  ;;  %12351 = vmatmul.mubr.msk.f32.vlgmr.msra.gmra.mrb[16].mxu0 %vm4440_vm8, %v15297_v39  ;;  %12588 = vmatmul.mubr.msk.f32.gmra.mrb[42].mxu1 %vm4440_vm8, %v15297_v39  ;;  %vm15358_vm5 = vmand %vm4237_vm14, %vm4249_vm15  ;;  %v4227_v58 = vadd.s32 6, %v15230_v20 }
 0x2a2   : > { %v4200_v26 = vsel %vm4152_vm9, %v4128_v27, %v4176_v62  ;;  %v4130_v28 = vadd.f32 %v15235_v22, %v4004_v61  ;;  %12375 = vmatpush3.msk.msra.mxu0 %vm4473_vm3, %v15222_v5  ;;  %v15331_v38 = vsel %vm15301_vm7, %v4201_v14, 0.0  ;;  %vm4250_vm9 = vcmp.lt.s32.totalorder %v4226_v49, 16 }
 0x2a3   : > { %v15325_v32 = vsel %vm15301_vm7, %v4200_v26, 0.0  ;;  %vm4155_vm11 = vcmp.gt.f32.partialorder %v4131_v60, 0.0  ;;  %v4179_v34 = vmul.f32 0.1, %v4131_v60  ;;  %12400 = vmatprep.subr.msk.mxu0 %vm4473_vm3, %v15293_v33  ;;  %vm4238_vm7 = vcmp.ge.s32.totalorder %v4226_v49, 0 }
 0x2a4   : > { %vm4154_vm13 = vcmp.gt.f32.partialorder %v4130_v28, 0.0  ;;  %v4178_v5 = vmul.f32 0.1, %v4130_v28  ;;  %v12326_v47 = vpop.f32.mrb[24].mxu1  ;;  %12353 = vmatprep.mubr.msk.f32.mxu0 %vm4440_vm8, %v15325_v32  ;;  %12590 = vmatprep.mubr.msk.f32.mxu1 %vm4440_vm8, %v15325_v32  ;;  %v4228_v14 = vadd.s32 7, %v15230_v20  ;;  %vm4251_vm14 = vcmp.lt.s32.totalorder %v4227_v58, 16 }
 0x2a5   : > { %v4203_v55 = vsel %vm4155_vm11, %v4131_v60, %v4179_v34  ;;  %v4133_v7 = vadd.f32 %v12326_v47, %v15235_v22  ;;  %v4014_v10 = vpop.f32.mrb[25].mxu1  ;;  %12354 = vmatmul.mubr.msk.f32.gmra.mrb[18].mxu0 %vm4440_vm8, %v15331_v38  ;;  %12591 = vmatmul.mubr.msk.f32.gmra.mrb[44].mxu1 %vm4440_vm8, %v15331_v38  ;;  %vm15382_vm11 = vmand %vm4238_vm7, %vm4250_vm9  ;;  %v15462_v47 = vadd.s32 11, %v15230_v20  ;;  %v4390_v30 = vrot.slane %v15325_v32, 1 }
 0x2a6   : > { %v4202_v16 = vsel %vm4154_vm13, %v4130_v28, %v4178_v5  ;;  %v4132_v23 = vadd.f32 %v15235_v22, %v4014_v10  ;;  %v15356_v42 = vsel %vm15335_vm12, %v4203_v55, 0.0  ;;  %vm4239_vm13 = vcmp.ge.s32.totalorder %v4227_v58, 0 }
 0x2a7   : > { %v15352_v25 = vsel %vm15335_vm12, %v4202_v16, 0.0  ;;  %vm4157_vm4 = vcmp.gt.f32.partialorder %v4133_v7, 0.0  ;;  %v4181_v31 = vmul.f32 0.1, %v4133_v7  ;;  %vm4252_vm7 = vcmp.lt.s32.totalorder %v4228_v14, 16 }
 0x2a8   : > { %vm4156_vm6 = vcmp.gt.f32.partialorder %v4132_v23, 0.0  ;;  %v4180_v24 = vmul.f32 0.1, %v4132_v23  ;;  %v12329_v36 = vpop.f32.mrb[26].mxu1  ;;  %12356 = vmatprep.mubr.msk.f32.mxu0 %vm4440_vm8, %v15352_v25  ;;  %12593 = vmatprep.mubr.msk.f32.mxu1 %vm4440_vm8, %v15352_v25  ;;  %v4391_v15 = vrot.slane %v15331_v38, 1  ;;  %v4394_v13 = vrot.slane %v15356_v42, 1 }
 0x2a9   : > { %v4205_v19 = vsel %vm4157_vm4, %v4133_v7, %v4181_v31  ;;  %v4135_v2 = vadd.f32 %v12329_v36, %v15235_v22  ;;  %v4024_v52 = vpop.f32.mrb[27].mxu1  ;;  %12357 = vmatmul.mubr.msk.f32.gmra.mrb[20].mxu0 %vm4440_vm8, %v15356_v42  ;;  %12594 = vmatmul.mubr.msk.f32.gmra.mrb[46].mxu1 %vm4440_vm8, %v15356_v42  ;;  %vm15405_vm4 = vmand %vm4239_vm13, %vm4251_vm14 }
 0x2aa   : > { %v4204_v11 = vsel %vm4156_vm6, %v4132_v23, %v4180_v24  ;;  %v4134_v63 = vadd.f32 %v15235_v22, %v4024_v52  ;;  %v15379_v48 = vsel %vm15358_vm5, %v4205_v19, 0.0  ;;  %vm4240_vm6 = vcmp.ge.s32.totalorder %v4228_v14, 0  ;;  %v15538_v52 = vld [vmem:[%s17209_s5 + $0x6] sm:$0x3] }
 0x2ab   : > { %v15375_v53 = vsel %vm15358_vm5, %v4204_v11, 0.0  ;;  %vm4159_vm10 = vcmp.gt.f32.partialorder %v4135_v2, 0.0  ;;  %v4183_v27 = vmul.f32 0.1, %v4135_v2  ;;  %v4229_v23 = vadd.s32 8, %v15230_v20 }
 0x2ac   : > { %vm4158_vm12 = vcmp.gt.f32.partialorder %v4134_v63, 0.0  ;;  %v4182_v62 = vmul.f32 0.1, %v4134_v63  ;;  %v12332_v46 = vpop.f32.mrb[28].mxu1  ;;  %12359 = vmatprep.mubr.msk.f32.mxu0 %vm4440_vm8, %v15375_v53  ;;  %12596 = vmatprep.mubr.msk.f32.mxu1 %vm4440_vm8, %v15375_v53  ;;  %v4230_v19 = vadd.s32 9, %v15230_v20  ;;  %v4231_v14 = vadd.s32 10, %v15230_v20 }
 0x2ad   : > { %v4207_v60 = vsel %vm4159_vm10, %v4135_v2, %v4183_v27  ;;  %v4137_v61 = vadd.f32 %v12332_v46, %v15235_v22  ;;  %v4034_v54 = vpop.f32.mrb[29].mxu1  ;;  %12360 = vmatmul.mubr.msk.f32.gmra.mrb[22].mxu0 %vm4440_vm8, %v15379_v48  ;;  %12597 = vmatmul.mubr.msk.f32.gmra.mrb[48].mxu1 %vm4440_vm8, %v15379_v48  ;;  %vm15430_vm10 = vmand %vm4240_vm6, %vm4252_vm7  ;;  %vm4253_vm13 = vcmp.lt.s32.totalorder %v4229_v23, 16  ;;  %v4338_v20 = vrot.slane %v15297_v39, 7 }
 0x2ae   : > { %v4206_v26 = vsel %vm4158_vm12, %v4134_v63, %v4182_v62  ;;  %v4136_v28 = vadd.f32 %v15235_v22, %v4034_v54  ;;  %v15403_v5 = vsel %vm15382_vm11, %v4207_v60, 0.0  ;;  %vm4241_vm12 = vcmp.ge.s32.totalorder %v4229_v23, 0 }
 0x2af   : > { %v15399_v34 = vsel %vm15382_vm11, %v4206_v26, 0.0  ;;  %vm4161_vm15 = vcmp.gt.f32.partialorder %v4137_v61, 0.0  ;;  %v4185_v41 = vmul.f32 0.1, %v4137_v61  ;;  %vm4254_vm6 = vcmp.lt.s32.totalorder %v4230_v19, 16 }
 0x2b0   : > { %vm4160_vm5 = vcmp.gt.f32.partialorder %v4136_v28, 0.0  ;;  %v4184_v49 = vmul.f32 0.1, %v4136_v28  ;;  %v12335_v55 = vpop.f32.mrb[30].mxu1  ;;  %12362 = vmatprep.mubr.msk.f32.mxu0 %vm4440_vm8, %v15399_v34  ;;  %12599 = vmatprep.mubr.msk.f32.mxu1 %vm4440_vm8, %v15399_v34  ;;  %vm4243_vm7 = vcmp.ge.s32.totalorder %v4231_v14, 0  ;;  %v6075_v26 = vsel %vm463_vm1, 0.0, %v6067_v8 }
 0x2b1   : > { %v4209_v7 = vsel %vm4161_vm15, %v4137_v61, %v4185_v41  ;;  %v4139_v10 = vadd.f32 %v12335_v55, %v15235_v22  ;;  %v4044_v16 = vpop.f32.mrb[31].mxu1  ;;  %12363 = vmatmul.mubr.msk.f32.gmra.mrb[24].mxu0 %vm4440_vm8, %v15403_v5  ;;  %12600 = vmatmul.mubr.msk.f32.gmra.mrb[50].mxu1 %vm4440_vm8, %v15403_v5  ;;  %vm4242_vm15 = vcmp.ge.s32.totalorder %v4230_v19, 0  ;;  %v15741_v0 = vsel %vm514_vm2, %v4394_v13, 0.0 }
 0x2b2   : > { %v4208_v31 = vsel %vm4160_vm5, %v4136_v28, %v4184_v49  ;;  %v4138_v50 = vadd.f32 %v15235_v22, %v4044_v16  ;;  %v15427_v2 = vsel %vm15405_vm4, %v4209_v7, 0.0  ;;  %v4399_v44 = vrot.slane %v15399_v34, 1 }
 0x2b3   : > { %v15422_v24 = vsel %vm15405_vm4, %v4208_v31, 0.0  ;;  %vm4163_vm9 = vcmp.gt.f32.partialorder %v4139_v10, 0.0  ;;  %v4187_v36 = vmul.f32 0.1, %v4139_v10  ;;  %vm15453_vm4 = vmand %vm4241_vm12, %vm4253_vm13  ;;  %vm4244_vm13 = vcmp.ge.s32.totalorder %v15462_v47, 0 }
 0x2b4   : > { %vm4162_vm11 = vcmp.gt.f32.partialorder %v4138_v50, 0.0  ;;  %v4186_v58 = vmul.f32 0.1, %v4138_v50  ;;  %v12338_v11 = vpop.f32.mrb[32].mxu1  ;;  %12365 = vmatprep.mubr.msk.f32.mxu0 %vm4440_vm8, %v15422_v24  ;;  %12602 = vmatprep.mubr.msk.f32.mxu1 %vm4440_vm8, %v15422_v24  ;;  %v4400_v51 = vrot.slane %v15403_v5, 1 }
 0x2b5   : > { %v4211_v63 = vsel %vm4163_vm9, %v4139_v10, %v4187_v36  ;;  %v4141_v27 = vadd.f32 %v12338_v11, %v15235_v22  ;;  %v4054_v6 = vpop.f32.mrb[33].mxu1  ;;  %12366 = vmatmul.mubr.msk.f32.gmra.mrb[26].mxu0 %vm4440_vm8, %v15427_v2  ;;  %12603 = vmatmul.mubr.msk.f32.gmra.mrb[52].mxu1 %vm4440_vm8, %v15427_v2  ;;  %v4337_v10 = vrot.slane %v15286_v3, 7  ;;  %vm4255_vm9 = vcmp.lt.s32.totalorder %v4231_v14, 16 }
 0x2b6   : > { %v4210_v62 = vsel %vm4162_vm11, %v4138_v50, %v4186_v58  ;;  %v4140_v46 = vadd.f32 %v15235_v22, %v4054_v6  ;;  %v15451_v54 = vsel %vm15430_vm10, %v4211_v63, 0.0  ;;  %vm15481_vm11 = vmand %vm4242_vm15, %vm4254_vm6  ;;  %v15774_v43 = vsel %vm514_vm2, %v4399_v44, %v4400_v51 }
 0x2b7   : > { %v15447_v60 = vsel %vm15430_vm10, %v4210_v62, 0.0  ;;  %vm4165_vm14 = vcmp.gt.f32.partialorder %v4141_v27, 0.0  ;;  %v4189_v61 = vmul.f32 0.1, %v4141_v27  ;;  %v15496_v19 = vsel %vm463_vm1, 0.0, %v4337_v10 }
 0x2b8   : > { %vm4164_vm5 = vcmp.gt.f32.partialorder %v4140_v46, 0.0  ;;  %v4188_v28 = vmul.f32 0.1, %v4140_v46  ;;  %v12341_v41 = vpop.f32.mrb[34].mxu1  ;;  %12368 = vmatprep.mubr.msk.f32.mxu0 %vm4440_vm8, %v15447_v60  ;;  %12605 = vmatprep.mubr.msk.f32.mxu1 %vm4440_vm8, %v15447_v60  ;;  %v4340_v62 = vrot.slane %v15325_v32, 7 }
 0x2b9   : > { %v4213_v49 = vsel %vm4165_vm14, %v4141_v27, %v4189_v61  ;;  %v4143_v55 = vadd.f32 %v12341_v41, %v15235_v22  ;;  %v4064_v7 = vpop.f32.mrb[35].mxu1  ;;  %12369 = vmatmul.mubr.msk.f32.gmra.mrb[28].mxu0 %vm4440_vm8, %v15451_v54  ;;  %12606 = vmatmul.mubr.msk.f32.gmra.mrb[54].mxu1 %vm4440_vm8, %v15451_v54  ;;  %vm4256_vm14 = vcmp.lt.s32.totalorder %v15462_v47, 16 }
 0x2ba   : > { %v4212_v16 = vsel %vm4164_vm5, %v4140_v46, %v4188_v28  ;;  %v4142_v23 = vadd.f32 %v15235_v22, %v4064_v7  ;;  %v15478_v36 = vsel %vm15453_vm4, %v4213_v49, 0.0 }
 0x2bb   : > { %v15474_v31 = vsel %vm15453_vm4, %v4212_v16, 0.0  ;;  %vm4167_vm10 = vcmp.gt.f32.partialorder %v4143_v55, 0.0  ;;  %v4191_v50 = vmul.f32 0.1, %v4143_v55  ;;  %vm15512_vm4 = vmand %vm4243_vm7, %vm4255_vm9  ;;  %v4341_v16 = vrot.slane %v15331_v38, 7 }
 0x2bc   : > { %vm4166_vm12 = vcmp.gt.f32.partialorder %v4142_v23, 0.0  ;;  %v4190_v58 = vmul.f32 0.1, %v4142_v23  ;;  %v12344_v11 = vpop.f32.mrb[36].mxu1  ;;  %12371 = vmatprep.mubr.msk.f32.mxu0 %vm4440_vm8, %v15474_v31  ;;  %12608 = vmatprep.mubr.msk.f32.mxu1 %vm4440_vm8, %v15474_v31  ;;  %vm15556_vm7 = vmand %vm4244_vm13, %vm4256_vm14  ;;  %v4409_v21 = vrot.slane %v15478_v36, 1 }
 0x2bd   : > { %v4215_v63 = vsel %vm4167_vm10, %v4143_v55, %v4191_v50  ;;  %v4145_v27 = vadd.f32 %v12344_v11, %v15235_v22  ;;  %v4074_v6 = vpop.f32.mrb[37].mxu1  ;;  %12372 = vmatmul.mubr.msk.f32.gmra.mrb[30].mxu0 %vm4440_vm8, %v15478_v36  ;;  %12609 = vmatmul.mubr.msk.f32.gmra.mrb[56].mxu1 %vm4440_vm8, %v15478_v36  ;;  %v15517_v55 = vsel %vm463_vm1, %v4337_v10, %v4338_v20  ;;  %v15532_v10 = vsel %vm463_vm1, 0.0, %v4340_v62 }
 0x2be   : > { %v4214_v46 = vsel %vm4166_vm12, %v4142_v23, %v4190_v58  ;;  %v4144_v61 = vadd.f32 %v15235_v22, %v4074_v6  ;;  %12376 = vmatprep.mubr.msk.f32.mxu0 %vm4440_vm8, %v15496_v19  ;;  %v15521_v57 = vsel %vm15481_vm11, %v4215_v63, 0.0  ;;  %v4343_v20 = vrot.slane %v15352_v25, 7 }
 0x2bf   : > { %v15508_v28 = vsel %vm15481_vm11, %v4214_v46, 0.0  ;;  %vm4169_vm15 = vcmp.gt.f32.partialorder %v4145_v27, 0.0  ;;  %v4193_v41 = vmul.f32 0.1, %v4145_v27  ;;  %v4362_v4 = vrot.slane %v15521_v57, 7 }
 0x2c0   : > { %vm4168_vm5 = vcmp.gt.f32.partialorder %v4144_v61, 0.0  ;;  %v4192_v8 = vmul.f32 0.1, %v4144_v61  ;;  %v12347_v7 = vpop.f32.mrb[38].mxu1  ;;  %12611 = vmatprep.mubr.msk.f32.mxu1 %vm4440_vm8, %v15508_v28  ;;  %v4361_v45 = vrot.slane %v15508_v28, 7  ;;  %v15833_v56 = vsel %vm514_vm2, %v4409_v21, 0.0 }
 0x2c1   : > { %v4217_v14 = vsel %vm4169_vm15, %v4145_v27, %v4193_v41  ;;  %v4147_v23 = vadd.f32 %v12347_v7, %v15235_v22  ;;  %v4084_v50 = vpop.f32.mrb[39].mxu1  ;;  %12377 = vmatmul.mubr.msk.f32.vlgmr.msra.gmra.mrb[16].mxu0 %vm4440_vm8, %v15517_v55  ;;  %12612 = vmatmul.mubr.msk.f32.gmra.mrb[58].mxu1 %vm4440_vm8, %v15521_v57  ;;  %v15569_v41 = vld [vmem:[%s17211_s7 + $0x6] sm:$0x3] }
 0x2c2   : > { %v15542_v58 = vsel %vm15512_vm4, %v4217_v14, 0.0  ;;  %v4216_v11 = vsel %vm4168_vm5, %v4144_v61, %v4192_v8  ;;  %v4146_v63 = vadd.f32 %v15235_v22, %v4084_v50  ;;  %12379 = vmatprep.mubr.msk.f32.mxu0 %vm4440_vm8, %v15532_v10  ;;  %12616 = vmatprep.mubr.msk.f32.mxu1 %vm4440_vm8, %v6075_v26  ;;  %v15563_v61 = vsel %vm463_vm1, %v4340_v62, %v4341_v16 }
 0x2c3   : > { %v15550_v27 = vsel %vm15512_vm4, %v4216_v11, 0.0  ;;  %vm4171_vm6 = vcmp.gt.f32.partialorder %v4147_v23, 0.0  ;;  %v4195_v6 = vmul.f32 0.1, %v4147_v23  ;;  %12401 = vmatpush3.msk.msra.mxu0 %vm4473_vm3, %v15293_v33  ;;  %v4344_v26 = vrot.slane %v15356_v42, 7 }
 0x2c4   : > { %vm4170_vm9 = vcmp.gt.f32.partialorder %v4146_v63, 0.0  ;;  %v4194_v22 = vmul.f32 0.1, %v4146_v63  ;;  %12426 = vmatprep.subr.msk.mxu0 %vm4473_vm3, %v15538_v52  ;;  %v15578_v33 = vsel %vm463_vm1, 0.0, %v4343_v20  ;;  %v4346_v62 = vrot.slane %v15375_v53, 7 }
 0x2c5   : > { %v4219_v47 = vsel %vm4171_vm6, %v4147_v23, %v4195_v6  ;;  %12380 = vmatmul.mubr.msk.f32.gmra.mrb[18].mxu0 %vm4440_vm8, %v15563_v61  ;;  %12617 = vmatmul.mubr.msk.f32.vlgmr.msra.gmra.mrb[40].mxu1 %vm4440_vm8, %v15318_v17  ;;  %v15598_v17 = vsel %vm463_vm1, %v4343_v20, %v4344_v26  ;;  %v4347_v16 = vrot.slane %v15379_v48, 7  ;;  %v4349_v14 = vrot.slane %v15399_v34, 7 }
 0x2c6   : > { %v15583_v49 = vsel %vm15556_vm7, %v4219_v47, 0.0  ;;  %v4218_v8 = vsel %vm4170_vm9, %v4146_v63, %v4194_v22  ;;  %12647 = vmatpush3.msk.msra.mxu1 %vm4473_vm3, %v15261_v9  ;;  %12382 = vmatprep.mubr.msk.f32.mxu0 %vm4440_vm8, %v15578_v33  ;;  %v15606_v9 = vsel %vm463_vm1, 0.0, %v4346_v62  ;;  %v4350_v50 = vrot.slane %v15403_v5, 7 }
 0x2c7   : > { %v15591_v7 = vsel %vm15556_vm7, %v4218_v8, 0.0  ;;  %12619 = vmatprep.mubr.msk.f32.mxu1 %vm4440_vm8, %v15496_v19  ;;  %12678 = vmatprep.subr.msk.mxu1 %vm4473_vm3, %v15569_v41  ;;  %v15614_v23 = vsel %vm463_vm1, %v4346_v62, %v4347_v16  ;;  %v15622_v20 = vsel %vm463_vm1, 0.0, %v4349_v14  ;;  %v4352_v11 = vrot.slane %v15422_v24, 7 }
 0x2c8   : > { %v15630_v63 = vsel %vm463_vm1, %v4349_v14, %v4350_v50  ;;  %v4353_v6 = vrot.slane %v15427_v2, 7  ;;  %v4355_v22 = vrot.slane %v15447_v60, 7  ;;  %v4356_v47 = vrot.slane %v15451_v54, 7 }
 0x2c9   : > { %12383 = vmatmul.mubr.msk.f32.gmra.mrb[20].mxu0 %vm4440_vm8, %v15598_v17  ;;  %12620 = vmatmul.mubr.msk.f32.gmra.mrb[42].mxu1 %vm4440_vm8, %v15517_v55  ;;  %v15638_v46 = vsel %vm463_vm1, 0.0, %v4352_v11  ;;  %v4358_v8 = vrot.slane %v15474_v31, 7  ;;  %v4359_v14 = vrot.slane %v15478_v36, 7  ;;  %v15732_v40 = vsel %vm463_vm1, 0.0, %v4361_v45 }
 0x2ca   : > { %12385 = vmatprep.mubr.msk.f32.mxu0 %vm4440_vm8, %v15606_v9  ;;  %12622 = vmatprep.mubr.msk.f32.mxu1 %vm4440_vm8, %v15532_v10  ;;  %v15646_v26 = vsel %vm463_vm1, %v4352_v11, %v4353_v6  ;;  %v15654_v62 = vsel %vm463_vm1, 0.0, %v4355_v22  ;;  %v15662_v16 = vsel %vm463_vm1, %v4355_v22, %v4356_v47  ;;  %v4387_v11 = vrot.slane %v15286_v3, 1 }
 0x2cb   : > { %v15670_v50 = vsel %vm463_vm1, 0.0, %v4358_v8  ;;  %v4388_v6 = vrot.slane %v15297_v39, 1  ;;  %v15679_v22 = vsel %vm463_vm1, %v4358_v8, %v4359_v14  ;;  %v15702_v14 = vsel %vm514_vm2, %v4390_v30, %v4391_v15 }
 0x2cc   : > { %v15719_v30 = vsel %vm514_vm2, %v4391_v15, 0.0  ;;  %v4396_v15 = vrot.slane %v15375_v53, 1  ;;  %v15744_v59 = vsel %vm463_vm1, %v4361_v45, %v4362_v4  ;;  %v17329_v45 = vrot.slane %v15251_v35, 1 }
 0x2cd   : > { %12386 = vmatmul.mubr.msk.f32.gmra.mrb[22].mxu0 %vm4440_vm8, %v15614_v23  ;;  %12623 = vmatmul.mubr.msk.f32.gmra.mrb[44].mxu1 %vm4440_vm8, %v15563_v61  ;;  %v15686_v47 = vsel %vm514_vm2, %v4387_v11, %v4388_v6  ;;  %v15695_v8 = vsel %vm514_vm2, %v4388_v6, 0.0  ;;  %v4393_v11 = vrot.slane %v15352_v25, 1  ;;  %v15710_v6 = vld [vmem:[%s17209_s5 + $0x8] sm:$0x3]  ;;  %v15787_v35 = vsel %vm514_vm2, %v4400_v51, 0.0 }
 0x2ce   : > { %12388 = vmatprep.mubr.msk.f32.mxu0 %vm4440_vm8, %v15622_v20  ;;  %12625 = vmatprep.mubr.msk.f32.mxu1 %vm4440_vm8, %v15578_v33 }
 0x2cf   : > { %v15729_v12 = vsel %vm514_vm2, %v4393_v11, %v4394_v13  ;;  %v6085_v13 = vsel %vm514_vm2, %v17329_v45, 0.0  ;;  %v4406_v45 = vrot.slane %v15451_v54, 1 }
 0x2d1   : > { %12389 = vmatmul.mubr.msk.f32.gmra.mrb[24].mxu0 %vm4440_vm8, %v15630_v63  ;;  %12626 = vmatmul.mubr.msk.f32.gmra.mrb[46].mxu1 %vm4440_vm8, %v15598_v17 }
 0x2d2   : > { %12391 = vmatprep.mubr.msk.f32.mxu0 %vm4440_vm8, %v15638_v46  ;;  %12628 = vmatprep.mubr.msk.f32.mxu1 %vm4440_vm8, %v15606_v9 }
 0x2d5   : > { %12392 = vmatmul.mubr.msk.f32.gmra.mrb[26].mxu0 %vm4440_vm8, %v15646_v26  ;;  %12629 = vmatmul.mubr.msk.f32.gmra.mrb[48].mxu1 %vm4440_vm8, %v15614_v23 }
 0x2d6   : > { %12394 = vmatprep.mubr.msk.f32.mxu0 %vm4440_vm8, %v15654_v62  ;;  %12631 = vmatprep.mubr.msk.f32.mxu1 %vm4440_vm8, %v15622_v20 }
 0x2d9   : > { %12395 = vmatmul.mubr.msk.f32.gmra.mrb[28].mxu0 %vm4440_vm8, %v15662_v16  ;;  %12632 = vmatmul.mubr.msk.f32.gmra.mrb[50].mxu1 %vm4440_vm8, %v15630_v63 }
 0x2da   : > { %12397 = vmatprep.mubr.msk.f32.mxu0 %vm4440_vm8, %v15670_v50  ;;  %12634 = vmatprep.mubr.msk.f32.mxu1 %vm4440_vm8, %v15638_v46 }
 0x2dd   : > { %12398 = vmatmul.mubr.msk.f32.gmra.mrb[30].mxu0 %vm4440_vm8, %v15679_v22  ;;  %12635 = vmatmul.mubr.msk.f32.gmra.mrb[52].mxu1 %vm4440_vm8, %v15646_v26 }
 0x2de   : > { %12402 = vmatprep.mubr.msk.f32.mxu0 %vm4440_vm8, %v15686_v47  ;;  %12637 = vmatprep.mubr.msk.f32.mxu1 %vm4440_vm8, %v15654_v62 }
 0x2e1   : > { %12403 = vmatmul.mubr.msk.f32.vlgmr.msra.gmra.mrb[16].mxu0 %vm4440_vm8, %v15695_v8  ;;  %12638 = vmatmul.mubr.msk.f32.gmra.mrb[54].mxu1 %vm4440_vm8, %v15662_v16 }
 0x2e2   : > { %12405 = vmatprep.mubr.msk.f32.mxu0 %vm4440_vm8, %v15702_v14  ;;  %12640 = vmatprep.mubr.msk.f32.mxu1 %vm4440_vm8, %v15670_v50 }
 0x2e3   : > { %12427 = vmatpush3.msk.msra.mxu0 %vm4473_vm3, %v15538_v52  ;;  %v4397_v52 = vrot.slane %v15379_v48, 1 }
 0x2e4   : > { %12452 = vmatprep.subr.msk.mxu0 %vm4473_vm3, %v15710_v6 }
 0x2e5   : > { %12406 = vmatmul.mubr.msk.f32.gmra.mrb[18].mxu0 %vm4440_vm8, %v15719_v30  ;;  %12641 = vmatmul.mubr.msk.f32.gmra.mrb[56].mxu1 %vm4440_vm8, %v15679_v22  ;;  %v15751_v11 = vsel %vm514_vm2, %v4396_v15, %v4397_v52  ;;  %v15760_v4 = vsel %vm514_vm2, %v4397_v52, 0.0  ;;  %v15768_v15 = vld [vmem:[%s17211_s7 + $0x8] sm:$0x3]  ;;  %v4403_v52 = vrot.slane %v15427_v2, 1 }
 0x2e6   : > { %12408 = vmatprep.mubr.msk.f32.mxu0 %vm4440_vm8, %v15729_v12  ;;  %12643 = vmatprep.mubr.msk.f32.mxu1 %vm4440_vm8, %v15732_v40 }
 0x2e7   : > { %v15803_v51 = vsel %vm514_vm2, %v4403_v52, 0.0 }
 0x2e9   : > { %12409 = vmatmul.mubr.msk.f32.gmra.mrb[20].mxu0 %vm4440_vm8, %v15741_v0  ;;  %12644 = vmatmul.mubr.msk.f32.gmra.mrb[58].mxu1 %vm4440_vm8, %v15744_v59 }
 0x2ea   : > { %12411 = vmatprep.mubr.msk.f32.mxu0 %vm4440_vm8, %v15751_v11  ;;  %12648 = vmatprep.mubr.msk.f32.mxu1 %vm4440_vm8, %v15282_v1  ;;  %v4402_v1 = vrot.slane %v15422_v24, 1 }
 0x2ec   : > { %v15794_v44 = vsel %vm514_vm2, %v4402_v1, %v4403_v52  ;;  %v4408_v1 = vrot.slane %v15474_v31, 1  ;;  %v15819_v52 = vsel %vm514_vm2, %v4406_v45, 0.0 }
 0x2ed   : > { %12412 = vmatmul.mubr.msk.f32.gmra.mrb[22].mxu0 %vm4440_vm8, %v15760_v4  ;;  %12649 = vmatmul.mubr.msk.f32.vlgmr.msra.gmra.mrb[40].mxu1 %vm4440_vm8, %v6085_v13 }
 0x2ee   : > { %12679 = vmatpush3.msk.msra.mxu1 %vm4473_vm3, %v15569_v41  ;;  %12414 = vmatprep.mubr.msk.f32.mxu0 %vm4440_vm8, %v15774_v43  ;;  %v4405_v41 = vrot.slane %v15447_v60, 1 }
 0x2ef   : > { %12651 = vmatprep.mubr.msk.f32.mxu1 %vm4440_vm8, %v15686_v47  ;;  %12710 = vmatprep.subr.msk.mxu1 %vm4473_vm3, %v15768_v15 }
 0x2f0   : > { %v15810_v13 = vsel %vm514_vm2, %v4405_v41, %v4406_v45  ;;  %v15826_v41 = vsel %vm514_vm2, %v4408_v1, %v4409_v21  ;;  %v10462_v21 = vld [vmem:[%s17209_s5 + $0xa] sm:$0x3]  ;;  %v4412_v45 = vrot.slane %v15521_v57, 1 }
 0x2f1   : > { %12415 = vmatmul.mubr.msk.f32.gmra.mrb[24].mxu0 %vm4440_vm8, %v15787_v35  ;;  %12652 = vmatmul.mubr.msk.f32.gmra.mrb[42].mxu1 %vm4440_vm8, %v15695_v8 }
 0x2f2   : > { %12417 = vmatprep.mubr.msk.f32.mxu0 %vm4440_vm8, %v15794_v44  ;;  %12654 = vmatprep.mubr.msk.f32.mxu1 %vm4440_vm8, %v15702_v14  ;;  %v15887_v37 = vsel %vm514_vm2, %v4412_v45, 0.0 }
 0x2f5   : > { %12418 = vmatmul.mubr.msk.f32.gmra.mrb[26].mxu0 %vm4440_vm8, %v15803_v51  ;;  %12655 = vmatmul.mubr.msk.f32.gmra.mrb[44].mxu1 %vm4440_vm8, %v15719_v30 }
 0x2f6   : > { %12420 = vmatprep.mubr.msk.f32.mxu0 %vm4440_vm8, %v15810_v13  ;;  %12657 = vmatprep.mubr.msk.f32.mxu1 %vm4440_vm8, %v15729_v12 }
 0x2f9   : > { %12421 = vmatmul.mubr.msk.f32.gmra.mrb[28].mxu0 %vm4440_vm8, %v15819_v52  ;;  %12658 = vmatmul.mubr.msk.f32.gmra.mrb[46].mxu1 %vm4440_vm8, %v15741_v0 }
 0x2fa   : > { %12423 = vmatprep.mubr.msk.f32.mxu0 %vm4440_vm8, %v15826_v41  ;;  %12660 = vmatprep.mubr.msk.f32.mxu1 %vm4440_vm8, %v15751_v11 }
 0x2fd   : > { %12424 = vmatmul.mubr.msk.f32.gmra.mrb[30].mxu0 %vm4440_vm8, %v15833_v56  ;;  %12661 = vmatmul.mubr.msk.f32.gmra.mrb[48].mxu1 %vm4440_vm8, %v15760_v4 }
 0x2fe   : > { %12428 = vmatprep.mubr.msk.f32.mxu0 %vm4440_vm8, %v15532_v10  ;;  %12663 = vmatprep.mubr.msk.f32.mxu1 %vm4440_vm8, %v15774_v43 }
 0x301   : > { %12429 = vmatmul.mubr.msk.f32.vlgmr.msra.gmra.mrb[16].mxu0 %vm4440_vm8, %v15563_v61  ;;  %12664 = vmatmul.mubr.msk.f32.gmra.mrb[50].mxu1 %vm4440_vm8, %v15787_v35 }
 0x302   : > { %12431 = vmatprep.mubr.msk.f32.mxu0 %vm4440_vm8, %v15578_v33  ;;  %12666 = vmatprep.mubr.msk.f32.mxu1 %vm4440_vm8, %v15794_v44 }
 0x303   : > { %12453 = vmatpush3.msk.msra.mxu0 %vm4473_vm3, %v15710_v6  ;;  %v4411_v6 = vrot.slane %v15508_v28, 1 }
 0x304   : > { %12478 = vmatprep.subr.msk.mxu0 %vm4473_vm3, %v10462_v21 }
 0x305   : > { %12432 = vmatmul.mubr.msk.f32.gmra.mrb[18].mxu0 %vm4440_vm8, %v15598_v17  ;;  %12667 = vmatmul.mubr.msk.f32.gmra.mrb[52].mxu1 %vm4440_vm8, %v15803_v51  ;;  %v15880_v1 = vsel %vm514_vm2, %v4411_v6, %v4412_v45  ;;  %v10644_v6 = vld [vmem:[%s17211_s7 + $0xa] sm:$0x3] }
 0x306   : > { %12434 = vmatprep.mubr.msk.f32.mxu0 %vm4440_vm8, %v15606_v9  ;;  %12669 = vmatprep.mubr.msk.f32.mxu1 %vm4440_vm8, %v15810_v13 }
 0x309   : > { %12435 = vmatmul.mubr.msk.f32.gmra.mrb[20].mxu0 %vm4440_vm8, %v15614_v23  ;;  %12670 = vmatmul.mubr.msk.f32.gmra.mrb[54].mxu1 %vm4440_vm8, %v15819_v52 }
 0x30a   : > { %12437 = vmatprep.mubr.msk.f32.mxu0 %vm4440_vm8, %v15622_v20  ;;  %12672 = vmatprep.mubr.msk.f32.mxu1 %vm4440_vm8, %v15826_v41 }
 0x30d   : > { %12438 = vmatmul.mubr.msk.f32.gmra.mrb[22].mxu0 %vm4440_vm8, %v15630_v63  ;;  %12673 = vmatmul.mubr.msk.f32.gmra.mrb[56].mxu1 %vm4440_vm8, %v15833_v56 }
 0x30e   : > { %12440 = vmatprep.mubr.msk.f32.mxu0 %vm4440_vm8, %v15638_v46  ;;  %12675 = vmatprep.mubr.msk.f32.mxu1 %vm4440_vm8, %v15880_v1 }
 0x311   : > { %12441 = vmatmul.mubr.msk.f32.gmra.mrb[24].mxu0 %vm4440_vm8, %v15646_v26  ;;  %12676 = vmatmul.mubr.msk.f32.gmra.mrb[58].mxu1 %vm4440_vm8, %v15887_v37 }
 0x312   : > { %12443 = vmatprep.mubr.msk.f32.mxu0 %vm4440_vm8, %v15654_v62  ;;  %12680 = vmatprep.mubr.msk.f32.mxu1 %vm4440_vm8, %v15496_v19  ;;  %v10480_v19 = vld [vmem:[%s17209_s5 + $0xc] sm:$0x3] }
 0x315   : > { %12444 = vmatmul.mubr.msk.f32.gmra.mrb[26].mxu0 %vm4440_vm8, %v15662_v16  ;;  %12681 = vmatmul.mubr.msk.f32.vlgmr.msra.gmra.mrb[40].mxu1 %vm4440_vm8, %v15517_v55  ;;  %v4364_v55 = vrot.slane %v15550_v27, 7 }
 0x316   : > { %12711 = vmatpush3.msk.msra.mxu1 %vm4473_vm3, %v15768_v15  ;;  %12446 = vmatprep.mubr.msk.f32.mxu0 %vm4440_vm8, %v15670_v50  ;;  %v4365_v15 = vrot.slane %v15542_v58, 7 }
 0x317   : > { %12683 = vmatprep.mubr.msk.f32.mxu1 %vm4440_vm8, %v15532_v10  ;;  %12742 = vmatprep.subr.msk.mxu1 %vm4473_vm3, %v10644_v6 }
 0x318   : > { %v15986_v45 = vsel %vm463_vm1, %v4364_v55, %v4365_v15 }
 0x319   : > { %12447 = vmatmul.mubr.msk.f32.gmra.mrb[28].mxu0 %vm4440_vm8, %v15679_v22  ;;  %12684 = vmatmul.mubr.msk.f32.gmra.mrb[42].mxu1 %vm4440_vm8, %v15563_v61 }
 0x31a   : > { %12449 = vmatprep.mubr.msk.f32.mxu0 %vm4440_vm8, %v15732_v40  ;;  %12686 = vmatprep.mubr.msk.f32.mxu1 %vm4440_vm8, %v15578_v33 }
 0x31d   : > { %12450 = vmatmul.mubr.msk.f32.gmra.mrb[30].mxu0 %vm4440_vm8, %v15744_v59  ;;  %12687 = vmatmul.mubr.msk.f32.gmra.mrb[44].mxu1 %vm4440_vm8, %v15598_v17 }
 0x31e   : > { %12454 = vmatprep.mubr.msk.f32.mxu0 %vm4440_vm8, %v15325_v32  ;;  %12689 = vmatprep.mubr.msk.f32.mxu1 %vm4440_vm8, %v15606_v9 }
 0x321   : > { %12455 = vmatmul.mubr.msk.f32.vlgmr.msra.gmra.mrb[16].mxu0 %vm4440_vm8, %v15331_v38  ;;  %12690 = vmatmul.mubr.msk.f32.gmra.mrb[46].mxu1 %vm4440_vm8, %v15614_v23 }
 0x322   : > { %12457 = vmatprep.mubr.msk.f32.mxu0 %vm4440_vm8, %v15352_v25  ;;  %12692 = vmatprep.mubr.msk.f32.mxu1 %vm4440_vm8, %v15622_v20 }
 0x323   : > { %12479 = vmatpush3.msk.msra.mxu0 %vm4473_vm3, %v10462_v21  ;;  %v15979_v21 = vsel %vm463_vm1, 0.0, %v4364_v55  ;;  %v10710_v55 = vld [vmem:[%s17211_s7 + $0x10] sm:$0x3] }
 0x324   : > { %12504 = vmatprep.subr.msk.mxu0 %vm4473_vm3, %v10480_v19 }
 0x325   : > { %12458 = vmatmul.mubr.msk.f32.gmra.mrb[18].mxu0 %vm4440_vm8, %v15356_v42  ;;  %12693 = vmatmul.mubr.msk.f32.gmra.mrb[48].mxu1 %vm4440_vm8, %v15630_v63 }
 0x326   : > { %12460 = vmatprep.mubr.msk.f32.mxu0 %vm4440_vm8, %v15375_v53  ;;  %12695 = vmatprep.mubr.msk.f32.mxu1 %vm4440_vm8, %v15638_v46 }
 0x329   : > { %12461 = vmatmul.mubr.msk.f32.gmra.mrb[20].mxu0 %vm4440_vm8, %v15379_v48  ;;  %12696 = vmatmul.mubr.msk.f32.gmra.mrb[50].mxu1 %vm4440_vm8, %v15646_v26 }
 0x32a   : > { %12463 = vmatprep.mubr.msk.f32.mxu0 %vm4440_vm8, %v15399_v34  ;;  %12698 = vmatprep.mubr.msk.f32.mxu1 %vm4440_vm8, %v15654_v62 }
 0x32d   : > { %12464 = vmatmul.mubr.msk.f32.gmra.mrb[22].mxu0 %vm4440_vm8, %v15403_v5  ;;  %12699 = vmatmul.mubr.msk.f32.gmra.mrb[52].mxu1 %vm4440_vm8, %v15662_v16 }
 0x32e   : > { %12466 = vmatprep.mubr.msk.f32.mxu0 %vm4440_vm8, %v15422_v24  ;;  %12701 = vmatprep.mubr.msk.f32.mxu1 %vm4440_vm8, %v15670_v50 }
 0x331   : > { %12467 = vmatmul.mubr.msk.f32.gmra.mrb[24].mxu0 %vm4440_vm8, %v15427_v2  ;;  %12702 = vmatmul.mubr.msk.f32.gmra.mrb[54].mxu1 %vm4440_vm8, %v15679_v22 }
 0x332   : > { %12469 = vmatprep.mubr.msk.f32.mxu0 %vm4440_vm8, %v15447_v60  ;;  %12704 = vmatprep.mubr.msk.f32.mxu1 %vm4440_vm8, %v15732_v40 }
 0x335   : > { %12470 = vmatmul.mubr.msk.f32.gmra.mrb[26].mxu0 %vm4440_vm8, %v15451_v54  ;;  %12705 = vmatmul.mubr.msk.f32.gmra.mrb[56].mxu1 %vm4440_vm8, %v15744_v59 }
 0x336   : > { %12472 = vmatprep.mubr.msk.f32.mxu0 %vm4440_vm8, %v15474_v31  ;;  %12707 = vmatprep.mubr.msk.f32.mxu1 %vm4440_vm8, %v15979_v21 }
 0x339   : > { %12473 = vmatmul.mubr.msk.f32.gmra.mrb[28].mxu0 %vm4440_vm8, %v15478_v36  ;;  %12708 = vmatmul.mubr.msk.f32.gmra.mrb[58].mxu1 %vm4440_vm8, %v15986_v45 }
 0x33a   : > { %12475 = vmatprep.mubr.msk.f32.mxu0 %vm4440_vm8, %v15508_v28  ;;  %12712 = vmatprep.mubr.msk.f32.mxu1 %vm4440_vm8, %v15286_v3  ;;  %v10498_v3 = vld [vmem:[%s17209_s5 + $0xe] sm:$0x3] }
 0x33d   : > { %12476 = vmatmul.mubr.msk.f32.gmra.mrb[30].mxu0 %vm4440_vm8, %v15521_v57  ;;  %12713 = vmatmul.mubr.msk.f32.vlgmr.msra.gmra.mrb[40].mxu1 %vm4440_vm8, %v15297_v39  ;;  %v10516_v39 = vld [vmem:[%s17209_s5 + $0x10] sm:$0x3] }
 0x33e   : > { %12743 = vmatpush3.msk.msra.mxu1 %vm4473_vm3, %v10644_v6  ;;  %12480 = vmatprep.mubr.msk.f32.mxu0 %vm4440_vm8, %v15702_v14  ;;  %v10688_v6 = vld [vmem:[%s17211_s7 + $0xe] sm:$0x3] }
 0x33f   : > { %12715 = vmatprep.mubr.msk.f32.mxu1 %vm4440_vm8, %v15325_v32  ;;  %12774 = vmatprep.subr.msk.mxu1 %vm4473_vm3, %v10666_v29 }
 0x341   : > { %12481 = vmatmul.mubr.msk.f32.vlgmr.msra.gmra.mrb[16].mxu0 %vm4440_vm8, %v15719_v30  ;;  %12716 = vmatmul.mubr.msk.f32.gmra.mrb[42].mxu1 %vm4440_vm8, %v15331_v38 }
 0x342   : > { %12483 = vmatprep.mubr.msk.f32.mxu0 %vm4440_vm8, %v15729_v12  ;;  %12718 = vmatprep.mubr.msk.f32.mxu1 %vm4440_vm8, %v15352_v25 }
 0x343   : > { %12505 = vmatpush3.msk.msra.mxu0 %vm4473_vm3, %v10480_v19 }
 0x344   : > { %12530 = vmatprep.subr.msk.mxu0 %vm4473_vm3, %v10498_v3 }
 0x345   : > { %12484 = vmatmul.mubr.msk.f32.gmra.mrb[18].mxu0 %vm4440_vm8, %v15741_v0  ;;  %12719 = vmatmul.mubr.msk.f32.gmra.mrb[44].mxu1 %vm4440_vm8, %v15356_v42 }
 0x346   : > { %12486 = vmatprep.mubr.msk.f32.mxu0 %vm4440_vm8, %v15751_v11  ;;  %12721 = vmatprep.mubr.msk.f32.mxu1 %vm4440_vm8, %v15375_v53 }
 0x349   : > { %12487 = vmatmul.mubr.msk.f32.gmra.mrb[20].mxu0 %vm4440_vm8, %v15760_v4  ;;  %12722 = vmatmul.mubr.msk.f32.gmra.mrb[46].mxu1 %vm4440_vm8, %v15379_v48 }
 0x34a   : > { %12489 = vmatprep.mubr.msk.f32.mxu0 %vm4440_vm8, %v15774_v43  ;;  %12724 = vmatprep.mubr.msk.f32.mxu1 %vm4440_vm8, %v15399_v34 }
 0x34d   : > { %12490 = vmatmul.mubr.msk.f32.gmra.mrb[22].mxu0 %vm4440_vm8, %v15787_v35  ;;  %12725 = vmatmul.mubr.msk.f32.gmra.mrb[48].mxu1 %vm4440_vm8, %v15403_v5 }
 0x34e   : > { %12492 = vmatprep.mubr.msk.f32.mxu0 %vm4440_vm8, %v15794_v44  ;;  %12727 = vmatprep.mubr.msk.f32.mxu1 %vm4440_vm8, %v15422_v24 }
 0x351   : > { %12493 = vmatmul.mubr.msk.f32.gmra.mrb[24].mxu0 %vm4440_vm8, %v15803_v51  ;;  %12728 = vmatmul.mubr.msk.f32.gmra.mrb[50].mxu1 %vm4440_vm8, %v15427_v2 }
 0x352   : > { %12495 = vmatprep.mubr.msk.f32.mxu0 %vm4440_vm8, %v15810_v13  ;;  %12730 = vmatprep.mubr.msk.f32.mxu1 %vm4440_vm8, %v15447_v60 }
 0x355   : > { %12496 = vmatmul.mubr.msk.f32.gmra.mrb[26].mxu0 %vm4440_vm8, %v15819_v52  ;;  %12731 = vmatmul.mubr.msk.f32.gmra.mrb[52].mxu1 %vm4440_vm8, %v15451_v54 }
 0x356   : > { %12498 = vmatprep.mubr.msk.f32.mxu0 %vm4440_vm8, %v15826_v41  ;;  %12733 = vmatprep.mubr.msk.f32.mxu1 %vm4440_vm8, %v15474_v31 }
 0x359   : > { %12499 = vmatmul.mubr.msk.f32.gmra.mrb[28].mxu0 %vm4440_vm8, %v15833_v56  ;;  %12734 = vmatmul.mubr.msk.f32.gmra.mrb[54].mxu1 %vm4440_vm8, %v15478_v36 }
 0x35a   : > { %12501 = vmatprep.mubr.msk.f32.mxu0 %vm4440_vm8, %v15880_v1  ;;  %12736 = vmatprep.mubr.msk.f32.mxu1 %vm4440_vm8, %v15508_v28 }
 0x35d   : > { %12502 = vmatmul.mubr.msk.f32.gmra.mrb[30].mxu0 %vm4440_vm8, %v15887_v37  ;;  %12737 = vmatmul.mubr.msk.f32.gmra.mrb[56].mxu1 %vm4440_vm8, %v15521_v57 }
 0x35e   : > { %12506 = vmatprep.mubr.msk.f32.mxu0 %vm4440_vm8, %v15578_v33  ;;  %12739 = vmatprep.mubr.msk.f32.mxu1 %vm4440_vm8, %v15550_v27 }
 0x361   : > { %12507 = vmatmul.mubr.msk.f32.vlgmr.msra.gmra.mrb[16].mxu0 %vm4440_vm8, %v15598_v17  ;;  %12740 = vmatmul.mubr.msk.f32.gmra.mrb[58].mxu1 %vm4440_vm8, %v15542_v58 }
 0x362   : > { %12509 = vmatprep.mubr.msk.f32.mxu0 %vm4440_vm8, %v15606_v9  ;;  %12744 = vmatprep.mubr.msk.f32.mxu1 %vm4440_vm8, %v15686_v47  ;;  %v4415_v47 = vrot.slane %v15542_v58, 1 }
 0x363   : > { %12531 = vmatpush3.msk.msra.mxu0 %vm4473_vm3, %v10498_v3 }
 0x364   : > { %12556 = vmatprep.subr.msk.mxu0 %vm4473_vm3, %v10516_v39  ;;  %v16175_v19 = vsel %vm514_vm2, %v4415_v47, 0.0 }
 0x365   : > { %12510 = vmatmul.mubr.msk.f32.gmra.mrb[18].mxu0 %vm4440_vm8, %v15614_v23  ;;  %12745 = vmatmul.mubr.msk.f32.vlgmr.msra.gmra.mrb[40].mxu1 %vm4440_vm8, %v15695_v8 }
 0x366   : > { %12775 = vmatpush3.msk.msra.mxu1 %vm4473_vm3, %v10666_v29  ;;  %12512 = vmatprep.mubr.msk.f32.mxu0 %vm4440_vm8, %v15622_v20  ;;  %v4414_v29 = vrot.slane %v15550_v27, 1 }
 0x367   : > { %12747 = vmatprep.mubr.msk.f32.mxu1 %vm4440_vm8, %v15702_v14  ;;  %12806 = vmatprep.subr.msk.mxu1 %vm4473_vm3, %v10688_v6 }
 0x368   : > { %v16168_v8 = vsel %vm514_vm2, %v4414_v29, %v4415_v47 }
 0x369   : > { %12513 = vmatmul.mubr.msk.f32.gmra.mrb[20].mxu0 %vm4440_vm8, %v15630_v63  ;;  %12748 = vmatmul.mubr.msk.f32.gmra.mrb[42].mxu1 %vm4440_vm8, %v15719_v30 }
 0x36a   : > { %12515 = vmatprep.mubr.msk.f32.mxu0 %vm4440_vm8, %v15638_v46  ;;  %12750 = vmatprep.mubr.msk.f32.mxu1 %vm4440_vm8, %v15729_v12 }
 0x36d   : > { %12516 = vmatmul.mubr.msk.f32.gmra.mrb[22].mxu0 %vm4440_vm8, %v15646_v26  ;;  %12751 = vmatmul.mubr.msk.f32.gmra.mrb[44].mxu1 %vm4440_vm8, %v15741_v0 }
 0x36e   : > { %12518 = vmatprep.mubr.msk.f32.mxu0 %vm4440_vm8, %v15654_v62  ;;  %12753 = vmatprep.mubr.msk.f32.mxu1 %vm4440_vm8, %v15751_v11 }
 0x371   : > { %12519 = vmatmul.mubr.msk.f32.gmra.mrb[24].mxu0 %vm4440_vm8, %v15662_v16  ;;  %12754 = vmatmul.mubr.msk.f32.gmra.mrb[46].mxu1 %vm4440_vm8, %v15760_v4 }
 0x372   : > { %12521 = vmatprep.mubr.msk.f32.mxu0 %vm4440_vm8, %v15670_v50  ;;  %12756 = vmatprep.mubr.msk.f32.mxu1 %vm4440_vm8, %v15774_v43 }
 0x375   : > { %12522 = vmatmul.mubr.msk.f32.gmra.mrb[26].mxu0 %vm4440_vm8, %v15679_v22  ;;  %12757 = vmatmul.mubr.msk.f32.gmra.mrb[48].mxu1 %vm4440_vm8, %v15787_v35 }
 0x376   : > { %12524 = vmatprep.mubr.msk.f32.mxu0 %vm4440_vm8, %v15732_v40  ;;  %12759 = vmatprep.mubr.msk.f32.mxu1 %vm4440_vm8, %v15794_v44 }
 0x379   : > { %12525 = vmatmul.mubr.msk.f32.gmra.mrb[28].mxu0 %vm4440_vm8, %v15744_v59  ;;  %12760 = vmatmul.mubr.msk.f32.gmra.mrb[50].mxu1 %vm4440_vm8, %v15803_v51 }
 0x37a   : > { %12527 = vmatprep.mubr.msk.f32.mxu0 %vm4440_vm8, %v15979_v21  ;;  %12762 = vmatprep.mubr.msk.f32.mxu1 %vm4440_vm8, %v15810_v13 }
 0x37d   : > { %12528 = vmatmul.mubr.msk.f32.gmra.mrb[30].mxu0 %vm4440_vm8, %v15986_v45  ;;  %12763 = vmatmul.mubr.msk.f32.gmra.mrb[52].mxu1 %vm4440_vm8, %v15819_v52 }
 0x37e   : > { %12532 = vmatprep.mubr.msk.f32.mxu0 %vm4440_vm8, %v15352_v25  ;;  %12765 = vmatprep.mubr.msk.f32.mxu1 %vm4440_vm8, %v15826_v41 }
 0x381   : > { %12533 = vmatmul.mubr.msk.f32.vlgmr.msra.gmra.mrb[16].mxu0 %vm4440_vm8, %v15356_v42  ;;  %12766 = vmatmul.mubr.msk.f32.gmra.mrb[54].mxu1 %vm4440_vm8, %v15833_v56 }
 0x382   : > { %12535 = vmatprep.mubr.msk.f32.mxu0 %vm4440_vm8, %v15375_v53  ;;  %12768 = vmatprep.mubr.msk.f32.mxu1 %vm4440_vm8, %v15880_v1 }
 0x383   : > { %12557 = vmatpush3.msk.msra.mxu0 %vm4473_vm3, %v10516_v39 }
 0x385   : > { %12536 = vmatmul.mubr.msk.f32.gmra.mrb[18].mxu0 %vm4440_vm8, %v15379_v48  ;;  %12769 = vmatmul.mubr.msk.f32.gmra.mrb[56].mxu1 %vm4440_vm8, %v15887_v37 }
 0x386   : > { %12538 = vmatprep.mubr.msk.f32.mxu0 %vm4440_vm8, %v15399_v34  ;;  %12771 = vmatprep.mubr.msk.f32.mxu1 %vm4440_vm8, %v16168_v8 }
 0x389   : > { %12539 = vmatmul.mubr.msk.f32.gmra.mrb[20].mxu0 %vm4440_vm8, %v15403_v5  ;;  %12772 = vmatmul.mubr.msk.f32.gmra.mrb[58].mxu1 %vm4440_vm8, %v16175_v19 }
 0x38a   : > { %12541 = vmatprep.mubr.msk.f32.mxu0 %vm4440_vm8, %v15422_v24  ;;  %12776 = vmatprep.mubr.msk.f32.mxu1 %vm4440_vm8, %v15532_v10  ;;  %v6070_v10 = vrot.slane %v15591_v7, 7 }
 0x38d   : > { %12542 = vmatmul.mubr.msk.f32.gmra.mrb[22].mxu0 %vm4440_vm8, %v15427_v2  ;;  %12777 = vmatmul.mubr.msk.f32.vlgmr.msra.gmra.mrb[40].mxu1 %vm4440_vm8, %v15563_v61  ;;  %v6071_v61 = vrot.slane %v15583_v49, 7 }
 0x38e   : > { %12807 = vmatpush3.msk.msra.mxu1 %vm4473_vm3, %v10688_v6  ;;  %12544 = vmatprep.mubr.msk.f32.mxu0 %vm4440_vm8, %v15447_v60 }
 0x38f   : > { %12779 = vmatprep.mubr.msk.f32.mxu1 %vm4440_vm8, %v15578_v33  ;;  %12838 = vmatprep.subr.msk.mxu1 %vm4473_vm3, %v10710_v55 }
 0x391   : > { %12545 = vmatmul.mubr.msk.f32.gmra.mrb[24].mxu0 %vm4440_vm8, %v15451_v54  ;;  %12780 = vmatmul.mubr.msk.f32.gmra.mrb[42].mxu1 %vm4440_vm8, %v15598_v17 }
 0x392   : > { %12547 = vmatprep.mubr.msk.f32.mxu0 %vm4440_vm8, %v15474_v31  ;;  %12782 = vmatprep.mubr.msk.f32.mxu1 %vm4440_vm8, %v15606_v9 }
 0x395   : > { %12548 = vmatmul.mubr.msk.f32.gmra.mrb[26].mxu0 %vm4440_vm8, %v15478_v36  ;;  %12783 = vmatmul.mubr.msk.f32.gmra.mrb[44].mxu1 %vm4440_vm8, %v15614_v23 }
 0x396   : > { %12550 = vmatprep.mubr.msk.f32.mxu0 %vm4440_vm8, %v15508_v28  ;;  %12785 = vmatprep.mubr.msk.f32.mxu1 %vm4440_vm8, %v15622_v20 }
 0x399   : > { %12551 = vmatmul.mubr.msk.f32.gmra.mrb[28].mxu0 %vm4440_vm8, %v15521_v57  ;;  %12786 = vmatmul.mubr.msk.f32.gmra.mrb[46].mxu1 %vm4440_vm8, %v15630_v63 }
 0x39a   : > { %12553 = vmatprep.mubr.msk.f32.mxu0 %vm4440_vm8, %v15550_v27  ;;  %12788 = vmatprep.mubr.msk.f32.mxu1 %vm4440_vm8, %v15638_v46 }
 0x39d   : > { %12554 = vmatmul.mubr.msk.f32.gmra.mrb[30].mxu0 %vm4440_vm8, %v15542_v58  ;;  %12789 = vmatmul.mubr.msk.f32.gmra.mrb[48].mxu1 %vm4440_vm8, %v15646_v26 }
 0x39e   : > { %12558 = vmatprep.mubr.msk.f32.mxu0 %vm4440_vm8, %v15729_v12  ;;  %12791 = vmatprep.mubr.msk.f32.mxu1 %vm4440_vm8, %v15654_v62 }
 0x3a1   : > { %12559 = vmatmul.mubr.msk.f32.vlgmr.msra.gmra.mrb[16].mxu0 %vm4440_vm8, %v15741_v0  ;;  %12792 = vmatmul.mubr.msk.f32.gmra.mrb[50].mxu1 %vm4440_vm8, %v15662_v16 }
 0x3a2   : > { %12561 = vmatprep.mubr.msk.f32.mxu0 %vm4440_vm8, %v15751_v11  ;;  %12794 = vmatprep.mubr.msk.f32.mxu1 %vm4440_vm8, %v15670_v50 }
 0x3a5   : > { %12562 = vmatmul.mubr.msk.f32.gmra.mrb[18].mxu0 %vm4440_vm8, %v15760_v4  ;;  %12795 = vmatmul.mubr.msk.f32.gmra.mrb[52].mxu1 %vm4440_vm8, %v15679_v22 }
 0x3a6   : > { %12564 = vmatprep.mubr.msk.f32.mxu0 %vm4440_vm8, %v15774_v43  ;;  %12797 = vmatprep.mubr.msk.f32.mxu1 %vm4440_vm8, %v15732_v40  ;;  %v6076_v40 = vsel %vm463_vm1, 0.0, %v6070_v10 }
 0x3a9   : > { %12565 = vmatmul.mubr.msk.f32.gmra.mrb[20].mxu0 %vm4440_vm8, %v15787_v35  ;;  %12798 = vmatmul.mubr.msk.f32.gmra.mrb[54].mxu1 %vm4440_vm8, %v15744_v59  ;;  %v6072_v59 = vsel %vm463_vm1, %v6070_v10, %v6071_v61  ;;  %v16426_v61 = vld [vmem:[%s17213_s9 + $0x4] sm:$0x3] }
 0x3aa   : > { %12567 = vmatprep.mubr.msk.f32.mxu0 %vm4440_vm8, %v15794_v44  ;;  %12800 = vmatprep.mubr.msk.f32.mxu1 %vm4440_vm8, %v15979_v21 }
 0x3ad   : > { %12568 = vmatmul.mubr.msk.f32.gmra.mrb[22].mxu0 %vm4440_vm8, %v15803_v51  ;;  %12801 = vmatmul.mubr.msk.f32.gmra.mrb[56].mxu1 %vm4440_vm8, %v15986_v45 }
 0x3ae   : > { %12570 = vmatprep.mubr.msk.f32.mxu0 %vm4440_vm8, %v15810_v13  ;;  %12803 = vmatprep.mubr.msk.f32.mxu1 %vm4440_vm8, %v6076_v40 }
 0x3b1   : > { %12571 = vmatmul.mubr.msk.f32.gmra.mrb[24].mxu0 %vm4440_vm8, %v15819_v52  ;;  %12804 = vmatmul.mubr.msk.f32.gmra.mrb[58].mxu1 %vm4440_vm8, %v6072_v59 }
 0x3b2   : > { %12573 = vmatprep.mubr.msk.f32.mxu0 %vm4440_vm8, %v15826_v41  ;;  %12808 = vmatprep.mubr.msk.f32.mxu1 %vm4440_vm8, %v15325_v32  ;;  %v16371_v32 = vld [vmem:[%s17213_s9] sm:$0x3] }
 0x3b5   : > { %12574 = vmatmul.mubr.msk.f32.gmra.mrb[26].mxu0 %vm4440_vm8, %v15833_v56  ;;  %12809 = vmatmul.mubr.msk.f32.vlgmr.msra.gmra.mrb[40].mxu1 %vm4440_vm8, %v15331_v38  ;;  %v10534_v38 = vld [vmem:[%s17210_s6] ss:$0 sm:$0xff] }
 0x3b6   : > { %12839 = vmatpush3.msk.msra.mxu1 %vm4473_vm3, %v10710_v55  ;;  %12576 = vmatprep.mubr.msk.f32.mxu0 %vm4440_vm8, %v15880_v1 }
 0x3b7   : > { %12811 = vmatprep.mubr.msk.f32.mxu1 %vm4440_vm8, %v15352_v25 }
 0x3b9   : > { %12577 = vmatmul.mubr.msk.f32.gmra.mrb[28].mxu0 %vm4440_vm8, %v15887_v37  ;;  %12812 = vmatmul.mubr.msk.f32.gmra.mrb[42].mxu1 %vm4440_vm8, %v15356_v42 }
 0x3ba   : > { %12579 = vmatprep.mubr.msk.f32.mxu0 %vm4440_vm8, %v16168_v8  ;;  %12814 = vmatprep.mubr.msk.f32.mxu1 %vm4440_vm8, %v15375_v53 }
 0x3bd   : > { %12580 = vmatmul.mubr.msk.f32.gmra.mrb[30].mxu0 %vm4440_vm8, %v16175_v19  ;;  %12815 = vmatmul.mubr.msk.f32.gmra.mrb[44].mxu1 %vm4440_vm8, %v15379_v48 }
 0x3be   : > { %12817 = vmatprep.mubr.msk.f32.mxu1 %vm4440_vm8, %v15399_v34 }
 0x3c1   : > { %12818 = vmatmul.mubr.msk.f32.gmra.mrb[46].mxu1 %vm4440_vm8, %v15403_v5 }
 0x3c2   : > { %12820 = vmatprep.mubr.msk.f32.mxu1 %vm4440_vm8, %v15422_v24 }
 0x3c5   : > { %12821 = vmatmul.mubr.msk.f32.gmra.mrb[48].mxu1 %vm4440_vm8, %v15427_v2 }
 0x3c6   : > { %12823 = vmatprep.mubr.msk.f32.mxu1 %vm4440_vm8, %v15447_v60 }
 0x3c9   : > { %12824 = vmatmul.mubr.msk.f32.gmra.mrb[50].mxu1 %vm4440_vm8, %v15451_v54 }
 0x3ca   : > { %12826 = vmatprep.mubr.msk.f32.mxu1 %vm4440_vm8, %v15474_v31 }
 0x3cd   : > { %12827 = vmatmul.mubr.msk.f32.gmra.mrb[52].mxu1 %vm4440_vm8, %v15478_v36 }
 0x3ce   : > { %12829 = vmatprep.mubr.msk.f32.mxu1 %vm4440_vm8, %v15508_v28 }
 0x3d1   : > { %12830 = vmatmul.mubr.msk.f32.gmra.mrb[54].mxu1 %vm4440_vm8, %v15521_v57 }
 0x3d2   : > { %12832 = vmatprep.mubr.msk.f32.mxu1 %vm4440_vm8, %v15550_v27 }
 0x3d5   : > { %12833 = vmatmul.mubr.msk.f32.gmra.mrb[56].mxu1 %vm4440_vm8, %v15542_v58 }
 0x3d6   : > { %12835 = vmatprep.mubr.msk.f32.mxu1 %vm4440_vm8, %v15591_v7 }
 0x3d9   : > { %12836 = vmatmul.mubr.msk.f32.gmra.mrb[58].mxu1 %vm4440_vm8, %v15583_v49 }
 0x3da   : > { %12840 = vmatprep.mubr.msk.f32.mxu1 %vm4440_vm8, %v15702_v14 }
 0x3dd   : > { %12841 = vmatmul.mubr.msk.f32.vlgmr.msra.gmra.mrb[40].mxu1 %vm4440_vm8, %v15719_v30 }
 0x3de   : > { %12843 = vmatprep.mubr.msk.f32.mxu1 %vm4440_vm8, %v15729_v12 }
 0x3e1   : > { %12844 = vmatmul.mubr.msk.f32.gmra.mrb[42].mxu1 %vm4440_vm8, %v15741_v0  ;;  %v6081_v0 = vrot.slane %v15583_v49, 1 }
 0x3e2   : > { %12846 = vmatprep.mubr.msk.f32.mxu1 %vm4440_vm8, %v15751_v11  ;;  %v16395_v11 = vstv %s10733_s12  ;;  %s408_s12 = sadd.s32 %s9990_s27, %s9989_s26 }
 0x3e3   : > { %vm7882_vm10 = vcmp.ge.s32.totalorder %v16395_v11, 0  ;;  %vm7892_vm11 = vcmp.lt.s32.totalorder %v16395_v11, 16  ;;  %s9991_s17 = sshll.u32 %s408_s12, 3 }
 0x3e4   : > { %vm16408_vm13 = vmand %vm7882_vm10, %vm7892_vm11  ;;  %s17088_s13 = scalar_lea.vmem %s17215_s11, %s9991_s17 }
 0x3e5   : > { %12847 = vmatmul.mubr.msk.f32.gmra.mrb[44].mxu1 %vm4440_vm8, %v15760_v4  ;;  %v16400_v4 = vld [vmem:[%s17212_s8] ss:$0 sm:$0xff] }
 0x3e6   : > { %12849 = vmatprep.mubr.msk.f32.mxu1 %vm4440_vm8, %v15774_v43  ;;  %v6080_v43 = vrot.slane %v15591_v7, 1 }
 0x3e8   : > { %v6082_v12 = vsel %vm514_vm2, %v6080_v43, %v6081_v0 }
 0x3e9   : > { %12850 = vmatmul.mubr.msk.f32.gmra.mrb[46].mxu1 %vm4440_vm8, %v15787_v35 }
 0x3ea   : > { %12852 = vmatprep.mubr.msk.f32.mxu1 %vm4440_vm8, %v15794_v44  ;;  %v7873_v44 = vadd.s32 1, %v16395_v11 }
 0x3ec   : > { %vm7883_vm15 = vcmp.ge.s32.totalorder %v7873_v44, 0  ;;  %vm7893_vm4 = vcmp.lt.s32.totalorder %v7873_v44, 16 }
 0x3ed   : > { %12853 = vmatmul.mubr.msk.f32.gmra.mrb[48].mxu1 %vm4440_vm8, %v15803_v51  ;;  %vm16434_vm10 = vmand %vm7883_vm15, %vm7893_vm4 }
 0x3ee   : > { %12855 = vmatprep.mubr.msk.f32.mxu1 %vm4440_vm8, %v15810_v13 }
 0x3f1   : > { %12856 = vmatmul.mubr.msk.f32.gmra.mrb[50].mxu1 %vm4440_vm8, %v15819_v52  ;;  %v7874_v52 = vadd.s32 2, %v16395_v11 }
 0x3f2   : > { %12858 = vmatprep.mubr.msk.f32.mxu1 %vm4440_vm8, %v15826_v41 }
 0x3f3   : > { %vm7884_vm5 = vcmp.ge.s32.totalorder %v7874_v52, 0  ;;  %vm7894_vm6 = vcmp.lt.s32.totalorder %v7874_v52, 16 }
 0x3f5   : > { %12859 = vmatmul.mubr.msk.f32.gmra.mrb[52].mxu1 %vm4440_vm8, %v15833_v56  ;;  %v6086_v56 = vsel %vm514_vm2, %v6081_v0, 0.0 }
 0x3f6   : > { %12861 = vmatprep.mubr.msk.f32.mxu1 %vm4440_vm8, %v15880_v1 }
 0x3f9   : > { %12862 = vmatmul.mubr.msk.f32.gmra.mrb[54].mxu1 %vm4440_vm8, %v15887_v37  ;;  %v10734_v37 = vld [vmem:[%s17213_s9 + $0x2] sm:$0x3] }
 0x3fa   : > { %12864 = vmatprep.mubr.msk.f32.mxu1 %vm4440_vm8, %v16168_v8  ;;  %12870 = vmatprep.subr.msk.mxu0 %vm4473_vm3, %v10734_v37 }
 0x3fb   : > { %12871 = vmatpush3.msk.msra.mxu0 %vm4473_vm3, %v10734_v37 }
 0x3fc   : > { %12896 = vmatprep.subr.msk.mxu0 %vm4473_vm3, %v16371_v32 }
 0x3fd   : > { %12865 = vmatmul.mubr.msk.f32.gmra.mrb[56].mxu1 %vm4440_vm8, %v16175_v19  ;;  %v7875_v19 = vadd.s32 3, %v16395_v11 }
 0x3fe   : > { %12867 = vmatprep.mubr.msk.f32.mxu1 %vm4440_vm8, %v6082_v12 }
 0x3ff   : > { %vm7895_vm15 = vcmp.lt.s32.totalorder %v7875_v19, 16 }
 0x401   : > { %12868 = vmatmul.mubr.msk.f32.gmra.mrb[58].mxu1 %vm4440_vm8, %v6086_v56 }
 0x474   : > { %v12560_v25 = vpop.f32.mrb[16].mxu0 }
 0x475   : > { %v6048_v42 = vadd.f32 %v12560_v25, %v10534_v38  ;;  %v5945_v53 = vpop.f32.mrb[17].mxu0 }
 0x476   : > { %v6047_v34 = vadd.f32 %v10534_v38, %v5945_v53 }
 0x477   : > { %9714 = vrot.lane.b32.xlu0 %v6048_v42, %s13929_s30 }
 0x478   : > { %v12563_v48 = vpop.f32.mrb[18].mxu0 }
 0x479   : > { %v6050_v5 = vadd.f32 %v12563_v48, %v10534_v38  ;;  %v5955_v24 = vpop.f32.mrb[19].mxu0 }
 0x47a   : > { %v6049_v60 = vadd.f32 %v10534_v38, %v5955_v24 }
 0x47b   : > { %9712 = vrot.lane.b32.xlu0 %v6047_v34, %s13929_s30  ;;  %9718 = vrot.lane.b32.xlu1 %v6050_v5, %s13929_s30 }
 0x47c   : > { %v12566_v2 = vpop.f32.mrb[20].mxu0 }
 0x47d   : > { %v5965_v54 = vpop.f32.mrb[21].mxu0  ;;  %v6052_v28 = vadd.f32 %v12566_v2, %v10534_v38 }
 0x47e   : > { %v6051_v31 = vadd.f32 %v10534_v38, %v5965_v54 }
 0x47f   : > { %9716 = vrot.lane.b32.xlu1 %v6049_v60, %s13929_s30 }
 0x480   : > { %9720 = vrot.lane.b32.xlu0 %v6051_v31, %s13929_s30  ;;  %v12569_v36 = vpop.f32.mrb[22].mxu0  ;;  %v7876_v31 = vadd.s32 4, %v16395_v11 }
 0x481   : > { %v5975_v57 = vpop.f32.mrb[23].mxu0  ;;  %v6054_v33 = vadd.f32 %v12569_v36, %v10534_v38 }
 0x482   : > { %v6053_v58 = vadd.f32 %v10534_v38, %v5975_v57 }
 0x483   : > { %9722 = vrot.lane.b32.xlu1 %v6052_v28, %s13929_s30 }
 0x484   : > { %9724 = vrot.lane.b32.xlu0 %v6053_v58, %s13929_s30  ;;  %v12572_v27 = vpop.f32.mrb[24].mxu0 }
 0x485   : > { %v5985_v49 = vpop.f32.mrb[25].mxu0  ;;  %v6056_v9 = vadd.f32 %v12572_v27, %v10534_v38 }
 0x486   : > { %v6055_v7 = vadd.f32 %v10534_v38, %v5985_v49 }
 0x487   : > { %9726 = vrot.lane.b32.xlu1 %v6054_v33, %s13929_s30 }
 0x488   : > { %9728 = vrot.lane.b32.xlu0 %v6055_v7, %s13929_s30  ;;  %v12575_v17 = vpop.f32.mrb[26].mxu0 }
 0x489   : > { %v5995_v23 = vpop.f32.mrb[27].mxu0  ;;  %v6058_v46 = vadd.f32 %v12575_v17, %v10534_v38 }
 0x48a   : > { %v6057_v20 = vadd.f32 %v10534_v38, %v5995_v23 }
 0x48b   : > { %9730 = vrot.lane.b32.xlu1 %v6056_v9, %s13929_s30 }
 0x48c   : > { %9732 = vrot.lane.b32.xlu0 %v6057_v20, %s13929_s30  ;;  %v12578_v63 = vpop.f32.mrb[28].mxu0 }
 0x48d   : > { %v6005_v26 = vpop.f32.mrb[29].mxu0  ;;  %v6060_v50 = vadd.f32 %v12578_v63, %v10534_v38 }
 0x48e   : > { %v6059_v62 = vadd.f32 %v10534_v38, %v6005_v26 }
 0x48f   : > { %9734 = vrot.lane.b32.xlu1 %v6058_v46, %s13929_s30 }
 0x490   : > { %9736 = vrot.lane.b32.xlu0 %v6059_v62, %s13929_s30  ;;  %v12581_v16 = vpop.f32.mrb[30].mxu0  ;;  %v7877_v62 = vadd.s32 5, %v16395_v11 }
 0x491   : > { %v6015_v22 = vpop.f32.mrb[31].mxu0  ;;  %v6062_v30 = vadd.f32 %v12581_v16, %v10534_v38 }
 0x492   : > { %v6061_v14 = vadd.f32 %v10534_v38, %v6015_v22 }
 0x493   : > { %9738 = vrot.lane.b32.xlu1 %v6060_v50, %s13929_s30 }
 0x494   : > { %9740 = vrot.lane.b32.xlu0 %v6061_v14, %s13929_s30 }
 0x497   : > { %9742 = vrot.lane.b32.xlu1 %v6062_v30, %s13929_s30 }
 0x4b0   : > { %v12842_v35 = vpop.f32.mrb[40].mxu1 }
 0x4b1   : > { %v7792_v51 = vadd.f32 %v12842_v35, %v16400_v4  ;;  %v7665_v13 = vpop.f32.mrb[41].mxu1 }
 0x4b2   : > { %v7791_v41 = vadd.f32 %v16400_v4, %v7665_v13  ;;  %v7878_v13 = vadd.s32 6, %v16395_v11 }
 0x4b3   : > { %vm7812_vm12 = vcmp.gt.f32.partialorder %v7792_v51, 0.0  ;;  %v7832_v1 = vmul.f32 0.1, %v7792_v51 }
 0x4b4   : > { %vm7811_vm14 = vcmp.gt.f32.partialorder %v7791_v41, 0.0  ;;  %v7831_v21 = vmul.f32 0.1, %v7791_v41  ;;  %v12845_v45 = vpop.f32.mrb[42].mxu1 }
 0x4b5   : > { %v7852_v3 = vsel %vm7812_vm12, %v7792_v51, %v7832_v1  ;;  %v7794_v39 = vadd.f32 %v12845_v45, %v16400_v4  ;;  %v7675_v6 = vpop.f32.mrb[43].mxu1  ;;  %vm7885_vm12 = vcmp.ge.s32.totalorder %v7875_v19, 0 }
 0x4b6   : > { %v7793_v29 = vadd.f32 %v16400_v4, %v7675_v6  ;;  %v7851_v47 = vsel %vm7811_vm14, %v7791_v41, %v7831_v21  ;;  %v16416_v8 = vsel %vm16408_vm13, %v7852_v3, 0.0  ;;  %vm16465_vm14 = vmand %vm7884_vm5, %vm7894_vm6 }
 0x4b7   : > { %vm7814_vm7 = vcmp.gt.f32.partialorder %v7794_v39, 0.0  ;;  %v7834_v55 = vmul.f32 0.1, %v7794_v39  ;;  %v16421_v10 = vsel %vm16408_vm13, %v7851_v47, 0.0  ;;  %v8023_v0 = vrot.slane %v16416_v8, 1  ;;  %vm16490_vm6 = vmand %vm7885_vm12, %vm7895_vm15 }
 0x4b8   : > { %vm7813_vm9 = vcmp.gt.f32.partialorder %v7793_v29, 0.0  ;;  %v7833_v40 = vmul.f32 0.1, %v7793_v29  ;;  %v12848_v59 = vpop.f32.mrb[44].mxu1  ;;  %v8022_v43 = vrot.slane %v16421_v10, 1  ;;  %12872 = vmatprep.mubr.msk.f32.mxu0 %vm4440_vm8, %v16421_v10  ;;  %v7973_v37 = vrot.slane %v16416_v8, 7 }
 0x4b9   : > { %v7796_v56 = vadd.f32 %v12848_v59, %v16400_v4  ;;  %v7685_v38 = vpop.f32.mrb[45].mxu1  ;;  %12873 = vmatmul.mubr.msk.f32.vlgmr.msra.gmra.mrb[32].mxu0 %vm4440_vm8, %v16416_v8  ;;  %v7854_v25 = vsel %vm7814_vm7, %v7794_v39, %v7834_v55  ;;  %v7972_v42 = vrot.slane %v16421_v10, 7  ;;  %vm7886_vm7 = vcmp.ge.s32.totalorder %v7876_v31, 0  ;;  %v16616_v47 = vld [vmem:[%s17213_s9 + $0x6] sm:$0x3] }
 0x4ba   : > { %v7795_v53 = vadd.f32 %v16400_v4, %v7685_v38  ;;  %12897 = vmatpush3.msk.msra.mxu0 %vm4473_vm3, %v16371_v32  ;;  %v7853_v48 = vsel %vm7813_vm9, %v7793_v29, %v7833_v40  ;;  %v16449_v34 = vsel %vm514_vm2, %v8022_v43, %v8023_v0  ;;  %v16461_v32 = vsel %vm16434_vm10, %v7854_v25, 0.0 }
 0x4bb   : > { %vm7816_vm11 = vcmp.gt.f32.partialorder %v7796_v56, 0.0  ;;  %v7836_v5 = vmul.f32 0.1, %v7796_v56  ;;  %v16453_v24 = vsel %vm16434_vm10, %v7853_v48, 0.0  ;;  %12922 = vmatprep.subr.msk.mxu0 %vm4473_vm3, %v16426_v61  ;;  %v16476_v58 = vsel %vm463_vm1, %v7972_v42, %v7973_v37 }
 0x4bc   : > { %vm7815_vm13 = vcmp.gt.f32.partialorder %v7795_v53, 0.0  ;;  %v7835_v2 = vmul.f32 0.1, %v7795_v53  ;;  %v12851_v60 = vpop.f32.mrb[46].mxu1  ;;  %12875 = vmatprep.mubr.msk.f32.mxu0 %vm4440_vm8, %v16453_v24  ;;  %vm7896_vm9 = vcmp.lt.s32.totalorder %v7876_v31, 16  ;;  %v7879_v59 = vadd.s32 7, %v16395_v11 }
 0x4bd   : > { %v7856_v36 = vsel %vm7816_vm11, %v7796_v56, %v7836_v5  ;;  %v7798_v28 = vadd.f32 %v12851_v60, %v16400_v4  ;;  %v7695_v57 = vpop.f32.mrb[47].mxu1  ;;  %12876 = vmatmul.mubr.msk.f32.gmra.mrb[34].mxu0 %vm4440_vm8, %v16461_v32  ;;  %vm16510_vm12 = vmand %vm7886_vm7, %vm7896_vm9  ;;  %vm7898_vm7 = vcmp.lt.s32.totalorder %v7878_v13, 16  ;;  %v7880_v56 = vadd.s32 8, %v16395_v11 }
 0x4be   : > { %v7855_v27 = vsel %vm7815_vm13, %v7795_v53, %v7835_v2  ;;  %v7797_v33 = vadd.f32 %v16400_v4, %v7695_v57  ;;  %v16487_v23 = vsel %vm16465_vm14, %v7856_v36, 0.0  ;;  %vm7887_vm13 = vcmp.ge.s32.totalorder %v7877_v62, 0 }
 0x4bf   : > { %vm7818_vm4 = vcmp.gt.f32.partialorder %v7798_v28, 0.0  ;;  %v7838_v49 = vmul.f32 0.1, %v7798_v28  ;;  %v16481_v7 = vsel %vm16465_vm14, %v7855_v27, 0.0  ;;  %vm7897_vm14 = vcmp.lt.s32.totalorder %v7877_v62, 16 }
 0x4c0   : > { %vm7817_vm5 = vcmp.gt.f32.partialorder %v7797_v33, 0.0  ;;  %v7837_v17 = vmul.f32 0.1, %v7797_v33  ;;  %v12854_v9 = vpop.f32.mrb[48].mxu1  ;;  %12878 = vmatprep.mubr.msk.f32.mxu0 %vm4440_vm8, %v16481_v7  ;;  %v7881_v27 = vadd.s32 9, %v16395_v11  ;;  %v7976_v10 = vrot.slane %v16461_v32, 7 }
 0x4c1   : > { %v7858_v63 = vsel %vm7818_vm4, %v7798_v28, %v7838_v49  ;;  %v7800_v46 = vadd.f32 %v12854_v9, %v16400_v4  ;;  %v7705_v26 = vpop.f32.mrb[49].mxu1  ;;  %12879 = vmatmul.mubr.msk.f32.gmra.mrb[36].mxu0 %vm4440_vm8, %v16487_v23 }
 0x4c2   : > { %v7857_v16 = vsel %vm7817_vm5, %v7797_v33, %v7837_v17  ;;  %v7799_v50 = vadd.f32 %v16400_v4, %v7705_v26  ;;  %v16507_v44 = vsel %vm16490_vm6, %v7858_v63, 0.0  ;;  %vm16529_vm5 = vmand %vm7887_vm13, %vm7897_vm14  ;;  %vm7899_vm13 = vcmp.lt.s32.totalorder %v7879_v59, 16 }
 0x4c3   : > { %vm7820_vm10 = vcmp.gt.f32.partialorder %v7800_v46, 0.0  ;;  %v7840_v22 = vmul.f32 0.1, %v7800_v46  ;;  %v16501_v14 = vsel %vm16490_vm6, %v7857_v16, 0.0  ;;  %vm7888_vm6 = vcmp.ge.s32.totalorder %v7878_v13, 0 }
 0x4c4   : > { %vm7819_vm11 = vcmp.gt.f32.partialorder %v7799_v50, 0.0  ;;  %v7839_v30 = vmul.f32 0.1, %v7799_v50  ;;  %v12857_v35 = vpop.f32.mrb[50].mxu1  ;;  %12881 = vmatprep.mubr.msk.f32.mxu0 %vm4440_vm8, %v16501_v14  ;;  %vm7890_vm14 = vcmp.ge.s32.totalorder %v7880_v56, 0  ;;  %v7982_v5 = vrot.slane %v16507_v44, 7 }
 0x4c5   : > { %v7860_v52 = vsel %vm7820_vm10, %v7800_v46, %v7840_v22  ;;  %v7802_v41 = vadd.f32 %v12857_v35, %v16400_v4  ;;  %v7715_v1 = vpop.f32.mrb[51].mxu1  ;;  %12882 = vmatmul.mubr.msk.f32.gmra.mrb[38].mxu0 %vm4440_vm8, %v16507_v44 }
 0x4c6   : > { %v7859_v15 = vsel %vm7819_vm11, %v7799_v50, %v7839_v30  ;;  %v7801_v21 = vadd.f32 %v16400_v4, %v7715_v1  ;;  %v16527_v29 = vsel %vm16510_vm12, %v7860_v52, 0.0  ;;  %vm16550_vm11 = vmand %vm7888_vm6, %vm7898_vm7  ;;  %v7975_v1 = vrot.slane %v16453_v24, 7 }
 0x4c7   : > { %vm7822_vm15 = vcmp.gt.f32.partialorder %v7802_v41, 0.0  ;;  %v7842_v45 = vmul.f32 0.1, %v7802_v41  ;;  %v16521_v3 = vsel %vm16510_vm12, %v7859_v15, 0.0  ;;  %vm7889_vm12 = vcmp.ge.s32.totalorder %v7879_v59, 0 }
 0x4c8   : > { %vm7821_vm4 = vcmp.gt.f32.partialorder %v7801_v21, 0.0  ;;  %v7841_v39 = vmul.f32 0.1, %v7801_v21  ;;  %v12860_v6 = vpop.f32.mrb[52].mxu1  ;;  %12884 = vmatprep.mubr.msk.f32.mxu0 %vm4440_vm8, %v16521_v3  ;;  %vm16570_vm6 = vmand %vm7889_vm12, %vm7899_vm13  ;;  %vm7901_vm12 = vcmp.lt.s32.totalorder %v7881_v27, 16 }
 0x4c9   : > { %v7862_v19 = vsel %vm7822_vm15, %v7802_v41, %v7842_v45  ;;  %v7804_v55 = vadd.f32 %v12860_v6, %v16400_v4  ;;  %v7725_v40 = vpop.f32.mrb[53].mxu1  ;;  %12885 = vmatmul.mubr.msk.f32.gmra.mrb[40].mxu0 %vm4440_vm8, %v16527_v29  ;;  %v8012_v41 = vsel %vm463_vm1, 0.0, %v7972_v42 }
 0x4ca   : > { %v7861_v43 = vsel %vm7821_vm4, %v7801_v21, %v7841_v39  ;;  %v7803_v12 = vadd.f32 %v16400_v4, %v7725_v40  ;;  %v16547_v48 = vsel %vm16529_vm5, %v7862_v19, 0.0  ;;  %v16621_v19 = vsel %vm463_vm1, 0.0, %v7975_v1 }
 0x4cb   : > { %vm7824_vm9 = vcmp.gt.f32.partialorder %v7804_v55, 0.0  ;;  %v7844_v37 = vmul.f32 0.1, %v7804_v55  ;;  %v16541_v38 = vsel %vm16529_vm5, %v7861_v43, 0.0  ;;  %vm7900_vm5 = vcmp.lt.s32.totalorder %v7880_v56, 16 }
 0x4cc   : > { %vm7823_vm10 = vcmp.gt.f32.partialorder %v7803_v12, 0.0  ;;  %v7843_v25 = vmul.f32 0.1, %v7803_v12  ;;  %v12863_v53 = vpop.f32.mrb[54].mxu1  ;;  %12887 = vmatprep.mubr.msk.f32.mxu0 %vm4440_vm8, %v16541_v38  ;;  %v7987_v9 = vrot.slane %v16541_v38, 7 }
 0x4cd   : > { %v7864_v2 = vsel %vm7824_vm9, %v7804_v55, %v7844_v37  ;;  %v7806_v60 = vadd.f32 %v12863_v53, %v16400_v4  ;;  %v7735_v54 = vpop.f32.mrb[55].mxu1  ;;  %12888 = vmatmul.mubr.msk.f32.gmra.mrb[42].mxu0 %vm4440_vm8, %v16547_v48  ;;  %vm16579_vm9 = vmand %vm7890_vm14, %vm7900_vm5  ;;  %v7978_v55 = vrot.slane %v16481_v7, 7 }
 0x4ce   : > { %v7863_v31 = vsel %vm7823_vm10, %v7803_v12, %v7843_v25  ;;  %v7805_v36 = vadd.f32 %v16400_v4, %v7735_v54  ;;  %v16567_v17 = vsel %vm16550_vm11, %v7864_v2, 0.0  ;;  %vm7891_vm10 = vcmp.ge.s32.totalorder %v7881_v27, 0 }
 0x4cf   : > { %vm7826_vm15 = vcmp.gt.f32.partialorder %v7806_v60, 0.0  ;;  %v7846_v28 = vmul.f32 0.1, %v7806_v60  ;;  %v16560_v57 = vsel %vm16550_vm11, %v7863_v31, 0.0  ;;  %vm7911_vm14 = vmand %vm7891_vm10, %vm7901_vm12  ;;  %v7979_v12 = vrot.slane %v16487_v23, 7 }
 0x4d0   : > { %vm7825_vm4 = vcmp.gt.f32.partialorder %v7805_v36, 0.0  ;;  %v7845_v33 = vmul.f32 0.1, %v7805_v36  ;;  %v12866_v49 = vpop.f32.mrb[56].mxu1  ;;  %12890 = vmatprep.mubr.msk.f32.mxu0 %vm4440_vm8, %v16560_v57  ;;  %v16641_v56 = vsel %vm463_vm1, 0.0, %v7978_v55  ;;  %v7984_v31 = vrot.slane %v16521_v3, 7 }
 0x4d1   : > { %v7866_v20 = vsel %vm7826_vm15, %v7806_v60, %v7846_v28  ;;  %v7808_v63 = vadd.f32 %v12866_v49, %v16400_v4  ;;  %v7745_v11 = vpop.f32.mrb[57].mxu1  ;;  %12891 = vmatmul.mubr.msk.f32.gmra.mrb[44].mxu0 %vm4440_vm8, %v16567_v17  ;;  %v16649_v53 = vsel %vm463_vm1, %v7978_v55, %v7979_v12  ;;  %v8035_v12 = vrot.slane %v16527_v29, 1 }
 0x4d2   : > { %v7865_v46 = vsel %vm7825_vm4, %v7805_v36, %v7845_v33  ;;  %v7807_v26 = vadd.f32 %v16400_v4, %v7745_v11  ;;  %v16591_v35 = vsel %vm16570_vm6, %v7866_v20, 0.0  ;;  %v7985_v33 = vrot.slane %v16527_v29, 7 }
 0x4d3   : > { %vm7828_vm7 = vcmp.gt.f32.partialorder %v7808_v63, 0.0  ;;  %v7848_v62 = vmul.f32 0.1, %v7808_v63  ;;  %v16585_v50 = vsel %vm16570_vm6, %v7865_v46, 0.0  ;;  %v16679_v49 = vsel %vm463_vm1, 0.0, %v7984_v31 }
 0x4d4   : > { %vm7827_vm11 = vcmp.gt.f32.partialorder %v7807_v26, 0.0  ;;  %v7847_v22 = vmul.f32 0.1, %v7807_v26  ;;  %v12869_v30 = vpop.f32.mrb[58].mxu1  ;;  %12893 = vmatprep.mubr.msk.f32.mxu0 %vm4440_vm8, %v16585_v50  ;;  %v16685_v20 = vsel %vm463_vm1, %v7984_v31, %v7985_v33  ;;  %v16691_v11 = vsel %vm463_vm1, 0.0, %v7987_v9 }
 0x4d5   : > { %v7868_v51 = vsel %vm7828_vm7, %v7808_v63, %v7848_v62  ;;  %v7810_v13 = vadd.f32 %v12869_v30, %v16400_v4  ;;  %v7755_v52 = vpop.f32.mrb[59].mxu1  ;;  %12894 = vmatmul.mubr.msk.f32.gmra.mrb[46].mxu0 %vm4440_vm8, %v16591_v35  ;;  %v7988_v63 = vrot.slane %v16547_v48, 7  ;;  %v7990_v46 = vrot.slane %v16560_v57, 7 }
 0x4d6   : > { %v16602_v15 = vsel %vm16579_vm9, %v7868_v51, 0.0  ;;  %v7867_v21 = vsel %vm7827_vm11, %v7807_v26, %v7847_v22  ;;  %v7809_v45 = vadd.f32 %v16400_v4, %v7755_v52  ;;  %12898 = vmatprep.mubr.msk.f32.mxu0 %vm4440_vm8, %v8012_v41  ;;  %v7991_v62 = vrot.slane %v16567_v17, 7 }
 0x4d7   : > { %v16608_v39 = vsel %vm16579_vm9, %v7867_v21, 0.0  ;;  %vm7830_vm13 = vcmp.gt.f32.partialorder %v7810_v13, 0.0  ;;  %v7850_v6 = vmul.f32 0.1, %v7810_v13  ;;  %v16697_v26 = vsel %vm463_vm1, %v7987_v9, %v7988_v63 }
 0x4d8   : > { %vm7829_vm15 = vcmp.gt.f32.partialorder %v7809_v45, 0.0  ;;  %v7849_v42 = vmul.f32 0.1, %v7809_v45  ;;  %v16703_v16 = vsel %vm463_vm1, 0.0, %v7990_v46  ;;  %v7993_v22 = vrot.slane %v16585_v50, 7 }
 0x4d9   : > { %v7870_v4 = vsel %vm7830_vm13, %v7810_v13, %v7850_v6  ;;  %12899 = vmatmul.mubr.msk.f32.vlgmr.msra.gmra.mrb[32].mxu0 %vm4440_vm8, %v16476_v58  ;;  %v16635_v58 = vsel %vm463_vm1, %v7975_v1, %v7976_v10  ;;  %v16709_v30 = vsel %vm463_vm1, %v7990_v46, %v7991_v62  ;;  %v7994_v51 = vrot.slane %v16591_v35, 7 }
 0x4da   : > { %v16624_v40 = vsel %vm7911_vm14, %v7870_v4, 0.0  ;;  %v7869_v59 = vsel %vm7829_vm15, %v7809_v45, %v7849_v42  ;;  %12923 = vmatpush3.msk.msra.mxu0 %vm4473_vm3, %v16426_v61  ;;  %12901 = vmatprep.mubr.msk.f32.mxu0 %vm4440_vm8, %v16621_v19  ;;  %v7981_v61 = vrot.slane %v16501_v14, 7  ;;  %v16715_v13 = vsel %vm463_vm1, 0.0, %v7993_v22  ;;  %v10805_v45 = vld [vmem:[%s17213_s9 + $0x8] sm:$0x3] }
 0x4db   : > { %v16630_v43 = vsel %vm7911_vm14, %v7869_v59, 0.0  ;;  %12948 = vmatprep.subr.msk.mxu0 %vm4473_vm3, %v16616_v47  ;;  %v8000_v25 = vrot.slane %v16624_v40, 7  ;;  %v8050_v60 = vrot.slane %v16624_v40, 1  ;;  %v16720_v52 = vsel %vm463_vm1, %v7993_v22, %v7994_v51 }
 0x4dc   : > { %v7999_v37 = vrot.slane %v16630_v43, 7  ;;  %v8049_v2 = vrot.slane %v16630_v43, 1  ;;  %v16657_v54 = vsel %vm463_vm1, 0.0, %v7981_v61  ;;  %v16673_v27 = vsel %vm463_vm1, %v7981_v61, %v7982_v5 }
 0x4dd   : > { %12902 = vmatmul.mubr.msk.f32.gmra.mrb[34].mxu0 %vm4440_vm8, %v16635_v58  ;;  %v8025_v41 = vrot.slane %v16453_v24, 1  ;;  %v8026_v1 = vrot.slane %v16461_v32, 1  ;;  %v8062_v21 = vsel %vm514_vm2, %v8023_v0, 0.0  ;;  %v8028_v10 = vrot.slane %v16481_v7, 1 }
 0x4de   : > { %12904 = vmatprep.mubr.msk.f32.mxu0 %vm4440_vm8, %v16641_v56  ;;  %v16663_v36 = vsel %vm463_vm1, %v7999_v37, %v8000_v25  ;;  %v16670_v28 = vsel %vm514_vm2, %v8049_v2, %v8050_v60  ;;  %v8029_v42 = vrot.slane %v16487_v23, 1  ;;  %v8032_v4 = vrot.slane %v16507_v44, 1 }
 0x4df   : > { %v16736_v6 = vsel %vm514_vm2, %v8025_v41, %v8026_v1  ;;  %v16746_v8 = vsel %vm514_vm2, %v8026_v1, 0.0  ;;  %v8034_v59 = vrot.slane %v16521_v3, 1  ;;  %v8037_v5 = vrot.slane %v16541_v38, 1 }
 0x4e0   : > { %v16751_v0 = vsel %vm514_vm2, %v8028_v10, %v8029_v42  ;;  %v16770_v61 = vsel %vm514_vm2, %v8032_v4, 0.0  ;;  %v8038_v2 = vrot.slane %v16547_v48, 1  ;;  %v16782_v31 = vsel %vm514_vm2, %v8035_v12, 0.0  ;;  %v10823_v10 = vld [vmem:[%s17213_s9 + $0xa] sm:$0x3] }
 0x4e1   : > { %12905 = vmatmul.mubr.msk.f32.gmra.mrb[36].mxu0 %vm4440_vm8, %v16649_v53  ;;  %v16775_v25 = vsel %vm514_vm2, %v8034_v59, %v8035_v12  ;;  %v8040_v9 = vrot.slane %v16560_v57, 1  ;;  %v8041_v63 = vrot.slane %v16567_v17, 1  ;;  %v8043_v22 = vrot.slane %v16585_v50, 1  ;;  %v10877_v59 = vld [vmem:[%s17213_s9 + $0x10] sm:$0x3] }
 0x4e2   : > { %12907 = vmatprep.mubr.msk.f32.mxu0 %vm4440_vm8, %v16657_v54  ;;  %v16787_v33 = vsel %vm514_vm2, %v8037_v5, %v8038_v2  ;;  %v16794_v46 = vsel %vm514_vm2, %v8038_v2, 0.0  ;;  %v8044_v51 = vrot.slane %v16591_v35, 1 }
 0x4e3   : > { %v16799_v62 = vsel %vm514_vm2, %v8040_v9, %v8041_v63  ;;  %v16806_v41 = vsel %vm514_vm2, %v8041_v63, 0.0 }
 0x4e4   : > { %v16811_v1 = vsel %vm514_vm2, %v8043_v22, %v8044_v51 }
 0x4e5   : > { %12908 = vmatmul.mubr.msk.f32.gmra.mrb[38].mxu0 %vm4440_vm8, %v16673_v27 }
 0x4e6   : > { %12910 = vmatprep.mubr.msk.f32.mxu0 %vm4440_vm8, %v16679_v49 }
 0x4e9   : > { %12911 = vmatmul.mubr.msk.f32.gmra.mrb[40].mxu0 %vm4440_vm8, %v16685_v20 }
 0x4ea   : > { %12913 = vmatprep.mubr.msk.f32.mxu0 %vm4440_vm8, %v16691_v11 }
 0x4ed   : > { %12914 = vmatmul.mubr.msk.f32.gmra.mrb[42].mxu0 %vm4440_vm8, %v16697_v26  ;;  %v9719_v12 = vpop.permute.xlu1 %9718 }
 0x4ee   : > { %12916 = vmatprep.mubr.msk.f32.mxu0 %vm4440_vm8, %v16703_v16 }
 0x4f1   : > { %12917 = vmatmul.mubr.msk.f32.gmra.mrb[44].mxu0 %vm4440_vm8, %v16709_v30 }
 0x4f2   : > { %12919 = vmatprep.mubr.msk.f32.mxu0 %vm4440_vm8, %v16715_v13 }
 0x4f5   : > { %12920 = vmatmul.mubr.msk.f32.gmra.mrb[46].mxu0 %vm4440_vm8, %v16720_v52 }
 0x4f6   : > { %12924 = vmatprep.mubr.msk.f32.mxu0 %vm4440_vm8, %v16449_v34  ;;  %v8031_v34 = vrot.slane %v16501_v14, 1 }
 0x4f8   : > { %v16763_v55 = vsel %vm514_vm2, %v8031_v34, %v8032_v4  ;;  %v10841_v34 = vld [vmem:[%s17213_s9 + $0xc] sm:$0x3] }
 0x4f9   : > { %12925 = vmatmul.mubr.msk.f32.vlgmr.msra.gmra.mrb[32].mxu0 %vm4440_vm8, %v8062_v21  ;;  %v16816_v21 = vsel %vm514_vm2, %v8044_v51, 0.0 }
 0x4fa   : > { %12949 = vmatpush3.msk.msra.mxu0 %vm4473_vm3, %v16616_v47  ;;  %12927 = vmatprep.mubr.msk.f32.mxu0 %vm4440_vm8, %v16736_v6  ;;  %v16758_v47 = vsel %vm514_vm2, %v8029_v42, 0.0 }
 0x4fb   : > { %12974 = vmatprep.subr.msk.mxu0 %vm4473_vm3, %v10805_v45 }
 0x4fd   : > { %12928 = vmatmul.mubr.msk.f32.gmra.mrb[34].mxu0 %vm4440_vm8, %v16746_v8 }
 0x4fe   : > { %12930 = vmatprep.mubr.msk.f32.mxu0 %vm4440_vm8, %v16751_v0 }
 0x501   : > { %12931 = vmatmul.mubr.msk.f32.gmra.mrb[36].mxu0 %vm4440_vm8, %v16758_v47 }
 0x502   : > { %12933 = vmatprep.mubr.msk.f32.mxu0 %vm4440_vm8, %v16763_v55 }
 0x505   : > { %12934 = vmatmul.mubr.msk.f32.gmra.mrb[38].mxu0 %vm4440_vm8, %v16770_v61 }
 0x506   : > { %12936 = vmatprep.mubr.msk.f32.mxu0 %vm4440_vm8, %v16775_v25 }
 0x509   : > { %12937 = vmatmul.mubr.msk.f32.gmra.mrb[40].mxu0 %vm4440_vm8, %v16782_v31 }
 0x50a   : > { %12939 = vmatprep.mubr.msk.f32.mxu0 %vm4440_vm8, %v16787_v33 }
 0x50d   : > { %12940 = vmatmul.mubr.msk.f32.gmra.mrb[42].mxu0 %vm4440_vm8, %v16794_v46 }
 0x50e   : > { %12942 = vmatprep.mubr.msk.f32.mxu0 %vm4440_vm8, %v16799_v62 }
 0x511   : > { %12943 = vmatmul.mubr.msk.f32.gmra.mrb[44].mxu0 %vm4440_vm8, %v16806_v41 }
 0x512   : > { %12945 = vmatprep.mubr.msk.f32.mxu0 %vm4440_vm8, %v16811_v1 }
 0x515   : > { %12946 = vmatmul.mubr.msk.f32.gmra.mrb[46].mxu0 %vm4440_vm8, %v16816_v21 }
 0x516   : > { %12950 = vmatprep.mubr.msk.f32.mxu0 %vm4440_vm8, %v16621_v19  ;;  %v7996_v19 = vrot.slane %v16608_v39, 7 }
 0x519   : > { %12951 = vmatmul.mubr.msk.f32.vlgmr.msra.gmra.mrb[32].mxu0 %vm4440_vm8, %v16635_v58  ;;  %v7997_v58 = vrot.slane %v16602_v15, 7 }
 0x51a   : > { %12975 = vmatpush3.msk.msra.mxu0 %vm4473_vm3, %v10805_v45  ;;  %12953 = vmatprep.mubr.msk.f32.mxu0 %vm4440_vm8, %v16641_v56  ;;  %v8020_v45 = vsel %vm463_vm1, 0.0, %v7996_v19 }
 0x51b   : > { %13000 = vmatprep.subr.msk.mxu0 %vm4473_vm3, %v10823_v10  ;;  %v7998_v42 = vsel %vm463_vm1, %v7996_v19, %v7997_v58  ;;  %v17348_v58 = vld [vmem:[#allocation4_spill] sm:$0xff] }
 0x51d   : > { %12954 = vmatmul.mubr.msk.f32.gmra.mrb[34].mxu0 %vm4440_vm8, %v16649_v53 }
 0x51e   : > { %12956 = vmatprep.mubr.msk.f32.mxu0 %vm4440_vm8, %v16657_v54 }
 0x521   : > { %12957 = vmatmul.mubr.msk.f32.gmra.mrb[36].mxu0 %vm4440_vm8, %v16673_v27 }
 0x522   : > { %12959 = vmatprep.mubr.msk.f32.mxu0 %vm4440_vm8, %v16679_v49 }
 0x525   : > { %12960 = vmatmul.mubr.msk.f32.gmra.mrb[38].mxu0 %vm4440_vm8, %v16685_v20 }
 0x526   : > { %12962 = vmatprep.mubr.msk.f32.mxu0 %vm4440_vm8, %v16691_v11 }
 0x529   : > { %12963 = vmatmul.mubr.msk.f32.gmra.mrb[40].mxu0 %vm4440_vm8, %v16697_v26 }
 0x52a   : > { %12965 = vmatprep.mubr.msk.f32.mxu0 %vm4440_vm8, %v16703_v16 }
 0x52d   : > { %12966 = vmatmul.mubr.msk.f32.gmra.mrb[42].mxu0 %vm4440_vm8, %v16709_v30 }
 0x52e   : > { %12968 = vmatprep.mubr.msk.f32.mxu0 %vm4440_vm8, %v16715_v13 }
 0x531   : > { %12969 = vmatmul.mubr.msk.f32.gmra.mrb[44].mxu0 %vm4440_vm8, %v16720_v52 }
 0x532   : > { %12971 = vmatprep.mubr.msk.f32.mxu0 %vm4440_vm8, %v8020_v45 }
 0x535   : > { %12972 = vmatmul.mubr.msk.f32.gmra.mrb[46].mxu0 %vm4440_vm8, %v7998_v42 }
 0x536   : > { %12976 = vmatprep.mubr.msk.f32.mxu0 %vm4440_vm8, %v16453_v24  ;;  %v10859_v24 = vld [vmem:[%s17213_s9 + $0xe] sm:$0x3] }
 0x539   : > { %12977 = vmatmul.mubr.msk.f32.vlgmr.msra.gmra.mrb[32].mxu0 %vm4440_vm8, %v16461_v32  ;;  %v8046_v32 = vrot.slane %v16608_v39, 1 }
 0x53a   : > { %13001 = vmatpush3.msk.msra.mxu0 %vm4473_vm3, %v10823_v10  ;;  %12979 = vmatprep.mubr.msk.f32.mxu0 %vm4440_vm8, %v16481_v7 }
 0x53b   : > { %13026 = vmatprep.subr.msk.mxu0 %vm4473_vm3, %v10841_v34 }
 0x53d   : > { %12980 = vmatmul.mubr.msk.f32.gmra.mrb[34].mxu0 %vm4440_vm8, %v16487_v23 }
 0x53e   : > { %12982 = vmatprep.mubr.msk.f32.mxu0 %vm4440_vm8, %v16501_v14 }
 0x541   : > { %12983 = vmatmul.mubr.msk.f32.gmra.mrb[36].mxu0 %vm4440_vm8, %v16507_v44 }
 0x542   : > { %12985 = vmatprep.mubr.msk.f32.mxu0 %vm4440_vm8, %v16521_v3 }
 0x545   : > { %12986 = vmatmul.mubr.msk.f32.gmra.mrb[38].mxu0 %vm4440_vm8, %v16527_v29 }
 0x546   : > { %12988 = vmatprep.mubr.msk.f32.mxu0 %vm4440_vm8, %v16541_v38 }
 0x549   : > { %12989 = vmatmul.mubr.msk.f32.gmra.mrb[40].mxu0 %vm4440_vm8, %v16547_v48 }
 0x54a   : > { %12991 = vmatprep.mubr.msk.f32.mxu0 %vm4440_vm8, %v16560_v57 }
 0x54d   : > { %12992 = vmatmul.mubr.msk.f32.gmra.mrb[42].mxu0 %vm4440_vm8, %v16567_v17 }
 0x54e   : > { %12994 = vmatprep.mubr.msk.f32.mxu0 %vm4440_vm8, %v16585_v50 }
 0x551   : > { %12995 = vmatmul.mubr.msk.f32.gmra.mrb[44].mxu0 %vm4440_vm8, %v16591_v35 }
 0x552   : > { %12997 = vmatprep.mubr.msk.f32.mxu0 %vm4440_vm8, %v16608_v39 }
 0x555   : > { %12998 = vmatmul.mubr.msk.f32.gmra.mrb[46].mxu0 %vm4440_vm8, %v16602_v15 }
 0x556   : > { %13002 = vmatprep.mubr.msk.f32.mxu0 %vm4440_vm8, %v16736_v6  ;;  %v8047_v6 = vrot.slane %v16602_v15, 1 }
 0x558   : > { %v8070_v4 = vsel %vm514_vm2, %v8047_v6, 0.0 }
 0x559   : > { %13003 = vmatmul.mubr.msk.f32.vlgmr.msra.gmra.mrb[32].mxu0 %vm4440_vm8, %v16746_v8  ;;  %v8048_v8 = vsel %vm514_vm2, %v8046_v32, %v8047_v6  ;;  %v17349_v6 = vld [vmem:[#allocation6_spill] sm:$0xff] }
 0x55a   : > { %13027 = vmatpush3.msk.msra.mxu0 %vm4473_vm3, %v10841_v34  ;;  %13005 = vmatprep.mubr.msk.f32.mxu0 %vm4440_vm8, %v16751_v0 }
 0x55b   : > { %13052 = vmatprep.subr.msk.mxu0 %vm4473_vm3, %v10859_v24 }
 0x55d   : > { %13006 = vmatmul.mubr.msk.f32.gmra.mrb[34].mxu0 %vm4440_vm8, %v16758_v47 }
 0x55e   : > { %13008 = vmatprep.mubr.msk.f32.mxu0 %vm4440_vm8, %v16763_v55 }
 0x561   : > { %13009 = vmatmul.mubr.msk.f32.gmra.mrb[36].mxu0 %vm4440_vm8, %v16770_v61 }
 0x562   : > { %13011 = vmatprep.mubr.msk.f32.mxu0 %vm4440_vm8, %v16775_v25 }
 0x565   : > { %13012 = vmatmul.mubr.msk.f32.gmra.mrb[38].mxu0 %vm4440_vm8, %v16782_v31 }
 0x566   : > { %13014 = vmatprep.mubr.msk.f32.mxu0 %vm4440_vm8, %v16787_v33 }
 0x569   : > { %13015 = vmatmul.mubr.msk.f32.gmra.mrb[40].mxu0 %vm4440_vm8, %v16794_v46 }
 0x56a   : > { %13017 = vmatprep.mubr.msk.f32.mxu0 %vm4440_vm8, %v16799_v62 }
 0x56d   : > { %13018 = vmatmul.mubr.msk.f32.gmra.mrb[42].mxu0 %vm4440_vm8, %v16806_v41 }
 0x56e   : > { %13020 = vmatprep.mubr.msk.f32.mxu0 %vm4440_vm8, %v16811_v1 }
 0x571   : > { %13021 = vmatmul.mubr.msk.f32.gmra.mrb[44].mxu0 %vm4440_vm8, %v16816_v21 }
 0x572   : > { %13023 = vmatprep.mubr.msk.f32.mxu0 %vm4440_vm8, %v8048_v8 }
 0x575   : > { %13024 = vmatmul.mubr.msk.f32.gmra.mrb[46].mxu0 %vm4440_vm8, %v8070_v4 }
 0x576   : > { %13028 = vmatprep.mubr.msk.f32.mxu0 %vm4440_vm8, %v16641_v56  ;;  %v8021_v56 = vsel %vm463_vm1, 0.0, %v7999_v37  ;;  %vm9824_vm1 = vcmask 31744  }
 0x579   : > { %13029 = vmatmul.mubr.msk.f32.vlgmr.msra.gmra.mrb[32].mxu0 %vm4440_vm8, %v16649_v53 }
 0x57a   : > { %13053 = vmatpush3.msk.msra.mxu0 %vm4473_vm3, %v10859_v24  ;;  %13031 = vmatprep.mubr.msk.f32.mxu0 %vm4440_vm8, %v16657_v54 }
 0x57b   : > { %13078 = vmatprep.subr.msk.mxu0 %vm4473_vm3, %v10877_v59 }
 0x57d   : > { %13032 = vmatmul.mubr.msk.f32.gmra.mrb[34].mxu0 %vm4440_vm8, %v16673_v27 }
 0x57e   : > { %13034 = vmatprep.mubr.msk.f32.mxu0 %vm4440_vm8, %v16679_v49 }
 0x581   : > { %13035 = vmatmul.mubr.msk.f32.gmra.mrb[36].mxu0 %vm4440_vm8, %v16685_v20 }
 0x582   : > { %13037 = vmatprep.mubr.msk.f32.mxu0 %vm4440_vm8, %v16691_v11 }
 0x585   : > { %13038 = vmatmul.mubr.msk.f32.gmra.mrb[38].mxu0 %vm4440_vm8, %v16697_v26 }
 0x586   : > { %13040 = vmatprep.mubr.msk.f32.mxu0 %vm4440_vm8, %v16703_v16 }
 0x589   : > { %13041 = vmatmul.mubr.msk.f32.gmra.mrb[40].mxu0 %vm4440_vm8, %v16709_v30 }
 0x58a   : > { %13043 = vmatprep.mubr.msk.f32.mxu0 %vm4440_vm8, %v16715_v13 }
 0x58d   : > { %13044 = vmatmul.mubr.msk.f32.gmra.mrb[42].mxu0 %vm4440_vm8, %v16720_v52 }
 0x58e   : > { %13046 = vmatprep.mubr.msk.f32.mxu0 %vm4440_vm8, %v8020_v45 }
 0x591   : > { %13047 = vmatmul.mubr.msk.f32.gmra.mrb[44].mxu0 %vm4440_vm8, %v7998_v42 }
 0x592   : > { %13049 = vmatprep.mubr.msk.f32.mxu0 %vm4440_vm8, %v8021_v56  ;;  %v17350_v56 = vld [vmem:[#allocation7_spill] sm:$0xff] }
 0x595   : > { %13050 = vmatmul.mubr.msk.f32.gmra.mrb[46].mxu0 %vm4440_vm8, %v16663_v36 }
 0x596   : > { %13054 = vmatprep.mubr.msk.f32.mxu0 %vm4440_vm8, %v16481_v7  ;;  %v8071_v7 = vsel %vm514_vm2, %v8050_v60, 0.0  ;;  %vm9841_vm2 = vcmask 48128  }
 0x599   : > { %13055 = vmatmul.mubr.msk.f32.vlgmr.msra.gmra.mrb[32].mxu0 %vm4440_vm8, %v16487_v23  ;;  %v10895_v23 = vld [vmem:[%s17214_s10] ss:$0 sm:$0xff] }
 0x59a   : > { %13079 = vmatpush3.msk.msra.mxu0 %vm4473_vm3, %v10877_v59  ;;  %13057 = vmatprep.mubr.msk.f32.mxu0 %vm4440_vm8, %v16501_v14 }
 0x59d   : > { %13058 = vmatmul.mubr.msk.f32.gmra.mrb[34].mxu0 %vm4440_vm8, %v16507_v44 }
 0x59e   : > { %13060 = vmatprep.mubr.msk.f32.mxu0 %vm4440_vm8, %v16521_v3 }
 0x5a1   : > { %13061 = vmatmul.mubr.msk.f32.gmra.mrb[36].mxu0 %vm4440_vm8, %v16527_v29 }
 0x5a2   : > { %13063 = vmatprep.mubr.msk.f32.mxu0 %vm4440_vm8, %v16541_v38 }
 0x5a5   : > { %13064 = vmatmul.mubr.msk.f32.gmra.mrb[38].mxu0 %vm4440_vm8, %v16547_v48 }
 0x5a6   : > { %13066 = vmatprep.mubr.msk.f32.mxu0 %vm4440_vm8, %v16560_v57 }
 0x5a9   : > { %13067 = vmatmul.mubr.msk.f32.gmra.mrb[40].mxu0 %vm4440_vm8, %v16567_v17 }
 0x5aa   : > { %13069 = vmatprep.mubr.msk.f32.mxu0 %vm4440_vm8, %v16585_v50 }
 0x5ad   : > { %13070 = vmatmul.mubr.msk.f32.gmra.mrb[42].mxu0 %vm4440_vm8, %v16591_v35 }
 0x5ae   : > { %13072 = vmatprep.mubr.msk.f32.mxu0 %vm4440_vm8, %v16608_v39 }
 0x5b1   : > { %13073 = vmatmul.mubr.msk.f32.gmra.mrb[44].mxu0 %vm4440_vm8, %v16602_v15 }
 0x5b2   : > { %13075 = vmatprep.mubr.msk.f32.mxu0 %vm4440_vm8, %v16630_v43 }
 0x5b5   : > { %13076 = vmatmul.mubr.msk.f32.gmra.mrb[46].mxu0 %vm4440_vm8, %v16624_v40 }
 0x5b6   : > { %13080 = vmatprep.mubr.msk.f32.mxu0 %vm4440_vm8, %v16751_v0 }
 0x5b9   : > { %13081 = vmatmul.mubr.msk.f32.vlgmr.msra.gmra.mrb[32].mxu0 %vm4440_vm8, %v16758_v47 }
 0x5ba   : > { %13083 = vmatprep.mubr.msk.f32.mxu0 %vm4440_vm8, %v16763_v55 }
 0x5bd   : > { %13084 = vmatmul.mubr.msk.f32.gmra.mrb[34].mxu0 %vm4440_vm8, %v16770_v61  ;;  %v9715_v61 = vpop.permute.xlu0 %9714 }
 0x5be   : > { %13086 = vmatprep.mubr.msk.f32.mxu0 %vm4440_vm8, %v16775_v25  ;;  %v9717_v25 = vpop.permute.xlu1 %9716 }
 0x5c1   : > { %13087 = vmatmul.mubr.msk.f32.gmra.mrb[36].mxu0 %vm4440_vm8, %v16782_v31  ;;  %v9713_v5 = vpop.permute.xlu0 %9712 }
 0x5c2   : > { %13089 = vmatprep.mubr.msk.f32.mxu0 %vm4440_vm8, %v16787_v33  ;;  %v9723_v2 = vpop.permute.xlu1 %9722 }
 0x5c5   : > { %13090 = vmatmul.mubr.msk.f32.gmra.mrb[38].mxu0 %vm4440_vm8, %v16794_v46  ;;  %v9721_v31 = vpop.permute.xlu0 %9720 }
 0x5c6   : > { %13092 = vmatprep.mubr.msk.f32.mxu0 %vm4440_vm8, %v16799_v62  ;;  %v9727_v33 = vpop.permute.xlu1 %9726 }
 0x5c9   : > { %13093 = vmatmul.mubr.msk.f32.gmra.mrb[40].mxu0 %vm4440_vm8, %v16806_v41  ;;  %v9725_v9 = vpop.permute.xlu0 %9724 }
 0x5ca   : > { %13095 = vmatprep.mubr.msk.f32.mxu0 %vm4440_vm8, %v16811_v1  ;;  %v17056_v63 = vpop.permute.xlu1 %9730  ;;  %v17074_v1 = vld [vmem:[%s17206_s2] ss:$0 sm:$0xff] }
 0x5cb   : > { %v2148_v19 = vadd.f32 %v15127_v18, %v17074_v1  ;;  %v2147_v45 = vadd.f32 %v17348_v58, %v17074_v1  ;;  %v17357_v58 = vld [vmem:[#allocation10_spill] sm:$0xff] }
 0x5cd   : > { %13096 = vmatmul.mubr.msk.f32.gmra.mrb[42].mxu0 %vm4440_vm8, %v16816_v21  ;;  %v17058_v46 = vpop.permute.xlu0 %9728  ;;  %v9826_v42 = vsel %vm9824_vm1, %v2148_v19, %v9715_v61  ;;  %v9825_v24 = vsel %vm9824_vm1, %v2147_v45, %v9713_v5  ;;  %v17356_v61 = vld [vmem:[#allocation9_spill] sm:$0xff]  ;;  %v2158_v45 = vadd.f32 %v17357_v58, %v17074_v1 }
 0x5ce   : > { %13098 = vmatprep.mubr.msk.f32.mxu0 %vm4440_vm8, %v8048_v8  ;;  %v17061_v62 = vpop.permute.xlu1 %9734  ;;  %v2150_v8 = vadd.f32 %v17349_v6, %v17074_v1 }
 0x5d1   : > { %13099 = vmatmul.mubr.msk.f32.gmra.mrb[44].mxu0 %vm4440_vm8, %v8070_v4  ;;  %v17063_v22 = vpop.permute.xlu0 %9732 }
 0x5d2   : > { %13101 = vmatprep.mubr.msk.f32.mxu0 %vm4440_vm8, %v16670_v28  ;;  %v17066_v51 = vpop.permute.xlu1 %9738 }
 0x5d5   : > { %13102 = vmatmul.mubr.msk.f32.gmra.mrb[46].mxu0 %vm4440_vm8, %v8071_v7  ;;  %v17068_v41 = vpop.permute.xlu0 %9736  ;;  %v2149_v7 = vadd.f32 %v17350_v56, %v17074_v1 }
 0x5d6   : > { %v17076_v21 = vpop.permute.xlu1 %9742 }
 0x5d9   : > { %v17078_v10 = vpop.permute.xlu0 %9740 }
 0x68c   : > { %v13082_v14 = vpop.f32.mrb[32].mxu0 }
 0x68d   : > { %v9681_v44 = vadd.f32 %v13082_v14, %v10895_v23  ;;  %v9578_v3 = vpop.f32.mrb[33].mxu0  ;;  %v9828_v14 = vsel %vm9824_vm1, %v2150_v8, %v9719_v12 }
 0x68e   : > { %v9680_v29 = vadd.f32 %v10895_v23, %v9578_v3  ;;  %v9827_v3 = vsel %vm9824_vm1, %v2149_v7, %v9717_v25  ;;  %v2155_v25 = vadd.f32 %v17356_v61, %v17074_v1 }
 0x68f   : > { %9778 = vrot.lane.b32.xlu1 %v9681_v44, %s13930_s25 }
 0x690   : > { %9776 = vrot.lane.b32.xlu0 %v9680_v29, %s13930_s25  ;;  %v13085_v38 = vpop.f32.mrb[34].mxu0 }
 0x691   : > { %v9683_v48 = vadd.f32 %v13085_v38, %v10895_v23  ;;  %v9588_v57 = vpop.f32.mrb[35].mxu0 }
 0x692   : > { %v9682_v17 = vadd.f32 %v10895_v23, %v9588_v57 }
 0x693   : > { %9782 = vrot.lane.b32.xlu1 %v9683_v48, %s13930_s25  ;;  %v17351_v48 = vld [vmem:[#allocation8_spill] sm:$0xff] }
 0x694   : > { %9780 = vrot.lane.b32.xlu0 %v9682_v17, %s13930_s25  ;;  %v13088_v50 = vpop.f32.mrb[36].mxu0  ;;  %v2152_v57 = vadd.f32 %v17351_v48, %v17074_v1 }
 0x695   : > { %v9685_v35 = vadd.f32 %v13088_v50, %v10895_v23  ;;  %v9598_v15 = vpop.f32.mrb[37].mxu0 }
 0x696   : > { %v9684_v39 = vadd.f32 %v10895_v23, %v9598_v15 }
 0x697   : > { %9786 = vrot.lane.b32.xlu1 %v9685_v35, %s13930_s25  ;;  %v17352_v35 = vld [vmem:[#allocation5_spill] sm:$0xff] }
 0x698   : > { %9784 = vrot.lane.b32.xlu0 %v9684_v39, %s13930_s25  ;;  %v13091_v40 = vpop.f32.mrb[38].mxu0  ;;  %v2151_v15 = vadd.f32 %v17352_v35, %v17074_v1  ;;  %v17362_v35 = vld [vmem:[#allocation18_spill] sm:$0xff] }
 0x699   : > { %v9687_v43 = vadd.f32 %v13091_v40, %v10895_v23  ;;  %v9608_v37 = vpop.f32.mrb[39].mxu0  ;;  %v9830_v40 = vsel %vm9824_vm1, %v2152_v57, %v9723_v2  ;;  %v17361_v57 = vld [vmem:[#allocation17_spill] sm:$0xff] }
 0x69a   : > { %v9686_v53 = vadd.f32 %v10895_v23, %v9608_v37  ;;  %v9829_v37 = vsel %vm9824_vm1, %v2151_v15, %v9721_v31  ;;  %v2161_v15 = vadd.f32 %v17362_v35, %v17074_v1 }
 0x69b   : > { %9790 = vrot.lane.b32.xlu1 %v9687_v43, %s13930_s25 }
 0x69c   : > { %9788 = vrot.lane.b32.xlu0 %v9686_v53, %s13930_s25  ;;  %v13094_v60 = vpop.f32.mrb[40].mxu0 }
 0x69d   : > { %v9689_v54 = vadd.f32 %v13094_v60, %v10895_v23  ;;  %v9618_v36 = vpop.f32.mrb[41].mxu0 }
 0x69e   : > { %v9688_v28 = vadd.f32 %v10895_v23, %v9618_v36 }
 0x69f   : > { %9794 = vrot.lane.b32.xlu1 %v9689_v54, %s13930_s25  ;;  %v17353_v54 = vld [vmem:[#allocation12_spill] sm:$0xff] }
 0x6a0   : > { %9792 = vrot.lane.b32.xlu0 %v9688_v28, %s13930_s25  ;;  %v13097_v27 = vpop.f32.mrb[42].mxu0  ;;  %v2154_v36 = vadd.f32 %v17353_v54, %v17074_v1 }
 0x6a1   : > { %v9691_v49 = vadd.f32 %v13097_v27, %v10895_v23  ;;  %v9628_v20 = vpop.f32.mrb[43].mxu0 }
 0x6a2   : > { %v9690_v11 = vadd.f32 %v10895_v23, %v9628_v20 }
 0x6a3   : > { %9798 = vrot.lane.b32.xlu1 %v9691_v49, %s13930_s25  ;;  %v17354_v49 = vld [vmem:[#allocation13_spill] sm:$0xff] }
 0x6a4   : > { %9796 = vrot.lane.b32.xlu0 %v9690_v11, %s13930_s25  ;;  %v13100_v26 = vpop.f32.mrb[44].mxu0  ;;  %v2153_v20 = vadd.f32 %v17354_v49, %v17074_v1 }
 0x6a5   : > { %v9693_v16 = vadd.f32 %v13100_v26, %v10895_v23  ;;  %v9638_v30 = vpop.f32.mrb[45].mxu0  ;;  %v9832_v26 = vsel %vm9824_vm1, %v2154_v36, %v9727_v33  ;;  %v9833_v33 = vsel %vm9824_vm1, %v2155_v25, %v17058_v46 }
 0x6a6   : > { %v9692_v13 = vadd.f32 %v10895_v23, %v9638_v30  ;;  %v9831_v30 = vsel %vm9824_vm1, %v2153_v20, %v9725_v9 }
 0x6a7   : > { %9802 = vrot.lane.b32.xlu1 %v9693_v16, %s13930_s25 }
 0x6a8   : > { %9800 = vrot.lane.b32.xlu0 %v9692_v13, %s13930_s25  ;;  %v13103_v52 = vpop.f32.mrb[46].mxu0 }
 0x6a9   : > { %v9695_v0 = vadd.f32 %v13103_v52, %v10895_v23  ;;  %v9648_v47 = vpop.f32.mrb[47].mxu0 }
 0x6aa   : > { %v9694_v55 = vadd.f32 %v10895_v23, %v9648_v47 }
 0x6ab   : > { %9806 = vrot.lane.b32.xlu1 %v9695_v0, %s13930_s25  ;;  %v17355_v0 = vld [vmem:[#allocation14_spill] sm:$0xff] }
 0x6ac   : > { %9804 = vrot.lane.b32.xlu0 %v9694_v55, %s13930_s25  ;;  %v2156_v47 = vadd.f32 %v17355_v0, %v17074_v1 }
 0x6ae   : > { %v9834_v2 = vsel %vm9824_vm1, %v2156_v47, %v17056_v63  ;;  %v17358_v63 = vld [vmem:[#allocation11_spill] sm:$0xff] }
 0x701   : > { %v9779_v34 = vpop.permute.xlu1 %9778 }
 0x702   : > { %v9843_v32 = vsel %vm9841_vm2, %v9826_v42, %v9779_v34  ;;  %v9777_v18 = vpop.permute.xlu0 %9776 }
 0x703   : > { %v9859_v4 = vmax.f32 %v9843_v32, 0.0  ;;  %v9842_v59 = vsel %vm9841_vm2, %v9825_v24, %v9777_v18  ;;  %v2157_v24 = vadd.f32 %v17358_v63, %v17074_v1  ;;  %v9836_v18 = vsel %vm9824_vm1, %v2158_v45, %v17061_v62  ;;  %v17360_v62 = vld [vmem:[#allocation16_spill] sm:$0xff] }
 0x704   : > { %v9858_v23 = vmax.f32 %v9842_v59, 0.0  ;;  %v17359_v59 = vld [vmem:[#allocation15_spill] sm:$0xff] }
 0x705   : > { %9875 = vst.msk [vmem:[%s17088_s13 + $0x8] sm:$0xff] %vm568_vm0, %v9859_v4  ;;  %v9783_v44 = vpop.permute.xlu1 %9782  ;;  %v9835_v6 = vsel %vm9824_vm1, %v2157_v24, %v17063_v22  ;;  %v2160_v56 = vadd.f32 %v17359_v59, %v17074_v1 }
 0x706   : > { %9874 = vst.msk [vmem:[%s17088_s13] sm:$0xff] %vm568_vm0, %v9858_v23  ;;  %v9845_v29 = vsel %vm9841_vm2, %v9828_v14, %v9783_v44  ;;  %v9781_v38 = vpop.permute.xlu0 %9780  ;;  %v2159_v14 = vadd.f32 %v17360_v62, %v17074_v1 }
 0x707   : > { %v9861_v17 = vmax.f32 %v9845_v29, 0.0  ;;  %v9844_v50 = vsel %vm9841_vm2, %v9827_v3, %v9781_v38  ;;  %v9838_v3 = vsel %vm9824_vm1, %v2160_v56, %v17066_v51 }
 0x708   : > { %v9860_v39 = vmax.f32 %v9844_v50, 0.0  ;;  %v9837_v29 = vsel %vm9824_vm1, %v2159_v14, %v17068_v41 }
 0x709   : > { %9877 = vst.msk [vmem:[%s17088_s13 + $0x18] sm:$0xff] %vm568_vm0, %v9861_v17  ;;  %v9787_v43 = vpop.permute.xlu1 %9786  ;;  %v2162_v17 = vadd.f32 %v17361_v57, %v17074_v1 }
 0x70a   : > { %9876 = vst.msk [vmem:[%s17088_s13 + $0x10] sm:$0xff] %vm568_vm0, %v9860_v39  ;;  %v9847_v53 = vsel %vm9841_vm2, %v9830_v40, %v9787_v43  ;;  %v9785_v60 = vpop.permute.xlu0 %9784  ;;  %v9839_v43 = vsel %vm9824_vm1, %v2161_v15, %v17078_v10 }
 0x70b   : > { %v9863_v28 = vmax.f32 %v9847_v53, 0.0  ;;  %v9846_v27 = vsel %vm9841_vm2, %v9829_v37, %v9785_v60  ;;  %v9840_v41 = vsel %vm9824_vm1, %v2162_v17, %v17076_v21 }
 0x70c   : > { %v9862_v11 = vmax.f32 %v9846_v27, 0.0 }
 0x70d   : > { %9879 = vst.msk [vmem:[%s17088_s13 + $0x28] sm:$0xff] %vm568_vm0, %v9863_v28  ;;  %v9791_v16 = vpop.permute.xlu1 %9790 }
 0x70e   : > { %9878 = vst.msk [vmem:[%s17088_s13 + $0x20] sm:$0xff] %vm568_vm0, %v9862_v11  ;;  %v9849_v13 = vsel %vm9841_vm2, %v9832_v26, %v9791_v16  ;;  %v9789_v52 = vpop.permute.xlu0 %9788 }
 0x70f   : > { %v9865_v55 = vmax.f32 %v9849_v13, 0.0  ;;  %v9848_v12 = vsel %vm9841_vm2, %v9831_v30, %v9789_v52 }
 0x710   : > { %v9864_v5 = vmax.f32 %v9848_v12, 0.0 }
 0x711   : > { %9881 = vst.msk [vmem:[%s17088_s13 + $0x38] sm:$0xff] %vm568_vm0, %v9865_v55  ;;  %v9795_v31 = vpop.permute.xlu1 %9794 }
 0x712   : > { %9880 = vst.msk [vmem:[%s17088_s13 + $0x30] sm:$0xff] %vm568_vm0, %v9864_v5  ;;  %v9851_v9 = vsel %vm9841_vm2, %v9834_v2, %v9795_v31  ;;  %v9793_v19 = vpop.permute.xlu0 %9792 }
 0x713   : > { %v9867_v42 = vmax.f32 %v9851_v9, 0.0  ;;  %v9850_v34 = vsel %vm9841_vm2, %v9833_v33, %v9793_v19 }
 0x714   : > { %v9866_v32 = vmax.f32 %v9850_v34, 0.0 }
 0x715   : > { %9883 = vst.msk [vmem:[%s17088_s13 + $0x48] sm:$0xff] %vm568_vm0, %v9867_v42  ;;  %v9799_v46 = vpop.permute.xlu1 %9798 }
 0x716   : > { %9882 = vst.msk [vmem:[%s17088_s13 + $0x40] sm:$0xff] %vm568_vm0, %v9866_v32  ;;  %v9853_v8 = vsel %vm9841_vm2, %v9836_v18, %v9799_v46  ;;  %v9797_v4 = vpop.permute.xlu0 %9796 }
 0x717   : > { %v9869_v7 = vmax.f32 %v9853_v8, 0.0  ;;  %v9852_v23 = vsel %vm9841_vm2, %v9835_v6, %v9797_v4 }
 0x718   : > { %v9868_v44 = vmax.f32 %v9852_v23, 0.0 }
 0x719   : > { %9885 = vst.msk [vmem:[%s17088_s13 + $0x58] sm:$0xff] %vm568_vm0, %v9869_v7  ;;  %v9803_v22 = vpop.permute.xlu1 %9802 }
 0x71a   : > { %9884 = vst.msk [vmem:[%s17088_s13 + $0x50] sm:$0xff] %vm568_vm0, %v9868_v44  ;;  %v9855_v38 = vsel %vm9841_vm2, %v9838_v3, %v9803_v22  ;;  %v9801_v48 = vpop.permute.xlu0 %9800 }
 0x71b   : > { %v9871_v50 = vmax.f32 %v9855_v38, 0.0  ;;  %v9854_v51 = vsel %vm9841_vm2, %v9837_v29, %v9801_v48 }
 0x71c   : > { %v9870_v39 = vmax.f32 %v9854_v51, 0.0 }
 0x71d   : > { %9887 = vst.msk [vmem:[%s17088_s13 + $0x68] sm:$0xff] %vm568_vm0, %v9871_v50  ;;  %v9807_v40 = vpop.permute.xlu1 %9806 }
 0x71e   : > { %9886 = vst.msk [vmem:[%s17088_s13 + $0x60] sm:$0xff] %vm568_vm0, %v9870_v39  ;;  %v9857_v37 = vsel %vm9841_vm2, %v9840_v41, %v9807_v40  ;;  %v9805_v53 = vpop.permute.xlu0 %9804 }
 0x71f   : > { %v9873_v60 = vmax.f32 %v9857_v37, 0.0  ;;  %v9856_v54 = vsel %vm9841_vm2, %v9839_v43, %v9805_v53 }
 0x720   : > { %v9872_v36 = vmax.f32 %v9856_v54, 0.0 }
 0x721   : > { %9889 = vst.msk [vmem:[%s17088_s13 + $0x78] sm:$0xff] %vm568_vm0, %v9873_v60 }
 0x722   : > { %9888 = vst.msk [vmem:[%s17088_s13 + $0x70] sm:$0xff] %vm568_vm0, %v9872_v36 }
 0x723 PF: > { %s21_s21 = sadd.s32 1, %s13927_s21   ;;  %s17363_s17 = smov %s13919_s19 }
 0x724   : > { %p18_p7 = scmp.ge.s32.totalorder %s21_s21, 6   ;;  %s17364_s18 = smov %s13923_s20 }
 0x725   : > { %s17365_s19 = smov %s17368_s22  ;;  %s17366_s20 = smov %s17372_s23 }
 0x726   :  { %20 = sbr.rel (!%p18_p7) target bundleno = 3 (0x3), region = 135 }

</bundles_post_ra>
